<compile_context>
chip_gen: v6e
topology: v6e:2x2x1
jax: 0.10.0
libtpu: 0.0.40
codegen_flags: <defaults>
</compile_context>

<pallas_src>
import numpy as np
import jax
import jax.numpy as jnp
from jax.experimental import pallas as pl
from jax.experimental.pallas import tpu as pltpu


BACKBONE_CHANNELS = (16, 32, 64, 128)   # backbone.channels  ->  c3=64, c4=128
BACKBONE_STRIDES = (4, 8, 16, 32)

# Operand dtype fed to the 3x3-conv MXU dots (accumulation stays float32).
MXU_DTYPE = jnp.bfloat16


# ---------------------------------------------------------------------------
# small helpers
# ---------------------------------------------------------------------------

def _pad_off(W):
    """Interior row offset inside the padded slab (aligned when W % 8 == 0)."""
    return W + 8


def _pad_len(HW, W):
    """Total rows of the padded slab (covers every tap the 3x3 conv reads)."""
    return _pad_off(W) + HW + W + 8


def _param_spec(a):
    """Whole-array BlockSpec for a parameter (same block for every grid step)."""
    nd = a.ndim
    return pl.BlockSpec(a.shape, lambda n, _nd=nd: (0,) * _nd)


def _compiler_params():
    """Explicit scoped-VMEM limit (review #8); falls back to defaults."""
    limit = None
    try:
        cap = int(pltpu.get_tpu_info().vmem_capacity_bytes)
        if cap > 0:
            limit = (cap * 3) // 4
    except Exception:
        limit = None
    return pltpu.CompilerParams(dimension_semantics=("parallel",),
                                vmem_limit_bytes=limit)


def _bilinear_matrix_np(n_in, n_out):
    """Separable bilinear interpolation matrix, PyTorch align_corners=True."""
    m = np.zeros((n_out, n_in), dtype=np.float64)
    if n_in == 1:
        m[:, 0] = 1.0
        return m
    scale = (n_in - 1) / (n_out - 1)
    for o in range(n_out):
        src = o * scale
        i0 = min(int(np.floor(src)), n_in - 2)
        frac = src - i0
        m[o, i0] += 1.0 - frac
        m[o, i0 + 1] += frac
    return m


def _w_index(HW, W, Cout):
    """In-kernel [HW, Cout] map of the within-row (w) coordinate.

    Replaces the old [HW,1] f32 mask *inputs* (lane-padded to 128 in VMEM and
    DMA'd from HBM every call) with a few VPU ops on values (review #2).
    """
    r = jax.lax.broadcasted_iota(jnp.int32, (HW, Cout), 0)
    if W & (W - 1) == 0:               # power of two -> strength-reduce the mod
        return r & (W - 1)
    return r % W


def _zero_halo(xpf_ref, off, HW, W, C):
    """Zero only the halo rows the conv taps can read, not the whole slab."""
    xpf_ref[pl.ds(0, off), :] = jnp.zeros((off, C), jnp.float32)
    xpf_ref[pl.ds(off + HW, W + 8), :] = jnp.zeros((W + 8, C), jnp.float32)


def _conv3x3_flat(xpf_ref, w3_ref, HW, W, Cout, off):
    """3x3 / stride 1 / pad 1 conv as 9 whole-image [HW,Cin]x[Cin,Cout] matmuls.

    xpf_ref is the row-major flattened, zero-haloed image: interior row r
    lives at slab row `off + r`.  For tap (dy,dx) the input for output row r
    is slab row off + (dy-1)*W + (dx-1) + r, i.e. one contiguous [HW, Cin]
    slice per tap.  W-border wrap-around of the dx=0 / dx=2 columns is
    cancelled with in-kernel iota masks.  Returns f32 [HW, Cout].
    """
    w_idx = _w_index(HW, W, Cout)

    def col_sum(dx):
        a = None
        for dy in range(3):
            start = off + (dy - 1) * W + (dx - 1)
            tap = xpf_ref[pl.ds(start, HW), :].astype(MXU_DTYPE)
            t = jnp.dot(tap, w3_ref[dy * 3 + dx],
                        preferred_element_type=jnp.float32)
            a = t if a is None else a + t
        return a

    # single running accumulator; each column group masked as it is finished
    acc = col_sum(1)
    acc = acc + jnp.where(w_idx == 0, 0.0, col_sum(0))
    acc = acc + jnp.where(w_idx == W - 1, 0.0, col_sum(2))
    return acc


# ---------------------------------------------------------------------------
# Pallas kernels
# ---------------------------------------------------------------------------

def _make_arm_kernel(H, W, Cin, Cout, with_gc):
    """AttentionRefinmentModule (optionally fused with global_context + add)."""
    HW = H * W
    OFF = _pad_off(W)
    inv_hw = 1.0 / float(HW)

    def kernel(x_ref, w3_ref, sA_ref, bA_ref, w1_ref, sB_ref, bB_ref, *rest):
        if with_gc:
            wg_ref, sG_ref, bG_ref, out_ref, xpf_ref = rest
        else:
            out_ref, xpf_ref = rest

        x = x_ref[0]                                           # [HW, Cin] f32

        # halo-only zeroing + aligned interior store into the VMEM scratch
        _zero_halo(xpf_ref, OFF, HW, W, Cin)
        xpf_ref[pl.ds(OFF, HW), :] = x

        # fm = ReLU(BN(conv3x3(x))) as one [HW, Cout] slab
        acc = _conv3x3_flat(xpf_ref, w3_ref, HW, W, Cout, OFF)
        fm = jnp.maximum(acc * sA_ref[...] + bA_ref[...], 0.0)

        # attention: global avg pool -> 1x1 conv (no bias) -> BN -> sigmoid
        pooled = jnp.sum(fm, axis=0, keepdims=True) * inv_hw   # [1, Cout]
        se = jax.nn.sigmoid(
            jnp.dot(pooled, w1_ref[...], preferred_element_type=jnp.float32)
            * sB_ref[...] + bB_ref[...])                       # [1, Cout]

        out = fm * se
        if with_gc:
            # global_context on the *input*: avg-pool -> 1x1 conv + BN + ReLU.
            # Bilinear resize (align_corners=True) from 1x1 is a broadcast.
            xpool = jnp.sum(x, axis=0, keepdims=True) * inv_hw  # [1, Cin]
            g = jnp.maximum(
                jnp.dot(xpool, wg_ref[...], preferred_element_type=jnp.float32)
                * sG_ref[...] + bG_ref[...], 0.0)               # [1, Cout]
            out = out + g

        out_ref[0] = out

    return kernel


def _make_up_refine_kernel(H, W, C, Cout, with_add):
    """(optional add) -> bilinear 2x upsample -> 3x3 conv + BN + ReLU, fused."""
    Ho, Wo = 2 * H, 2 * W
    HWo = Ho * Wo
    OFF = _pad_off(Wo)
    Uh = _bilinear_matrix_np(H, Ho)          # trace-time constants
    # per output row: the (at most two) contributing input rows and weights
    htaps = [[(h, float(Uh[o, h])) for h in range(H) if Uh[o, h] != 0.0]
             for o in range(Ho)]

    def kernel(*args):
        if with_add:
            (a_ref, b_ref, uw_ref, w3_ref, s_ref, bi_ref,
             out_ref, xpf_ref) = args
        else:
            (a_ref, uw_ref, w3_ref, s_ref, bi_ref, out_ref, xpf_ref) = args

        _zero_halo(xpf_ref, OFF, HWo, Wo, C)

        # hoisted elementwise add: each input element is added exactly once
        xs = a_ref[0]                                          # [HW, C] f32
        if with_add:
            xs = xs + b_ref[0]

        uw = uw_ref[...]                                       # [Wo, W]

        # W-direction first: one [Wo,W]x[W,C] MXU matmul per *input* row
        # (H matmuls instead of Ho).
        wrows = [jnp.dot(uw, xs[h * W:(h + 1) * W, :],
                         preferred_element_type=jnp.float32)
                 for h in range(H)]                            # H x [Wo, C]

        # H-direction: <=2 weighted row adds per output row, stored at
        # Wo-aligned offsets straight into the padded conv scratch.
        # TODO(synk): at real resolutions convert this unroll into a
        # fori_loop / row-tile grid axis (Ho is <= 8 at the test shapes).
        for o in range(Ho):
            row = None
            for h, wgt in htaps[o]:
                t = wgt * wrows[h]
                row = t if row is None else row + t
            xpf_ref[pl.ds(OFF + o * Wo, Wo), :] = row

        # refine conv on the upsampled slab (never leaves VMEM)
        acc = _conv3x3_flat(xpf_ref, w3_ref, HWo, Wo, Cout, OFF)
        out_ref[0] = jnp.maximum(acc * s_ref[...] + bi_ref[...], 0.0)

    return kernel


# ---------------------------------------------------------------------------
# pallas_call wrappers (NHWC in / out)
# ---------------------------------------------------------------------------

def arm_forward(x, p, gc=None):
    N, H, W, Cin = x.shape
    Cout = p['w3'].shape[-1]
    HW = H * W
    xf = x.reshape(N, HW, Cin)
    w3 = p['w3'].astype(MXU_DTYPE)
    args = [xf, w3, p['sA'], p['bA'], p['w1'], p['sB'], p['bB']]
    if gc is not None:
        args += [gc['w'], gc['s'], gc['b']]
    in_specs = [pl.BlockSpec((1, HW, Cin), lambda n: (n, 0, 0))]
    in_specs += [_param_spec(a) for a in args[1:]]
    out = pl.pallas_call(
        _make_arm_kernel(H, W, Cin, Cout, with_gc=gc is not None),
        out_shape=jax.ShapeDtypeStruct((N, HW, Cout), jnp.float32),
        grid_spec=pltpu.PrefetchScalarGridSpec(
            num_scalar_prefetch=0, grid=(N,),
            in_specs=in_specs,
            out_specs=pl.BlockSpec((1, HW, Cout), lambda n: (n, 0, 0)),
            scratch_shapes=[pltpu.VMEM((_pad_len(HW, W), Cin), jnp.float32)]),
        compiler_params=_compiler_params(),
    )(*args)
    return out.reshape(N, H, W, Cout)


def upsample2x_refine(a, p, add=None):
    """(a [+ add]) -> bilinear 2x upsample -> ConvModule(128,128,3,1,1)."""
    N, H, W, C = a.shape
    Cout = p['w3'].shape[-1]
    Ho, Wo = 2 * H, 2 * W
    HWo = Ho * Wo
    args = [a.reshape(N, H * W, C)]
    if add is not None:
        args.append(add.reshape(N, H * W, C))
    uw = jnp.asarray(_bilinear_matrix_np(W, Wo), jnp.float32)
    w3 = p['w3'].astype(MXU_DTYPE)
    args += [uw, w3, p['s'], p['b']]
    n_x = 2 if add is not None else 1
    xspec = pl.BlockSpec((1, H * W, C), lambda n: (n, 0, 0))
    in_specs = [xspec] * n_x + [_param_spec(a) for a in args[n_x:]]
    out = pl.pallas_call(
        _make_up_refine_kernel(H, W, C, Cout, with_add=add is not None),
        out_shape=jax.ShapeDtypeStruct((N, HWo, Cout), jnp.float32),
        grid_spec=pltpu.PrefetchScalarGridSpec(
            num_scalar_prefetch=0, grid=(N,),
            in_specs=in_specs,
            out_specs=pl.BlockSpec((1, HWo, Cout), lambda n: (n, 0, 0)),
            scratch_shapes=[pltpu.VMEM((_pad_len(HWo, Wo), C), jnp.float32)]),
        compiler_params=_compiler_params(),
    )(*args)
    return out.reshape(N, Ho, Wo, Cout)


# ---------------------------------------------------------------------------
# parameters (deterministic, synthetic) and plain-JAX glue
# ---------------------------------------------------------------------------

def _bn_fold(key, c, eps=1e-5):
    k1, k2, k3, k4 = jax.random.split(key, 4)
    gamma = 1.0 + 0.1 * jax.random.normal(k1, (c,), jnp.float32)
    beta = 0.1 * jax.random.normal(k2, (c,), jnp.float32)
    mean = 0.1 * jax.random.normal(k3, (c,), jnp.float32)
    var = 1.0 + 0.1 * jax.random.uniform(k4, (c,), jnp.float32)
    scale = gamma / jnp.sqrt(var + eps)
    bias = beta - mean * scale
    return scale.reshape(1, c), bias.reshape(1, c)


def _conv_module_params(key, cin, cout):
    kw, kb = jax.random.split(key)
    w3 = jax.random.normal(kw, (9, cin, cout), jnp.float32) / np.sqrt(9 * cin)
    s, b = _bn_fold(kb, cout)
    return {'w3': w3, 's': s, 'b': b}


def _arm_params(key, cin, cout):
    k1, k2, k3 = jax.random.split(key, 3)
    cm = _conv_module_params(k1, cin, cout)
    w1 = jax.random.normal(k2, (cout, cout), jnp.float32) / np.sqrt(cout)
    sB, bB = _bn_fold(k3, cout)
    return {'w3': cm['w3'], 'sA': cm['s'], 'bA': cm['b'],
            'w1': w1, 'sB': sB, 'bB': bB}


def _gc_params(key, cin, cout):
    k1, k2 = jax.random.split(key)
    w = jax.random.normal(k1, (cin, cout), jnp.float32) / np.sqrt(cin)
    s, b = _bn_fold(k2, cout)
    return {'w': w, 's': s, 'b': b}


def make_params(key):
    c3, c4 = BACKBONE_CHANNELS[-2:]
    ks = jax.random.split(key, 6)
    bb = [jax.random.normal(jax.random.fold_in(ks[0], i), (3, c), jnp.float32) * 0.5
          for i, c in enumerate(BACKBONE_CHANNELS)]
    return {
        'backbone': bb,
        'arm16': _arm_params(ks[1], c3, 128),
        'arm32': _arm_params(ks[2], c4, 128),
        'gc': _gc_params(ks[3], c4, 128),
        'refine16': _conv_module_params(ks[4], 128, 128),
        'refine32': _conv_module_params(ks[5], 128, 128),
    }


def synthetic_backbone(x_nchw, bb_weights):
    # TODO(synk): the real backbone is an injected nn.Module; this is a
    # deterministic plain-JAX stand-in producing the 4 pyramid features (NHWC).
    x = jnp.transpose(x_nchw, (0, 2, 3, 1)).astype(jnp.float32)
    feats = []
    for w, stride in zip(bb_weights, BACKBONE_STRIDES):
        N, H, W, C = x.shape
        p = jnp.mean(x.reshape(N, H // stride, stride, W // stride, stride, C),
                     axis=(2, 4))
        feats.append(jnp.tanh(jnp.einsum('nhwc,co->nhwo', p, w)))
    return feats


def context_path_forward(x_nchw, params):
    """Pallas implementation of ContextPath.forward (returns NCHW tensors)."""
    feats = synthetic_backbone(x_nchw, params['backbone'])
    down16, down32 = feats[-2], feats[-1]

    arm_down16 = arm_forward(down16, params['arm16'])
    # arm32 kernel fuses:  arm32(down32) + global_context(down32) (broadcast)
    arm_down32 = arm_forward(down32, params['arm32'], gc=params['gc'])
    # fused:  up32 -> refine32
    arm_down32 = upsample2x_refine(arm_down32, params['refine32'])
    # fused:  (+ arm_down32) -> up16 -> refine16
    arm_down16 = upsample2x_refine(arm_down16, params['refine16'],
                                   add=arm_down32)
    return (jnp.transpose(arm_down16, (0, 3, 1, 2)),
            jnp.transpose(arm_down32, (0, 3, 1, 2)))


# ---------------------------------------------------------------------------
# pure-JAX reference (for correctness checking)
# ---------------------------------------------------------------------------

def _ref_conv3x3_bn_relu(x, w3, s, b):
    cin, cout = w3.shape[1], w3.shape[2]
    w = w3.reshape(3, 3, cin, cout)
    y = jax.lax.conv_general_dilated(x, w, (1, 1), ((1, 1), (1, 1)),
                                     dimension_numbers=('NHWC', 'HWIO', 'NHWC'))
    return jnp.maximum(y * s.reshape(1, 1, 1, cout) + b.reshape(1, 1, 1, cout), 0.0)


def _ref_arm(x, p, gc=None):
    fm = _ref_conv3x3_bn_relu(x, p['w3'], p['sA'], p['bA'])
    pooled = jnp.mean(fm, axis=(1, 2))
    se = jax.nn.sigmoid(pooled @ p['w1'] * p['sB'] + p['bB'])
    out = fm * se[:, None, None, :]
    if gc is not None:
        xp = jnp.mean(x, axis=(1, 2))
        g = jnp.maximum(xp @ gc['w'] * gc['s'] + gc['b'], 0.0)
        out = out + g[:, None, None, :]
    return out


def _ref_upsample(x, add=None):
    if add is not None:
        x = x + add
    N, H, W, C = x.shape
    Uh = jnp.asarray(_bilinear_matrix_np(H, 2 * H), jnp.float32)
    Uw = jnp.asarray(_bilinear_matrix_np(W, 2 * W), jnp.float32)
    return jnp.einsum('oh,pw,nhwc->nopc', Uh, Uw, x)


def context_path_reference(x_nchw, params):
    feats = synthetic_backbone(x_nchw, params['backbone'])
    down16, down32 = feats[-2], feats[-1]
    a16 = _ref_arm(down16, params['arm16'])
    a32 = _ref_arm(down32, params['arm32'], gc=params['gc'])
    a32 = _ref_upsample(a32)
    a32 = _ref_conv3x3_bn_relu(a32, params['refine32']['w3'],
                               params['refine32']['s'], params['refine32']['b'])
    a16 = _ref_upsample(a16, add=a32)
    a16 = _ref_conv3x3_bn_relu(a16, params['refine16']['w3'],
                               params['refine16']['s'], params['refine16']['b'])
    return jnp.transpose(a16, (0, 3, 1, 2)), jnp.transpose(a32, (0, 3, 1, 2))


# ---------------------------------------------------------------------------

if __name__ == "__main__":
    key = jax.random.PRNGKey(0)
    N, Cx, Hx, Wx = 2, 3, 64, 64                      # down16: 4x4, down32: 2x2
    x = jax.random.normal(key, (N, Cx, Hx, Wx), jnp.float32)
    params = make_params(jax.random.PRNGKey(1))

    fwd = jax.jit(lambda xx: context_path_forward(xx, params))
    out16, out32 = fwd(x)
    jax.block_until_ready((out16, out32))

    ref16, ref32 = context_path_reference(x, params)
    # bf16 MXU operands (f32 accumulation) -> slightly looser tolerance than
    # a pure-f32 run (set MXU_DTYPE = jnp.float32 for 1e-3 agreement).
    np.testing.assert_allclose(np.asarray(out16), np.asarray(ref16),
                               rtol=2e-2, atol=2e-2)
    np.testing.assert_allclose(np.asarray(out32), np.asarray(ref32),
                               rtol=2e-2, atol=2e-2)
    assert out16.shape == (N, 128, 8, 8) and out32.shape == (N, 128, 4, 4)
    print("KERNEL_OK")
</pallas_src>

<mosaic_0001>
module attributes {stable_mosaic.version = 11 : i64} {
  func.func @kernel(%arg0: i32, %arg1: memref<1x16x64xf32, #tpu.memory_space<vmem>>, %arg2: memref<9x64x128xbf16, #tpu.memory_space<vmem>>, %arg3: memref<1x128xf32, #tpu.memory_space<vmem>>, %arg4: memref<1x128xf32, #tpu.memory_space<vmem>>, %arg5: memref<128x128xf32, #tpu.memory_space<vmem>>, %arg6: memref<1x128xf32, #tpu.memory_space<vmem>>, %arg7: memref<1x128xf32, #tpu.memory_space<vmem>>, %arg8: memref<1x16x128xf32, #tpu.memory_space<vmem>>, %arg9: memref<40x64xf32, #tpu.memory_space<vmem>>) attributes {dimension_semantics = [#tpu.dimension_semantics<parallel>], iteration_bounds = array<i64: 2>, scalar_prefetch = 0 : i64, scratch_operands = 1 : i64, tpu.core_type = #tpu.core_type<tc>, window_params = [{transform_indices = @transform_0, window_bounds = array<i64: 1, 16, 64>}, {pipeline_mode = #tpu.pipeline_mode<synchronous>, transform_indices = @transform_1, window_bounds = array<i64: 9, 64, 128>}, {pipeline_mode = #tpu.pipeline_mode<synchronous>, transform_indices = @transform_2, window_bounds = array<i64: 1, 128>}, {pipeline_mode = #tpu.pipeline_mode<synchronous>, transform_indices = @transform_3, window_bounds = array<i64: 1, 128>}, {pipeline_mode = #tpu.pipeline_mode<synchronous>, transform_indices = @transform_4, window_bounds = array<i64: 128, 128>}, {pipeline_mode = #tpu.pipeline_mode<synchronous>, transform_indices = @transform_5, window_bounds = array<i64: 1, 128>}, {pipeline_mode = #tpu.pipeline_mode<synchronous>, transform_indices = @transform_6, window_bounds = array<i64: 1, 128>}, {transform_indices = @transform_7, window_bounds = array<i64: 1, 16, 128>}]} {
    %c0 = arith.constant 0 : index
    %c0_0 = arith.constant 0 : index
    %c0_1 = arith.constant 0 : index
    %0 = vector.load %arg1[%c0, %c0_0, %c0_1] : memref<1x16x64xf32, #tpu.memory_space<vmem>>, vector<1x16x64xf32>
    %1 = vector.shape_cast %0 : vector<1x16x64xf32> to vector<16x64xf32>
    %cst = arith.constant 0.000000e+00 : f32
    %2 = vector.broadcast %cst : f32 to vector<12x64xf32>
    %c0_2 = arith.constant 0 : index
    %c0_3 = arith.constant 0 : index
    %3 = vector.load %arg9[%c0_2, %c0_3] : memref<40x64xf32, #tpu.memory_space<vmem>>, vector<12x64xf32>
    tpu.vector_store %arg9[%c0_2, %c0_3], %2 {strides = array<i32>} : memref<40x64xf32, #tpu.memory_space<vmem>>, vector<12x64xf32>,
    %cst_4 = arith.constant 0.000000e+00 : f32
    %4 = vector.broadcast %cst_4 : f32 to vector<12x64xf32>
    %c28 = arith.constant 28 : index
    %c0_5 = arith.constant 0 : index
    %5 = vector.load %arg9[%c28, %c0_5] : memref<40x64xf32, #tpu.memory_space<vmem>>, vector<12x64xf32>
    tpu.vector_store %arg9[%c28, %c0_5], %4 {strides = array<i32>} : memref<40x64xf32, #tpu.memory_space<vmem>>, vector<12x64xf32>,
    %c12 = arith.constant 12 : index
    %c0_6 = arith.constant 0 : index
    %6 = vector.load %arg9[%c12, %c0_6] : memref<40x64xf32, #tpu.memory_space<vmem>>, vector<16x64xf32>
    tpu.vector_store %arg9[%c12, %c0_6], %1 {strides = array<i32>} : memref<40x64xf32, #tpu.memory_space<vmem>>, vector<16x64xf32>,
    %7 = tpu.iota {dimensions = array<i32: 0>} : vector<16x128xi32>
    %c3_i32 = arith.constant 3 : i32
    %8 = vector.broadcast %c3_i32 : i32 to vector<16x128xi32>
    %9 = arith.andi %7, %8 : vector<16x128xi32>
    %c8 = arith.constant 8 : index
    %c0_7 = arith.constant 0 : index
    %10 = vector.load %arg9[%c8, %c0_7] : memref<40x64xf32, #tpu.memory_space<vmem>>, vector<16x64xf32>
    %11 = arith.truncf %10 : vector<16x64xf32> to vector<16x64xbf16>
    %c1 = arith.constant 1 : index
    %c0_8 = arith.constant 0 : index
    %c0_9 = arith.constant 0 : index
    %12 = vector.load %arg2[%c1, %c0_8, %c0_9] : memref<9x64x128xbf16, #tpu.memory_space<vmem>>, vector<1x64x128xbf16>
    %13 = vector.shape_cast %12 : vector<1x64x128xbf16> to vector<64x128xbf16>
    %cst_10 = arith.constant dense<0.000000e+00> : vector<16x128xf32>
    %14 = tpu.matmul %11, %13, %cst_10 {dimension_numbers = #tpu.dot_dimension_numbers<[1], [0], [0], [1], [0, 0, 1, 1], [], []>} : vector<16x64xbf16>, vector<64x128xbf16>, vector<16x128xf32> -> vector<16x128xf32>
    %c12_11 = arith.constant 12 : index
    %c0_12 = arith.constant 0 : index
    %15 = vector.load %arg9[%c12_11, %c0_12] : memref<40x64xf32, #tpu.memory_space<vmem>>, vector<16x64xf32>
    %16 = arith.truncf %15 : vector<16x64xf32> to vector<16x64xbf16>
    %c4 = arith.constant 4 : index
    %c0_13 = arith.constant 0 : index
    %c0_14 = arith.constant 0 : index
    %17 = vector.load %arg2[%c4, %c0_13, %c0_14] : memref<9x64x128xbf16, #tpu.memory_space<vmem>>, vector<1x64x128xbf16>
    %18 = vector.shape_cast %17 : vector<1x64x128xbf16> to vector<64x128xbf16>
    %cst_15 = arith.constant dense<0.000000e+00> : vector<16x128xf32>
    %19 = tpu.matmul %16, %18, %cst_15 {dimension_numbers = #tpu.dot_dimension_numbers<[1], [0], [0], [1], [0, 0, 1, 1], [], []>} : vector<16x64xbf16>, vector<64x128xbf16>, vector<16x128xf32> -> vector<16x128xf32>
    %20 = arith.addf %14, %19 : vector<16x128xf32>
    %c16 = arith.constant 16 : index
    %c0_16 = arith.constant 0 : index
    %21 = vector.load %arg9[%c16, %c0_16] : memref<40x64xf32, #tpu.memory_space<vmem>>, vector<16x64xf32>
    %22 = arith.truncf %21 : vector<16x64xf32> to vector<16x64xbf16>
    %c7 = arith.constant 7 : index
    %c0_17 = arith.constant 0 : index
    %c0_18 = arith.constant 0 : index
    %23 = vector.load %arg2[%c7, %c0_17, %c0_18] : memref<9x64x128xbf16, #tpu.memory_space<vmem>>, vector<1x64x128xbf16>
    %24 = vector.shape_cast %23 : vector<1x64x128xbf16> to vector<64x128xbf16>
    %cst_19 = arith.constant dense<0.000000e+00> : vector<16x128xf32>
    %25 = tpu.matmul %22, %24, %cst_19 {dimension_numbers = #tpu.dot_dimension_numbers<[1], [0], [0], [1], [0, 0, 1, 1], [], []>} : vector<16x64xbf16>, vector<64x128xbf16>, vector<16x128xf32> -> vector<16x128xf32>
    %26 = arith.addf %20, %25 : vector<16x128xf32>
    %c0_i32 = arith.constant 0 : i32
    %27 = vector.broadcast %c0_i32 : i32 to vector<16x128xi32>
    %28 = arith.cmpi eq, %9, %27 : vector<16x128xi32>
    %c7_20 = arith.constant 7 : index
    %c0_21 = arith.constant 0 : index
    %29 = vector.load %arg9[%c7_20, %c0_21] : memref<40x64xf32, #tpu.memory_space<vmem>>, vector<16x64xf32>
    %30 = arith.truncf %29 : vector<16x64xf32> to vector<16x64xbf16>
    %c0_22 = arith.constant 0 : index
    %c0_23 = arith.constant 0 : index
    %c0_24 = arith.constant 0 : index
    %31 = vector.load %arg2[%c0_22, %c0_23, %c0_24] : memref<9x64x128xbf16, #tpu.memory_space<vmem>>, vector<1x64x128xbf16>
    %32 = vector.shape_cast %31 : vector<1x64x128xbf16> to vector<64x128xbf16>
    %cst_25 = arith.constant dense<0.000000e+00> : vector<16x128xf32>
    %33 = tpu.matmul %30, %32, %cst_25 {dimension_numbers = #tpu.dot_dimension_numbers<[1], [0], [0], [1], [0, 0, 1, 1], [], []>} : vector<16x64xbf16>, vector<64x128xbf16>, vector<16x128xf32> -> vector<16x128xf32>
    %c11 = arith.constant 11 : index
    %c0_26 = arith.constant 0 : index
    %34 = vector.load %arg9[%c11, %c0_26] : memref<40x64xf32, #tpu.memory_space<vmem>>, vector<16x64xf32>
    %35 = arith.truncf %34 : vector<16x64xf32> to vector<16x64xbf16>
    %c3 = arith.constant 3 : index
    %c0_27 = arith.constant 0 : index
    %c0_28 = arith.constant 0 : index
    %36 = vector.load %arg2[%c3, %c0_27, %c0_28] : memref<9x64x128xbf16, #tpu.memory_space<vmem>>, vector<1x64x128xbf16>
    %37 = vector.shape_cast %36 : vector<1x64x128xbf16> to vector<64x128xbf16>
    %cst_29 = arith.constant dense<0.000000e+00> : vector<16x128xf32>
    %38 = tpu.matmul %35, %37, %cst_29 {dimension_numbers = #tpu.dot_dimension_numbers<[1], [0], [0], [1], [0, 0, 1, 1], [], []>} : vector<16x64xbf16>, vector<64x128xbf16>, vector<16x128xf32> -> vector<16x128xf32>
    %39 = arith.addf %33, %38 : vector<16x128xf32>
    %c15 = arith.constant 15 : index
    %c0_30 = arith.constant 0 : index
    %40 = vector.load %arg9[%c15, %c0_30] : memref<40x64xf32, #tpu.memory_space<vmem>>, vector<16x64xf32>
    %41 = arith.truncf %40 : vector<16x64xf32> to vector<16x64xbf16>
    %c6 = arith.constant 6 : index
    %c0_31 = arith.constant 0 : index
    %c0_32 = arith.constant 0 : index
    %42 = vector.load %arg2[%c6, %c0_31, %c0_32] : memref<9x64x128xbf16, #tpu.memory_space<vmem>>, vector<1x64x128xbf16>
    %43 = vector.shape_cast %42 : vector<1x64x128xbf16> to vector<64x128xbf16>
    %cst_33 = arith.constant dense<0.000000e+00> : vector<16x128xf32>
    %44 = tpu.matmul %41, %43, %cst_33 {dimension_numbers = #tpu.dot_dimension_numbers<[1], [0], [0], [1], [0, 0, 1, 1], [], []>} : vector<16x64xbf16>, vector<64x128xbf16>, vector<16x128xf32> -> vector<16x128xf32>
    %45 = arith.addf %39, %44 : vector<16x128xf32>
    %cst_34 = arith.constant 0.000000e+00 : f32
    %46 = vector.broadcast %cst_34 : f32 to vector<16x128xf32>
    %47 = arith.select %28, %46, %45 : vector<16x128xi1>, vector<16x128xf32>
    %48 = arith.addf %26, %47 : vector<16x128xf32>
    %c3_i32_35 = arith.constant 3 : i32
    %49 = vector.broadcast %c3_i32_35 : i32 to vector<16x128xi32>
    %50 = arith.cmpi eq, %9, %49 : vector<16x128xi32>
    %c9 = arith.constant 9 : index
    %c0_36 = arith.constant 0 : index
    %51 = vector.load %arg9[%c9, %c0_36] : memref<40x64xf32, #tpu.memory_space<vmem>>, vector<16x64xf32>
    %52 = arith.truncf %51 : vector<16x64xf32> to vector<16x64xbf16>
    %c2 = arith.constant 2 : index
    %c0_37 = arith.constant 0 : index
    %c0_38 = arith.constant 0 : index
    %53 = vector.load %arg2[%c2, %c0_37, %c0_38] : memref<9x64x128xbf16, #tpu.memory_space<vmem>>, vector<1x64x128xbf16>
    %54 = vector.shape_cast %53 : vector<1x64x128xbf16> to vector<64x128xbf16>
    %cst_39 = arith.constant dense<0.000000e+00> : vector<16x128xf32>
    %55 = tpu.matmul %52, %54, %cst_39 {dimension_numbers = #tpu.dot_dimension_numbers<[1], [0], [0], [1], [0, 0, 1, 1], [], []>} : vector<16x64xbf16>, vector<64x128xbf16>, vector<16x128xf32> -> vector<16x128xf32>
    %c13 = arith.constant 13 : index
    %c0_40 = arith.constant 0 : index
    %56 = vector.load %arg9[%c13, %c0_40] : memref<40x64xf32, #tpu.memory_space<vmem>>, vector<16x64xf32>
    %57 = arith.truncf %56 : vector<16x64xf32> to vector<16x64xbf16>
    %c5 = arith.constant 5 : index
    %c0_41 = arith.constant 0 : index
    %c0_42 = arith.constant 0 : index
    %58 = vector.load %arg2[%c5, %c0_41, %c0_42] : memref<9x64x128xbf16, #tpu.memory_space<vmem>>, vector<1x64x128xbf16>
    %59 = vector.shape_cast %58 : vector<1x64x128xbf16> to vector<64x128xbf16>
    %cst_43 = arith.constant dense<0.000000e+00> : vector<16x128xf32>
    %60 = tpu.matmul %57, %59, %cst_43 {dimension_numbers = #tpu.dot_dimension_numbers<[1], [0], [0], [1], [0, 0, 1, 1], [], []>} : vector<16x64xbf16>, vector<64x128xbf16>, vector<16x128xf32> -> vector<16x128xf32>
    %61 = arith.addf %55, %60 : vector<16x128xf32>
    %c17 = arith.constant 17 : index
    %c0_44 = arith.constant 0 : index
    %62 = vector.load %arg9[%c17, %c0_44] : memref<40x64xf32, #tpu.memory_space<vmem>>, vector<16x64xf32>
    %63 = arith.truncf %62 : vector<16x64xf32> to vector<16x64xbf16>
    %c8_45 = arith.constant 8 : index
    %c0_46 = arith.constant 0 : index
    %c0_47 = arith.constant 0 : index
    %64 = vector.load %arg2[%c8_45, %c0_46, %c0_47] : memref<9x64x128xbf16, #tpu.memory_space<vmem>>, vector<1x64x128xbf16>
    %65 = vector.shape_cast %64 : vector<1x64x128xbf16> to vector<64x128xbf16>
    %cst_48 = arith.constant dense<0.000000e+00> : vector<16x128xf32>
    %66 = tpu.matmul %63, %65, %cst_48 {dimension_numbers = #tpu.dot_dimension_numbers<[1], [0], [0], [1], [0, 0, 1, 1], [], []>} : vector<16x64xbf16>, vector<64x128xbf16>, vector<16x128xf32> -> vector<16x128xf32>
    %67 = arith.addf %61, %66 : vector<16x128xf32>
    %cst_49 = arith.constant 0.000000e+00 : f32
    %68 = vector.broadcast %cst_49 : f32 to vector<16x128xf32>
    %69 = arith.select %50, %68, %67 : vector<16x128xi1>, vector<16x128xf32>
    %70 = arith.addf %48, %69 : vector<16x128xf32>
    %c0_50 = arith.constant 0 : index
    %c0_51 = arith.constant 0 : index
    %71 = vector.load %arg3[%c0_50, %c0_51] : memref<1x128xf32, #tpu.memory_space<vmem>>, vector<1x128xf32>
    %72 = vector.broadcast %71 : vector<1x128xf32> to vector<16x128xf32>
    %73 = arith.mulf %70, %72 : vector<16x128xf32>
    %c0_52 = arith.constant 0 : index
    %c0_53 = arith.constant 0 : index
    %74 = vector.load %arg4[%c0_52, %c0_53] : memref<1x128xf32, #tpu.memory_space<vmem>>, vector<1x128xf32>
    %75 = vector.broadcast %74 : vector<1x128xf32> to vector<16x128xf32>
    %76 = arith.addf %73, %75 : vector<16x128xf32>
    %cst_54 = arith.constant 0.000000e+00 : f32
    %77 = vector.broadcast %cst_54 : f32 to vector<16x128xf32>
    %78 = arith.maximumf %76, %77 : vector<16x128xf32>
    %cst_55 = arith.constant dense<0.000000e+00> : vector<128xf32>
    %79 = vector.multi_reduction <add>, %78, %cst_55 [0] : vector<16x128xf32> to vector<128xf32>
    %80 = vector.shape_cast %79 : vector<128xf32> to vector<1x128xf32>
    %cst_56 = arith.constant 6.250000e-02 : f32
    %81 = vector.broadcast %cst_56 : f32 to vector<1x128xf32>
    %82 = arith.mulf %80, %81 : vector<1x128xf32>
    %c0_57 = arith.constant 0 : index
    %c0_58 = arith.constant 0 : index
    %83 = vector.load %arg5[%c0_57, %c0_58] : memref<128x128xf32, #tpu.memory_space<vmem>>, vector<128x128xf32>
    %cst_59 = arith.constant dense<0.000000e+00> : vector<1x128xf32>
    %84 = tpu.matmul %82, %83, %cst_59 {dimension_numbers = #tpu.dot_dimension_numbers<[1], [0], [0], [1], [0, 0, 1, 1], [], []>} : vector<1x128xf32>, vector<128x128xf32>, vector<1x128xf32> -> vector<1x128xf32>
    %c0_60 = arith.constant 0 : index
    %c0_61 = arith.constant 0 : index
    %85 = vector.load %arg6[%c0_60, %c0_61] : memref<1x128xf32, #tpu.memory_space<vmem>>, vector<1x128xf32>
    %86 = arith.mulf %84, %85 : vector<1x128xf32>
    %c0_62 = arith.constant 0 : index
    %c0_63 = arith.constant 0 : index
    %87 = vector.load %arg7[%c0_62, %c0_63] : memref<1x128xf32, #tpu.memory_space<vmem>>, vector<1x128xf32>
    %88 = arith.addf %86, %87 : vector<1x128xf32>
    %89 = arith.negf %88 : vector<1x128xf32>
    %90 = math.exp %89 : vector<1x128xf32>
    %cst_64 = arith.constant 1.000000e+00 : f32
    %91 = vector.broadcast %cst_64 : f32 to vector<1x128xf32>
    %92 = arith.addf %91, %90 : vector<1x128xf32>
    %93 = arith.divf %91, %92 : vector<1x128xf32>
    %94 = vector.broadcast %93 : vector<1x128xf32> to vector<16x128xf32>
    %95 = arith.mulf %78, %94 : vector<16x128xf32>
    %c0_65 = arith.constant 0 : index
    %c0_66 = arith.constant 0 : index
    %c0_67 = arith.constant 0 : index
    %96 = vector.load %arg8[%c0_65, %c0_66, %c0_67] : memref<1x16x128xf32, #tpu.memory_space<vmem>>, vector<1x16x128xf32>
    %97 = vector.shape_cast %96 : vector<1x16x128xf32> to vector<16x128xf32>
    %98 = vector.shape_cast %95 : vector<16x128xf32> to vector<1x16x128xf32>
    tpu.vector_store %arg8[%c0_65, %c0_66, %c0_67], %98 {strides = array<i32>} : memref<1x16x128xf32, #tpu.memory_space<vmem>>, vector<1x16x128xf32>,
    return
  }
  func.func @transform_0(%arg0: i32) -> (i32, i32, i32) {
    %c0_i32 = arith.constant 0 : i32
    %c0_i32_0 = arith.constant 0 : i32
    %c0_i32_1 = arith.constant 0 : i32
    return %arg0, %c0_i32, %c0_i32_0 : i32, i32, i32
  }
  func.func @transform_1(%arg0: i32) -> (i32, i32, i32) {
    %c0_i32 = arith.constant 0 : i32
    %c0_i32_0 = arith.constant 0 : i32
    %c0_i32_1 = arith.constant 0 : i32
    %c0_i32_2 = arith.constant 0 : i32
    return %c0_i32, %c0_i32_0, %c0_i32_1 : i32, i32, i32
  }
  func.func @transform_2(%arg0: i32) -> (i32, i32) {
    %c0_i32 = arith.constant 0 : i32
    %c0_i32_0 = arith.constant 0 : i32
    %c0_i32_1 = arith.constant 0 : i32
    return %c0_i32, %c0_i32_0 : i32, i32
  }
  func.func @transform_3(%arg0: i32) -> (i32, i32) {
    %c0_i32 = arith.constant 0 : i32
    %c0_i32_0 = arith.constant 0 : i32
    %c0_i32_1 = arith.constant 0 : i32
    return %c0_i32, %c0_i32_0 : i32, i32
  }
  func.func @transform_4(%arg0: i32) -> (i32, i32) {
    %c0_i32 = arith.constant 0 : i32
    %c0_i32_0 = arith.constant 0 : i32
    %c0_i32_1 = arith.constant 0 : i32
    return %c0_i32, %c0_i32_0 : i32, i32
  }
  func.func @transform_5(%arg0: i32) -> (i32, i32) {
    %c0_i32 = arith.constant 0 : i32
    %c0_i32_0 = arith.constant 0 : i32
    %c0_i32_1 = arith.constant 0 : i32
    return %c0_i32, %c0_i32_0 : i32, i32
  }
  func.func @transform_6(%arg0: i32) -> (i32, i32) {
    %c0_i32 = arith.constant 0 : i32
    %c0_i32_0 = arith.constant 0 : i32
    %c0_i32_1 = arith.constant 0 : i32
    return %c0_i32, %c0_i32_0 : i32, i32
  }
  func.func @transform_7(%arg0: i32) -> (i32, i32, i32) {
    %c0_i32 = arith.constant 0 : i32
    %c0_i32_0 = arith.constant 0 : i32
    %c0_i32_1 = arith.constant 0 : i32
    return %arg0, %c0_i32, %c0_i32_0 : i32, i32, i32
  }
}

module attributes {stable_mosaic.version = 11 : i64} {
  func.func @kernel(%arg0: i32, %arg1: memref<1x4x128xf32, #tpu.memory_space<vmem>>, %arg2: memref<9x128x128xbf16, #tpu.memory_space<vmem>>, %arg3: memref<1x128xf32, #tpu.memory_space<vmem>>, %arg4: memref<1x128xf32, #tpu.memory_space<vmem>>, %arg5: memref<128x128xf32, #tpu.memory_space<vmem>>, %arg6: memref<1x128xf32, #tpu.memory_space<vmem>>, %arg7: memref<1x128xf32, #tpu.memory_space<vmem>>, %arg8: memref<128x128xf32, #tpu.memory_space<vmem>>, %arg9: memref<1x128xf32, #tpu.memory_space<vmem>>, %arg10: memref<1x128xf32, #tpu.memory_space<vmem>>, %arg11: memref<1x4x128xf32, #tpu.memory_space<vmem>>, %arg12: memref<24x128xf32, #tpu.memory_space<vmem>>) attributes {dimension_semantics = [#tpu.dimension_semantics<parallel>], iteration_bounds = array<i64: 2>, scalar_prefetch = 0 : i64, scratch_operands = 1 : i64, tpu.core_type = #tpu.core_type<tc>, window_params = [{transform_indices = @transform_0, window_bounds = array<i64: 1, 4, 128>}, {pipeline_mode = #tpu.pipeline_mode<synchronous>, transform_indices = @transform_1, window_bounds = array<i64: 9, 128, 128>}, {pipeline_mode = #tpu.pipeline_mode<synchronous>, transform_indices = @transform_2, window_bounds = array<i64: 1, 128>}, {pipeline_mode = #tpu.pipeline_mode<synchronous>, transform_indices = @transform_3, window_bounds = array<i64: 1, 128>}, {pipeline_mode = #tpu.pipeline_mode<synchronous>, transform_indices = @transform_4, window_bounds = array<i64: 128, 128>}, {pipeline_mode = #tpu.pipeline_mode<synchronous>, transform_indices = @transform_5, window_bounds = array<i64: 1, 128>}, {pipeline_mode = #tpu.pipeline_mode<synchronous>, transform_indices = @transform_6, window_bounds = array<i64: 1, 128>}, {pipeline_mode = #tpu.pipeline_mode<synchronous>, transform_indices = @transform_7, window_bounds = array<i64: 128, 128>}, {pipeline_mode = #tpu.pipeline_mode<synchronous>, transform_indices = @transform_8, window_bounds = array<i64: 1, 128>}, {pipeline_mode = #tpu.pipeline_mode<synchronous>, transform_indices = @transform_9, window_bounds = array<i64: 1, 128>}, {transform_indices = @transform_10, window_bounds = array<i64: 1, 4, 128>}]} {
    %c0 = arith.constant 0 : index
    %c0_0 = arith.constant 0 : index
    %c0_1 = arith.constant 0 : index
    %0 = vector.load %arg1[%c0, %c0_0, %c0_1] : memref<1x4x128xf32, #tpu.memory_space<vmem>>, vector<1x4x128xf32>
    %1 = vector.shape_cast %0 : vector<1x4x128xf32> to vector<4x128xf32>
    %cst = arith.constant 0.000000e+00 : f32
    %2 = vector.broadcast %cst : f32 to vector<10x128xf32>
    %c0_2 = arith.constant 0 : index
    %c0_3 = arith.constant 0 : index
    %3 = vector.load %arg12[%c0_2, %c0_3] : memref<24x128xf32, #tpu.memory_space<vmem>>, vector<10x128xf32>
    tpu.vector_store %arg12[%c0_2, %c0_3], %2 {strides = array<i32>} : memref<24x128xf32, #tpu.memory_space<vmem>>, vector<10x128xf32>,
    %cst_4 = arith.constant 0.000000e+00 : f32
    %4 = vector.broadcast %cst_4 : f32 to vector<10x128xf32>
    %c14 = arith.constant 14 : index
    %c0_5 = arith.constant 0 : index
    %5 = vector.load %arg12[%c14, %c0_5] : memref<24x128xf32, #tpu.memory_space<vmem>>, vector<10x128xf32>
    tpu.vector_store %arg12[%c14, %c0_5], %4 {strides = array<i32>} : memref<24x128xf32, #tpu.memory_space<vmem>>, vector<10x128xf32>,
    %c10 = arith.constant 10 : index
    %c0_6 = arith.constant 0 : index
    %6 = vector.load %arg12[%c10, %c0_6] : memref<24x128xf32, #tpu.memory_space<vmem>>, vector<4x128xf32>
    tpu.vector_store %arg12[%c10, %c0_6], %1 {strides = array<i32>} : memref<24x128xf32, #tpu.memory_space<vmem>>, vector<4x128xf32>,
    %7 = tpu.iota {dimensions = array<i32: 0>} : vector<4x128xi32>
    %c1_i32 = arith.constant 1 : i32
    %8 = vector.broadcast %c1_i32 : i32 to vector<4x128xi32>
    %9 = arith.andi %7, %8 : vector<4x128xi32>
    %c8 = arith.constant 8 : index
    %c0_7 = arith.constant 0 : index
    %10 = vector.load %arg12[%c8, %c0_7] : memref<24x128xf32, #tpu.memory_space<vmem>>, vector<4x128xf32>
    %11 = arith.truncf %10 : vector<4x128xf32> to vector<4x128xbf16>
    %c1 = arith.constant 1 : index
    %c0_8 = arith.constant 0 : index
    %c0_9 = arith.constant 0 : index
    %12 = vector.load %arg2[%c1, %c0_8, %c0_9] : memref<9x128x128xbf16, #tpu.memory_space<vmem>>, vector<1x128x128xbf16>
    %13 = vector.shape_cast %12 : vector<1x128x128xbf16> to vector<128x128xbf16>
    %cst_10 = arith.constant dense<0.000000e+00> : vector<4x128xf32>
    %14 = tpu.matmul %11, %13, %cst_10 {dimension_numbers = #tpu.dot_dimension_numbers<[1], [0], [0], [1], [0, 0, 1, 1], [], []>} : vector<4x128xbf16>, vector<128x128xbf16>, vector<4x128xf32> -> vector<4x128xf32>
    %c10_11 = arith.constant 10 : index
    %c0_12 = arith.constant 0 : index
    %15 = vector.load %arg12[%c10_11, %c0_12] : memref<24x128xf32, #tpu.memory_space<vmem>>, vector<4x128xf32>
    %16 = arith.truncf %15 : vector<4x128xf32> to vector<4x128xbf16>
    %c4 = arith.constant 4 : index
    %c0_13 = arith.constant 0 : index
    %c0_14 = arith.constant 0 : index
    %17 = vector.load %arg2[%c4, %c0_13, %c0_14] : memref<9x128x128xbf16, #tpu.memory_space<vmem>>, vector<1x128x128xbf16>
    %18 = vector.shape_cast %17 : vector<1x128x128xbf16> to vector<128x128xbf16>
    %cst_15 = arith.constant dense<0.000000e+00> : vector<4x128xf32>
    %19 = tpu.matmul %16, %18, %cst_15 {dimension_numbers = #tpu.dot_dimension_numbers<[1], [0], [0], [1], [0, 0, 1, 1], [], []>} : vector<4x128xbf16>, vector<128x128xbf16>, vector<4x128xf32> -> vector<4x128xf32>
    %20 = arith.addf %14, %19 : vector<4x128xf32>
    %c12 = arith.constant 12 : index
    %c0_16 = arith.constant 0 : index
    %21 = vector.load %arg12[%c12, %c0_16] : memref<24x128xf32, #tpu.memory_space<vmem>>, vector<4x128xf32>
    %22 = arith.truncf %21 : vector<4x128xf32> to vector<4x128xbf16>
    %c7 = arith.constant 7 : index
    %c0_17 = arith.constant 0 : index
    %c0_18 = arith.constant 0 : index
    %23 = vector.load %arg2[%c7, %c0_17, %c0_18] : memref<9x128x128xbf16, #tpu.memory_space<vmem>>, vector<1x128x128xbf16>
    %24 = vector.shape_cast %23 : vector<1x128x128xbf16> to vector<128x128xbf16>
    %cst_19 = arith.constant dense<0.000000e+00> : vector<4x128xf32>
    %25 = tpu.matmul %22, %24, %cst_19 {dimension_numbers = #tpu.dot_dimension_numbers<[1], [0], [0], [1], [0, 0, 1, 1], [], []>} : vector<4x128xbf16>, vector<128x128xbf16>, vector<4x128xf32> -> vector<4x128xf32>
    %26 = arith.addf %20, %25 : vector<4x128xf32>
    %c0_i32 = arith.constant 0 : i32
    %27 = vector.broadcast %c0_i32 : i32 to vector<4x128xi32>
    %28 = arith.cmpi eq, %9, %27 : vector<4x128xi32>
    %c7_20 = arith.constant 7 : index
    %c0_21 = arith.constant 0 : index
    %29 = vector.load %arg12[%c7_20, %c0_21] : memref<24x128xf32, #tpu.memory_space<vmem>>, vector<4x128xf32>
    %30 = arith.truncf %29 : vector<4x128xf32> to vector<4x128xbf16>
    %c0_22 = arith.constant 0 : index
    %c0_23 = arith.constant 0 : index
    %c0_24 = arith.constant 0 : index
    %31 = vector.load %arg2[%c0_22, %c0_23, %c0_24] : memref<9x128x128xbf16, #tpu.memory_space<vmem>>, vector<1x128x128xbf16>
    %32 = vector.shape_cast %31 : vector<1x128x128xbf16> to vector<128x128xbf16>
    %cst_25 = arith.constant dense<0.000000e+00> : vector<4x128xf32>
    %33 = tpu.matmul %30, %32, %cst_25 {dimension_numbers = #tpu.dot_dimension_numbers<[1], [0], [0], [1], [0, 0, 1, 1], [], []>} : vector<4x128xbf16>, vector<128x128xbf16>, vector<4x128xf32> -> vector<4x128xf32>
    %c9 = arith.constant 9 : index
    %c0_26 = arith.constant 0 : index
    %34 = vector.load %arg12[%c9, %c0_26] : memref<24x128xf32, #tpu.memory_space<vmem>>, vector<4x128xf32>
    %35 = arith.truncf %34 : vector<4x128xf32> to vector<4x128xbf16>
    %c3 = arith.constant 3 : index
    %c0_27 = arith.constant 0 : index
    %c0_28 = arith.constant 0 : index
    %36 = vector.load %arg2[%c3, %c0_27, %c0_28] : memref<9x128x128xbf16, #tpu.memory_space<vmem>>, vector<1x128x128xbf16>
    %37 = vector.shape_cast %36 : vector<1x128x128xbf16> to vector<128x128xbf16>
    %cst_29 = arith.constant dense<0.000000e+00> : vector<4x128xf32>
    %38 = tpu.matmul %35, %37, %cst_29 {dimension_numbers = #tpu.dot_dimension_numbers<[1], [0], [0], [1], [0, 0, 1, 1], [], []>} : vector<4x128xbf16>, vector<128x128xbf16>, vector<4x128xf32> -> vector<4x128xf32>
    %39 = arith.addf %33, %38 : vector<4x128xf32>
    %c11 = arith.constant 11 : index
    %c0_30 = arith.constant 0 : index
    %40 = vector.load %arg12[%c11, %c0_30] : memref<24x128xf32, #tpu.memory_space<vmem>>, vector<4x128xf32>
    %41 = arith.truncf %40 : vector<4x128xf32> to vector<4x128xbf16>
    %c6 = arith.constant 6 : index
    %c0_31 = arith.constant 0 : index
    %c0_32 = arith.constant 0 : index
    %42 = vector.load %arg2[%c6, %c0_31, %c0_32] : memref<9x128x128xbf16, #tpu.memory_space<vmem>>, vector<1x128x128xbf16>
    %43 = vector.shape_cast %42 : vector<1x128x128xbf16> to vector<128x128xbf16>
    %cst_33 = arith.constant dense<0.000000e+00> : vector<4x128xf32>
    %44 = tpu.matmul %41, %43, %cst_33 {dimension_numbers = #tpu.dot_dimension_numbers<[1], [0], [0], [1], [0, 0, 1, 1], [], []>} : vector<4x128xbf16>, vector<128x128xbf16>, vector<4x128xf32> -> vector<4x128xf32>
    %45 = arith.addf %39, %44 : vector<4x128xf32>
    %cst_34 = arith.constant 0.000000e+00 : f32
    %46 = vector.broadcast %cst_34 : f32 to vector<4x128xf32>
    %47 = arith.select %28, %46, %45 : vector<4x128xi1>, vector<4x128xf32>
    %48 = arith.addf %26, %47 : vector<4x128xf32>
    %c1_i32_35 = arith.constant 1 : i32
    %49 = vector.broadcast %c1_i32_35 : i32 to vector<4x128xi32>
    %50 = arith.cmpi eq, %9, %49 : vector<4x128xi32>
    %c9_36 = arith.constant 9 : index
    %c0_37 = arith.constant 0 : index
    %51 = vector.load %arg12[%c9_36, %c0_37] : memref<24x128xf32, #tpu.memory_space<vmem>>, vector<4x128xf32>
    %52 = arith.truncf %51 : vector<4x128xf32> to vector<4x128xbf16>
    %c2 = arith.constant 2 : index
    %c0_38 = arith.constant 0 : index
    %c0_39 = arith.constant 0 : index
    %53 = vector.load %arg2[%c2, %c0_38, %c0_39] : memref<9x128x128xbf16, #tpu.memory_space<vmem>>, vector<1x128x128xbf16>
    %54 = vector.shape_cast %53 : vector<1x128x128xbf16> to vector<128x128xbf16>
    %cst_40 = arith.constant dense<0.000000e+00> : vector<4x128xf32>
    %55 = tpu.matmul %52, %54, %cst_40 {dimension_numbers = #tpu.dot_dimension_numbers<[1], [0], [0], [1], [0, 0, 1, 1], [], []>} : vector<4x128xbf16>, vector<128x128xbf16>, vector<4x128xf32> -> vector<4x128xf32>
    %c11_41 = arith.constant 11 : index
    %c0_42 = arith.constant 0 : index
    %56 = vector.load %arg12[%c11_41, %c0_42] : memref<24x128xf32, #tpu.memory_space<vmem>>, vector<4x128xf32>
    %57 = arith.truncf %56 : vector<4x128xf32> to vector<4x128xbf16>
    %c5 = arith.constant 5 : index
    %c0_43 = arith.constant 0 : index
    %c0_44 = arith.constant 0 : index
    %58 = vector.load %arg2[%c5, %c0_43, %c0_44] : memref<9x128x128xbf16, #tpu.memory_space<vmem>>, vector<1x128x128xbf16>
    %59 = vector.shape_cast %58 : vector<1x128x128xbf16> to vector<128x128xbf16>
    %cst_45 = arith.constant dense<0.000000e+00> : vector<4x128xf32>
    %60 = tpu.matmul %57, %59, %cst_45 {dimension_numbers = #tpu.dot_dimension_numbers<[1], [0], [0], [1], [0, 0, 1, 1], [], []>} : vector<4x128xbf16>, vector<128x128xbf16>, vector<4x128xf32> -> vector<4x128xf32>
    %61 = arith.addf %55, %60 : vector<4x128xf32>
    %c13 = arith.constant 13 : index
    %c0_46 = arith.constant 0 : index
    %62 = vector.load %arg12[%c13, %c0_46] : memref<24x128xf32, #tpu.memory_space<vmem>>, vector<4x128xf32>
    %63 = arith.truncf %62 : vector<4x128xf32> to vector<4x128xbf16>
    %c8_47 = arith.constant 8 : index
    %c0_48 = arith.constant 0 : index
    %c0_49 = arith.constant 0 : index
    %64 = vector.load %arg2[%c8_47, %c0_48, %c0_49] : memref<9x128x128xbf16, #tpu.memory_space<vmem>>, vector<1x128x128xbf16>
    %65 = vector.shape_cast %64 : vector<1x128x128xbf16> to vector<128x128xbf16>
    %cst_50 = arith.constant dense<0.000000e+00> : vector<4x128xf32>
    %66 = tpu.matmul %63, %65, %cst_50 {dimension_numbers = #tpu.dot_dimension_numbers<[1], [0], [0], [1], [0, 0, 1, 1], [], []>} : vector<4x128xbf16>, vector<128x128xbf16>, vector<4x128xf32> -> vector<4x128xf32>
    %67 = arith.addf %61, %66 : vector<4x128xf32>
    %cst_51 = arith.constant 0.000000e+00 : f32
    %68 = vector.broadcast %cst_51 : f32 to vector<4x128xf32>
    %69 = arith.select %50, %68, %67 : vector<4x128xi1>, vector<4x128xf32>
    %70 = arith.addf %48, %69 : vector<4x128xf32>
    %c0_52 = arith.constant 0 : index
    %c0_53 = arith.constant 0 : index
    %71 = vector.load %arg3[%c0_52, %c0_53] : memref<1x128xf32, #tpu.memory_space<vmem>>, vector<1x128xf32>
    %72 = vector.broadcast %71 : vector<1x128xf32> to vector<4x128xf32>
    %73 = arith.mulf %70, %72 : vector<4x128xf32>
    %c0_54 = arith.constant 0 : index
    %c0_55 = arith.constant 0 : index
    %74 = vector.load %arg4[%c0_54, %c0_55] : memref<1x128xf32, #tpu.memory_space<vmem>>, vector<1x128xf32>
    %75 = vector.broadcast %74 : vector<1x128xf32> to vector<4x128xf32>
    %76 = arith.addf %73, %75 : vector<4x128xf32>
    %cst_56 = arith.constant 0.000000e+00 : f32
    %77 = vector.broadcast %cst_56 : f32 to vector<4x128xf32>
    %78 = arith.maximumf %76, %77 : vector<4x128xf32>
    %cst_57 = arith.constant dense<0.000000e+00> : vector<128xf32>
    %79 = vector.multi_reduction <add>, %78, %cst_57 [0] : vector<4x128xf32> to vector<128xf32>
    %80 = vector.shape_cast %79 : vector<128xf32> to vector<1x128xf32>
    %cst_58 = arith.constant 2.500000e-01 : f32
    %81 = vector.broadcast %cst_58 : f32 to vector<1x128xf32>
    %82 = arith.mulf %80, %81 : vector<1x128xf32>
    %c0_59 = arith.constant 0 : index
    %c0_60 = arith.constant 0 : index
    %83 = vector.load %arg5[%c0_59, %c0_60] : memref<128x128xf32, #tpu.memory_space<vmem>>, vector<128x128xf32>
    %cst_61 = arith.constant dense<0.000000e+00> : vector<1x128xf32>
    %84 = tpu.matmul %82, %83, %cst_61 {dimension_numbers = #tpu.dot_dimension_numbers<[1], [0], [0], [1], [0, 0, 1, 1], [], []>} : vector<1x128xf32>, vector<128x128xf32>, vector<1x128xf32> -> vector<1x128xf32>
    %c0_62 = arith.constant 0 : index
    %c0_63 = arith.constant 0 : index
    %85 = vector.load %arg6[%c0_62, %c0_63] : memref<1x128xf32, #tpu.memory_space<vmem>>, vector<1x128xf32>
    %86 = arith.mulf %84, %85 : vector<1x128xf32>
    %c0_64 = arith.constant 0 : index
    %c0_65 = arith.constant 0 : index
    %87 = vector.load %arg7[%c0_64, %c0_65] : memref<1x128xf32, #tpu.memory_space<vmem>>, vector<1x128xf32>
    %88 = arith.addf %86, %87 : vector<1x128xf32>
    %89 = arith.negf %88 : vector<1x128xf32>
    %90 = math.exp %89 : vector<1x128xf32>
    %cst_66 = arith.constant 1.000000e+00 : f32
    %91 = vector.broadcast %cst_66 : f32 to vector<1x128xf32>
    %92 = arith.addf %91, %90 : vector<1x128xf32>
    %93 = arith.divf %91, %92 : vector<1x128xf32>
    %94 = vector.broadcast %93 : vector<1x128xf32> to vector<4x128xf32>
    %95 = arith.mulf %78, %94 : vector<4x128xf32>
    %cst_67 = arith.constant dense<0.000000e+00> : vector<128xf32>
    %96 = vector.multi_reduction <add>, %1, %cst_67 [0] : vector<4x128xf32> to vector<128xf32>
    %97 = vector.shape_cast %96 : vector<128xf32> to vector<1x128xf32>
    %cst_68 = arith.constant 2.500000e-01 : f32
    %98 = vector.broadcast %cst_68 : f32 to vector<1x128xf32>
    %99 = arith.mulf %97, %98 : vector<1x128xf32>
    %c0_69 = arith.constant 0 : index
    %c0_70 = arith.constant 0 : index
    %100 = vector.load %arg8[%c0_69, %c0_70] : memref<128x128xf32, #tpu.memory_space<vmem>>, vector<128x128xf32>
    %cst_71 = arith.constant dense<0.000000e+00> : vector<1x128xf32>
    %101 = tpu.matmul %99, %100, %cst_71 {dimension_numbers = #tpu.dot_dimension_numbers<[1], [0], [0], [1], [0, 0, 1, 1], [], []>} : vector<1x128xf32>, vector<128x128xf32>, vector<1x128xf32> -> vector<1x128xf32>
    %c0_72 = arith.constant 0 : index
    %c0_73 = arith.constant 0 : index
    %102 = vector.load %arg9[%c0_72, %c0_73] : memref<1x128xf32, #tpu.memory_space<vmem>>, vector<1x128xf32>
    %103 = arith.mulf %101, %102 : vector<1x128xf32>
    %c0_74 = arith.constant 0 : index
    %c0_75 = arith.constant 0 : index
    %104 = vector.load %arg10[%c0_74, %c0_75] : memref<1x128xf32, #tpu.memory_space<vmem>>, vector<1x128xf32>
    %105 = arith.addf %103, %104 : vector<1x128xf32>
    %cst_76 = arith.constant 0.000000e+00 : f32
    %106 = vector.broadcast %cst_76 : f32 to vector<1x128xf32>
    %107 = arith.maximumf %105, %106 : vector<1x128xf32>
    %108 = vector.broadcast %107 : vector<1x128xf32> to vector<4x128xf32>
    %109 = arith.addf %95, %108 : vector<4x128xf32>
    %c0_77 = arith.constant 0 : index
    %c0_78 = arith.constant 0 : index
    %c0_79 = arith.constant 0 : index
    %110 = vector.load %arg11[%c0_77, %c0_78, %c0_79] : memref<1x4x128xf32, #tpu.memory_space<vmem>>, vector<1x4x128xf32>
    %111 = vector.shape_cast %110 : vector<1x4x128xf32> to vector<4x128xf32>
    %112 = vector.shape_cast %109 : vector<4x128xf32> to vector<1x4x128xf32>
    tpu.vector_store %arg11[%c0_77, %c0_78, %c0_79], %112 {strides = array<i32>} : memref<1x4x128xf32, #tpu.memory_space<vmem>>, vector<1x4x128xf32>,
    return
  }
  func.func @transform_0(%arg0: i32) -> (i32, i32, i32) {
    %c0_i32 = arith.constant 0 : i32
    %c0_i32_0 = arith.constant 0 : i32
    %c0_i32_1 = arith.constant 0 : i32
    return %arg0, %c0_i32, %c0_i32_0 : i32, i32, i32
  }
  func.func @transform_1(%arg0: i32) -> (i32, i32, i32) {
    %c0_i32 = arith.constant 0 : i32
    %c0_i32_0 = arith.constant 0 : i32
    %c0_i32_1 = arith.constant 0 : i32
    %c0_i32_2 = arith.constant 0 : i32
    return %c0_i32, %c0_i32_0, %c0_i32_1 : i32, i32, i32
  }
  func.func @transform_2(%arg0: i32) -> (i32, i32) {
    %c0_i32 = arith.constant 0 : i32
    %c0_i32_0 = arith.constant 0 : i32
    %c0_i32_1 = arith.constant 0 : i32
    return %c0_i32, %c0_i32_0 : i32, i32
  }
  func.func @transform_3(%arg0: i32) -> (i32, i32) {
    %c0_i32 = arith.constant 0 : i32
    %c0_i32_0 = arith.constant 0 : i32
    %c0_i32_1 = arith.constant 0 : i32
    return %c0_i32, %c0_i32_0 : i32, i32
  }
  func.func @transform_4(%arg0: i32) -> (i32, i32) {
    %c0_i32 = arith.constant 0 : i32
    %c0_i32_0 = arith.constant 0 : i32
    %c0_i32_1 = arith.constant 0 : i32
    return %c0_i32, %c0_i32_0 : i32, i32
  }
  func.func @transform_5(%arg0: i32) -> (i32, i32) {
    %c0_i32 = arith.constant 0 : i32
    %c0_i32_0 = arith.constant 0 : i32
    %c0_i32_1 = arith.constant 0 : i32
    return %c0_i32, %c0_i32_0 : i32, i32
  }
  func.func @transform_6(%arg0: i32) -> (i32, i32) {
    %c0_i32 = arith.constant 0 : i32
    %c0_i32_0 = arith.constant 0 : i32
    %c0_i32_1 = arith.constant 0 : i32
    return %c0_i32, %c0_i32_0 : i32, i32
  }
  func.func @transform_7(%arg0: i32) -> (i32, i32) {
    %c0_i32 = arith.constant 0 : i32
    %c0_i32_0 = arith.constant 0 : i32
    %c0_i32_1 = arith.constant 0 : i32
    return %c0_i32, %c0_i32_0 : i32, i32
  }
  func.func @transform_8(%arg0: i32) -> (i32, i32) {
    %c0_i32 = arith.constant 0 : i32
    %c0_i32_0 = arith.constant 0 : i32
    %c0_i32_1 = arith.constant 0 : i32
    return %c0_i32, %c0_i32_0 : i32, i32
  }
  func.func @transform_9(%arg0: i32) -> (i32, i32) {
    %c0_i32 = arith.constant 0 : i32
    %c0_i32_0 = arith.constant 0 : i32
    %c0_i32_1 = arith.constant 0 : i32
    return %c0_i32, %c0_i32_0 : i32, i32
  }
  func.func @transform_10(%arg0: i32) -> (i32, i32, i32) {
    %c0_i32 = arith.constant 0 : i32
    %c0_i32_0 = arith.constant 0 : i32
    %c0_i32_1 = arith.constant 0 : i32
    return %arg0, %c0_i32, %c0_i32_0 : i32, i32, i32
  }
}

module attributes {stable_mosaic.version = 11 : i64} {
  func.func @kernel(%arg0: i32, %arg1: memref<1x4x128xf32, #tpu.memory_space<vmem>>, %arg2: memref<4x2xf32, #tpu.memory_space<vmem>>, %arg3: memref<9x128x128xbf16, #tpu.memory_space<vmem>>, %arg4: memref<1x128xf32, #tpu.memory_space<vmem>>, %arg5: memref<1x128xf32, #tpu.memory_space<vmem>>, %arg6: memref<1x16x128xf32, #tpu.memory_space<vmem>>, %arg7: memref<40x128xf32, #tpu.memory_space<vmem>>) attributes {dimension_semantics = [#tpu.dimension_semantics<parallel>], iteration_bounds = array<i64: 2>, scalar_prefetch = 0 : i64, scratch_operands = 1 : i64, tpu.core_type = #tpu.core_type<tc>, window_params = [{transform_indices = @transform_0, window_bounds = array<i64: 1, 4, 128>}, {pipeline_mode = #tpu.pipeline_mode<synchronous>, transform_indices = @transform_1, window_bounds = array<i64: 4, 2>}, {pipeline_mode = #tpu.pipeline_mode<synchronous>, transform_indices = @transform_2, window_bounds = array<i64: 9, 128, 128>}, {pipeline_mode = #tpu.pipeline_mode<synchronous>, transform_indices = @transform_3, window_bounds = array<i64: 1, 128>}, {pipeline_mode = #tpu.pipeline_mode<synchronous>, transform_indices = @transform_4, window_bounds = array<i64: 1, 128>}, {transform_indices = @transform_5, window_bounds = array<i64: 1, 16, 128>}]} {
    %cst = arith.constant 0.000000e+00 : f32
    %0 = vector.broadcast %cst : f32 to vector<12x128xf32>
    %c0 = arith.constant 0 : index
    %c0_0 = arith.constant 0 : index
    %1 = vector.load %arg7[%c0, %c0_0] : memref<40x128xf32, #tpu.memory_space<vmem>>, vector<12x128xf32>
    tpu.vector_store %arg7[%c0, %c0_0], %0 {strides = array<i32>} : memref<40x128xf32, #tpu.memory_space<vmem>>, vector<12x128xf32>,
    %cst_1 = arith.constant 0.000000e+00 : f32
    %2 = vector.broadcast %cst_1 : f32 to vector<12x128xf32>
    %c28 = arith.constant 28 : index
    %c0_2 = arith.constant 0 : index
    %3 = vector.load %arg7[%c28, %c0_2] : memref<40x128xf32, #tpu.memory_space<vmem>>, vector<12x128xf32>
    tpu.vector_store %arg7[%c28, %c0_2], %2 {strides = array<i32>} : memref<40x128xf32, #tpu.memory_space<vmem>>, vector<12x128xf32>,
    %c0_3 = arith.constant 0 : index
    %c0_4 = arith.constant 0 : index
    %c0_5 = arith.constant 0 : index
    %4 = vector.load %arg1[%c0_3, %c0_4, %c0_5] : memref<1x4x128xf32, #tpu.memory_space<vmem>>, vector<1x4x128xf32>
    %5 = vector.shape_cast %4 : vector<1x4x128xf32> to vector<4x128xf32>
    %c0_6 = arith.constant 0 : index
    %c0_7 = arith.constant 0 : index
    %6 = vector.load %arg2[%c0_6, %c0_7] : memref<4x2xf32, #tpu.memory_space<vmem>>, vector<4x2xf32>
    %7 = vector.extract_strided_slice %5 {offsets = [0, 0], sizes = [2, 128], strides = [1, 1]} : vector<4x128xf32> to vector<2x128xf32>
    %cst_8 = arith.constant dense<0.000000e+00> : vector<4x128xf32>
    %8 = tpu.matmul %6, %7, %cst_8 {dimension_numbers = #tpu.dot_dimension_numbers<[1], [0], [0], [1], [0, 0, 1, 1], [], []>} : vector<4x2xf32>, vector<2x128xf32>, vector<4x128xf32> -> vector<4x128xf32>
    %9 = vector.extract_strided_slice %5 {offsets = [2, 0], sizes = [2, 128], strides = [1, 1]} : vector<4x128xf32> to vector<2x128xf32>
    %cst_9 = arith.constant dense<0.000000e+00> : vector<4x128xf32>
    %10 = tpu.matmul %6, %9, %cst_9 {dimension_numbers = #tpu.dot_dimension_numbers<[1], [0], [0], [1], [0, 0, 1, 1], [], []>} : vector<4x2xf32>, vector<2x128xf32>, vector<4x128xf32> -> vector<4x128xf32>
    %cst_10 = arith.constant 1.000000e+00 : f32
    %11 = vector.broadcast %cst_10 : f32 to vector<4x128xf32>
    %12 = arith.mulf %11, %8 : vector<4x128xf32>
    %c12 = arith.constant 12 : index
    %c0_11 = arith.constant 0 : index
    %13 = vector.load %arg7[%c12, %c0_11] : memref<40x128xf32, #tpu.memory_space<vmem>>, vector<4x128xf32>
    tpu.vector_store %arg7[%c12, %c0_11], %12 {strides = array<i32>} : memref<40x128xf32, #tpu.memory_space<vmem>>, vector<4x128xf32>,
    %cst_12 = arith.constant 0.666666686 : f32
    %14 = vector.broadcast %cst_12 : f32 to vector<4x128xf32>
    %15 = arith.mulf %14, %8 : vector<4x128xf32>
    %cst_13 = arith.constant 0.333333343 : f32
    %16 = vector.broadcast %cst_13 : f32 to vector<4x128xf32>
    %17 = arith.mulf %16, %10 : vector<4x128xf32>
    %18 = arith.addf %15, %17 : vector<4x128xf32>
    %c16 = arith.constant 16 : index
    %c0_14 = arith.constant 0 : index
    %19 = vector.load %arg7[%c16, %c0_14] : memref<40x128xf32, #tpu.memory_space<vmem>>, vector<4x128xf32>
    tpu.vector_store %arg7[%c16, %c0_14], %18 {strides = array<i32>} : memref<40x128xf32, #tpu.memory_space<vmem>>, vector<4x128xf32>,
    %cst_15 = arith.constant 0.333333343 : f32
    %20 = vector.broadcast %cst_15 : f32 to vector<4x128xf32>
    %21 = arith.mulf %20, %8 : vector<4x128xf32>
    %cst_16 = arith.constant 0.666666686 : f32
    %22 = vector.broadcast %cst_16 : f32 to vector<4x128xf32>
    %23 = arith.mulf %22, %10 : vector<4x128xf32>
    %24 = arith.addf %21, %23 : vector<4x128xf32>
    %c20 = arith.constant 20 : index
    %c0_17 = arith.constant 0 : index
    %25 = vector.load %arg7[%c20, %c0_17] : memref<40x128xf32, #tpu.memory_space<vmem>>, vector<4x128xf32>
    tpu.vector_store %arg7[%c20, %c0_17], %24 {strides = array<i32>} : memref<40x128xf32, #tpu.memory_space<vmem>>, vector<4x128xf32>,
    %cst_18 = arith.constant 1.000000e+00 : f32
    %26 = vector.broadcast %cst_18 : f32 to vector<4x128xf32>
    %27 = arith.mulf %26, %10 : vector<4x128xf32>
    %c24 = arith.constant 24 : index
    %c0_19 = arith.constant 0 : index
    %28 = vector.load %arg7[%c24, %c0_19] : memref<40x128xf32, #tpu.memory_space<vmem>>, vector<4x128xf32>
    tpu.vector_store %arg7[%c24, %c0_19], %27 {strides = array<i32>} : memref<40x128xf32, #tpu.memory_space<vmem>>, vector<4x128xf32>,
    %29 = tpu.iota {dimensions = array<i32: 0>} : vector<16x128xi32>
    %c3_i32 = arith.constant 3 : i32
    %30 = vector.broadcast %c3_i32 : i32 to vector<16x128xi32>
    %31 = arith.andi %29, %30 : vector<16x128xi32>
    %c8 = arith.constant 8 : index
    %c0_20 = arith.constant 0 : index
    %32 = vector.load %arg7[%c8, %c0_20] : memref<40x128xf32, #tpu.memory_space<vmem>>, vector<16x128xf32>
    %33 = arith.truncf %32 : vector<16x128xf32> to vector<16x128xbf16>
    %c1 = arith.constant 1 : index
    %c0_21 = arith.constant 0 : index
    %c0_22 = arith.constant 0 : index
    %34 = vector.load %arg3[%c1, %c0_21, %c0_22] : memref<9x128x128xbf16, #tpu.memory_space<vmem>>, vector<1x128x128xbf16>
    %35 = vector.shape_cast %34 : vector<1x128x128xbf16> to vector<128x128xbf16>
    %cst_23 = arith.constant dense<0.000000e+00> : vector<16x128xf32>
    %36 = tpu.matmul %33, %35, %cst_23 {dimension_numbers = #tpu.dot_dimension_numbers<[1], [0], [0], [1], [0, 0, 1, 1], [], []>} : vector<16x128xbf16>, vector<128x128xbf16>, vector<16x128xf32> -> vector<16x128xf32>
    %c12_24 = arith.constant 12 : index
    %c0_25 = arith.constant 0 : index
    %37 = vector.load %arg7[%c12_24, %c0_25] : memref<40x128xf32, #tpu.memory_space<vmem>>, vector<16x128xf32>
    %38 = arith.truncf %37 : vector<16x128xf32> to vector<16x128xbf16>
    %c4 = arith.constant 4 : index
    %c0_26 = arith.constant 0 : index
    %c0_27 = arith.constant 0 : index
    %39 = vector.load %arg3[%c4, %c0_26, %c0_27] : memref<9x128x128xbf16, #tpu.memory_space<vmem>>, vector<1x128x128xbf16>
    %40 = vector.shape_cast %39 : vector<1x128x128xbf16> to vector<128x128xbf16>
    %cst_28 = arith.constant dense<0.000000e+00> : vector<16x128xf32>
    %41 = tpu.matmul %38, %40, %cst_28 {dimension_numbers = #tpu.dot_dimension_numbers<[1], [0], [0], [1], [0, 0, 1, 1], [], []>} : vector<16x128xbf16>, vector<128x128xbf16>, vector<16x128xf32> -> vector<16x128xf32>
    %42 = arith.addf %36, %41 : vector<16x128xf32>
    %c16_29 = arith.constant 16 : index
    %c0_30 = arith.constant 0 : index
    %43 = vector.load %arg7[%c16_29, %c0_30] : memref<40x128xf32, #tpu.memory_space<vmem>>, vector<16x128xf32>
    %44 = arith.truncf %43 : vector<16x128xf32> to vector<16x128xbf16>
    %c7 = arith.constant 7 : index
    %c0_31 = arith.constant 0 : index
    %c0_32 = arith.constant 0 : index
    %45 = vector.load %arg3[%c7, %c0_31, %c0_32] : memref<9x128x128xbf16, #tpu.memory_space<vmem>>, vector<1x128x128xbf16>
    %46 = vector.shape_cast %45 : vector<1x128x128xbf16> to vector<128x128xbf16>
    %cst_33 = arith.constant dense<0.000000e+00> : vector<16x128xf32>
    %47 = tpu.matmul %44, %46, %cst_33 {dimension_numbers = #tpu.dot_dimension_numbers<[1], [0], [0], [1], [0, 0, 1, 1], [], []>} : vector<16x128xbf16>, vector<128x128xbf16>, vector<16x128xf32> -> vector<16x128xf32>
    %48 = arith.addf %42, %47 : vector<16x128xf32>
    %c0_i32 = arith.constant 0 : i32
    %49 = vector.broadcast %c0_i32 : i32 to vector<16x128xi32>
    %50 = arith.cmpi eq, %31, %49 : vector<16x128xi32>
    %c7_34 = arith.constant 7 : index
    %c0_35 = arith.constant 0 : index
    %51 = vector.load %arg7[%c7_34, %c0_35] : memref<40x128xf32, #tpu.memory_space<vmem>>, vector<16x128xf32>
    %52 = arith.truncf %51 : vector<16x128xf32> to vector<16x128xbf16>
    %c0_36 = arith.constant 0 : index
    %c0_37 = arith.constant 0 : index
    %c0_38 = arith.constant 0 : index
    %53 = vector.load %arg3[%c0_36, %c0_37, %c0_38] : memref<9x128x128xbf16, #tpu.memory_space<vmem>>, vector<1x128x128xbf16>
    %54 = vector.shape_cast %53 : vector<1x128x128xbf16> to vector<128x128xbf16>
    %cst_39 = arith.constant dense<0.000000e+00> : vector<16x128xf32>
    %55 = tpu.matmul %52, %54, %cst_39 {dimension_numbers = #tpu.dot_dimension_numbers<[1], [0], [0], [1], [0, 0, 1, 1], [], []>} : vector<16x128xbf16>, vector<128x128xbf16>, vector<16x128xf32> -> vector<16x128xf32>
    %c11 = arith.constant 11 : index
    %c0_40 = arith.constant 0 : index
    %56 = vector.load %arg7[%c11, %c0_40] : memref<40x128xf32, #tpu.memory_space<vmem>>, vector<16x128xf32>
    %57 = arith.truncf %56 : vector<16x128xf32> to vector<16x128xbf16>
    %c3 = arith.constant 3 : index
    %c0_41 = arith.constant 0 : index
    %c0_42 = arith.constant 0 : index
    %58 = vector.load %arg3[%c3, %c0_41, %c0_42] : memref<9x128x128xbf16, #tpu.memory_space<vmem>>, vector<1x128x128xbf16>
    %59 = vector.shape_cast %58 : vector<1x128x128xbf16> to vector<128x128xbf16>
    %cst_43 = arith.constant dense<0.000000e+00> : vector<16x128xf32>
    %60 = tpu.matmul %57, %59, %cst_43 {dimension_numbers = #tpu.dot_dimension_numbers<[1], [0], [0], [1], [0, 0, 1, 1], [], []>} : vector<16x128xbf16>, vector<128x128xbf16>, vector<16x128xf32> -> vector<16x128xf32>
    %61 = arith.addf %55, %60 : vector<16x128xf32>
    %c15 = arith.constant 15 : index
    %c0_44 = arith.constant 0 : index
    %62 = vector.load %arg7[%c15, %c0_44] : memref<40x128xf32, #tpu.memory_space<vmem>>, vector<16x128xf32>
    %63 = arith.truncf %62 : vector<16x128xf32> to vector<16x128xbf16>
    %c6 = arith.constant 6 : index
    %c0_45 = arith.constant 0 : index
    %c0_46 = arith.constant 0 : index
    %64 = vector.load %arg3[%c6, %c0_45, %c0_46] : memref<9x128x128xbf16, #tpu.memory_space<vmem>>, vector<1x128x128xbf16>
    %65 = vector.shape_cast %64 : vector<1x128x128xbf16> to vector<128x128xbf16>
    %cst_47 = arith.constant dense<0.000000e+00> : vector<16x128xf32>
    %66 = tpu.matmul %63, %65, %cst_47 {dimension_numbers = #tpu.dot_dimension_numbers<[1], [0], [0], [1], [0, 0, 1, 1], [], []>} : vector<16x128xbf16>, vector<128x128xbf16>, vector<16x128xf32> -> vector<16x128xf32>
    %67 = arith.addf %61, %66 : vector<16x128xf32>
    %cst_48 = arith.constant 0.000000e+00 : f32
    %68 = vector.broadcast %cst_48 : f32 to vector<16x128xf32>
    %69 = arith.select %50, %68, %67 : vector<16x128xi1>, vector<16x128xf32>
    %70 = arith.addf %48, %69 : vector<16x128xf32>
    %c3_i32_49 = arith.constant 3 : i32
    %71 = vector.broadcast %c3_i32_49 : i32 to vector<16x128xi32>
    %72 = arith.cmpi eq, %31, %71 : vector<16x128xi32>
    %c9 = arith.constant 9 : index
    %c0_50 = arith.constant 0 : index
    %73 = vector.load %arg7[%c9, %c0_50] : memref<40x128xf32, #tpu.memory_space<vmem>>, vector<16x128xf32>
    %74 = arith.truncf %73 : vector<16x128xf32> to vector<16x128xbf16>
    %c2 = arith.constant 2 : index
    %c0_51 = arith.constant 0 : index
    %c0_52 = arith.constant 0 : index
    %75 = vector.load %arg3[%c2, %c0_51, %c0_52] : memref<9x128x128xbf16, #tpu.memory_space<vmem>>, vector<1x128x128xbf16>
    %76 = vector.shape_cast %75 : vector<1x128x128xbf16> to vector<128x128xbf16>
    %cst_53 = arith.constant dense<0.000000e+00> : vector<16x128xf32>
    %77 = tpu.matmul %74, %76, %cst_53 {dimension_numbers = #tpu.dot_dimension_numbers<[1], [0], [0], [1], [0, 0, 1, 1], [], []>} : vector<16x128xbf16>, vector<128x128xbf16>, vector<16x128xf32> -> vector<16x128xf32>
    %c13 = arith.constant 13 : index
    %c0_54 = arith.constant 0 : index
    %78 = vector.load %arg7[%c13, %c0_54] : memref<40x128xf32, #tpu.memory_space<vmem>>, vector<16x128xf32>
    %79 = arith.truncf %78 : vector<16x128xf32> to vector<16x128xbf16>
    %c5 = arith.constant 5 : index
    %c0_55 = arith.constant 0 : index
    %c0_56 = arith.constant 0 : index
    %80 = vector.load %arg3[%c5, %c0_55, %c0_56] : memref<9x128x128xbf16, #tpu.memory_space<vmem>>, vector<1x128x128xbf16>
    %81 = vector.shape_cast %80 : vector<1x128x128xbf16> to vector<128x128xbf16>
    %cst_57 = arith.constant dense<0.000000e+00> : vector<16x128xf32>
    %82 = tpu.matmul %79, %81, %cst_57 {dimension_numbers = #tpu.dot_dimension_numbers<[1], [0], [0], [1], [0, 0, 1, 1], [], []>} : vector<16x128xbf16>, vector<128x128xbf16>, vector<16x128xf32> -> vector<16x128xf32>
    %83 = arith.addf %77, %82 : vector<16x128xf32>
    %c17 = arith.constant 17 : index
    %c0_58 = arith.constant 0 : index
    %84 = vector.load %arg7[%c17, %c0_58] : memref<40x128xf32, #tpu.memory_space<vmem>>, vector<16x128xf32>
    %85 = arith.truncf %84 : vector<16x128xf32> to vector<16x128xbf16>
    %c8_59 = arith.constant 8 : index
    %c0_60 = arith.constant 0 : index
    %c0_61 = arith.constant 0 : index
    %86 = vector.load %arg3[%c8_59, %c0_60, %c0_61] : memref<9x128x128xbf16, #tpu.memory_space<vmem>>, vector<1x128x128xbf16>
    %87 = vector.shape_cast %86 : vector<1x128x128xbf16> to vector<128x128xbf16>
    %cst_62 = arith.constant dense<0.000000e+00> : vector<16x128xf32>
    %88 = tpu.matmul %85, %87, %cst_62 {dimension_numbers = #tpu.dot_dimension_numbers<[1], [0], [0], [1], [0, 0, 1, 1], [], []>} : vector<16x128xbf16>, vector<128x128xbf16>, vector<16x128xf32> -> vector<16x128xf32>
    %89 = arith.addf %83, %88 : vector<16x128xf32>
    %cst_63 = arith.constant 0.000000e+00 : f32
    %90 = vector.broadcast %cst_63 : f32 to vector<16x128xf32>
    %91 = arith.select %72, %90, %89 : vector<16x128xi1>, vector<16x128xf32>
    %92 = arith.addf %70, %91 : vector<16x128xf32>
    %c0_64 = arith.constant 0 : index
    %c0_65 = arith.constant 0 : index
    %93 = vector.load %arg4[%c0_64, %c0_65] : memref<1x128xf32, #tpu.memory_space<vmem>>, vector<1x128xf32>
    %94 = vector.broadcast %93 : vector<1x128xf32> to vector<16x128xf32>
    %95 = arith.mulf %92, %94 : vector<16x128xf32>
    %c0_66 = arith.constant 0 : index
    %c0_67 = arith.constant 0 : index
    %96 = vector.load %arg5[%c0_66, %c0_67] : memref<1x128xf32, #tpu.memory_space<vmem>>, vector<1x128xf32>
    %97 = vector.broadcast %96 : vector<1x128xf32> to vector<16x128xf32>
    %98 = arith.addf %95, %97 : vector<16x128xf32>
    %cst_68 = arith.constant 0.000000e+00 : f32
    %99 = vector.broadcast %cst_68 : f32 to vector<16x128xf32>
    %100 = arith.maximumf %98, %99 : vector<16x128xf32>
    %c0_69 = arith.constant 0 : index
    %c0_70 = arith.constant 0 : index
    %c0_71 = arith.constant 0 : index
    %101 = vector.load %arg6[%c0_69, %c0_70, %c0_71] : memref<1x16x128xf32, #tpu.memory_space<vmem>>, vector<1x16x128xf32>
    %102 = vector.shape_cast %101 : vector<1x16x128xf32> to vector<16x128xf32>
    %103 = vector.shape_cast %100 : vector<16x128xf32> to vector<1x16x128xf32>
    tpu.vector_store %arg6[%c0_69, %c0_70, %c0_71], %103 {strides = array<i32>} : memref<1x16x128xf32, #tpu.memory_space<vmem>>, vector<1x16x128xf32>,
    return
  }
  func.func @transform_0(%arg0: i32) -> (i32, i32, i32) {
    %c0_i32 = arith.constant 0 : i32
    %c0_i32_0 = arith.constant 0 : i32
    %c0_i32_1 = arith.constant 0 : i32
    return %arg0, %c0_i32, %c0_i32_0 : i32, i32, i32
  }
  func.func @transform_1(%arg0: i32) -> (i32, i32) {
    %c0_i32 = arith.constant 0 : i32
    %c0_i32_0 = arith.constant 0 : i32
    %c0_i32_1 = arith.constant 0 : i32
    return %c0_i32, %c0_i32_0 : i32, i32
  }
  func.func @transform_2(%arg0: i32) -> (i32, i32, i32) {
    %c0_i32 = arith.constant 0 : i32
    %c0_i32_0 = arith.constant 0 : i32
    %c0_i32_1 = arith.constant 0 : i32
    %c0_i32_2 = arith.constant 0 : i32
    return %c0_i32, %c0_i32_0, %c0_i32_1 : i32, i32, i32
  }
  func.func @transform_3(%arg0: i32) -> (i32, i32) {
    %c0_i32 = arith.constant 0 : i32
    %c0_i32_0 = arith.constant 0 : i32
    %c0_i32_1 = arith.constant 0 : i32
    return %c0_i32, %c0_i32_0 : i32, i32
  }
  func.func @transform_4(%arg0: i32) -> (i32, i32) {
    %c0_i32 = arith.constant 0 : i32
    %c0_i32_0 = arith.constant 0 : i32
    %c0_i32_1 = arith.constant 0 : i32
    return %c0_i32, %c0_i32_0 : i32, i32
  }
  func.func @transform_5(%arg0: i32) -> (i32, i32, i32) {
    %c0_i32 = arith.constant 0 : i32
    %c0_i32_0 = arith.constant 0 : i32
    %c0_i32_1 = arith.constant 0 : i32
    return %arg0, %c0_i32, %c0_i32_0 : i32, i32, i32
  }
}

module attributes {stable_mosaic.version = 11 : i64} {
  func.func @kernel(%arg0: i32, %arg1: memref<1x16x128xf32, #tpu.memory_space<vmem>>, %arg2: memref<1x16x128xf32, #tpu.memory_space<vmem>>, %arg3: memref<8x4xf32, #tpu.memory_space<vmem>>, %arg4: memref<9x128x128xbf16, #tpu.memory_space<vmem>>, %arg5: memref<1x128xf32, #tpu.memory_space<vmem>>, %arg6: memref<1x128xf32, #tpu.memory_space<vmem>>, %arg7: memref<1x64x128xf32, #tpu.memory_space<vmem>>, %arg8: memref<96x128xf32, #tpu.memory_space<vmem>>) attributes {dimension_semantics = [#tpu.dimension_semantics<parallel>], iteration_bounds = array<i64: 2>, scalar_prefetch = 0 : i64, scratch_operands = 1 : i64, tpu.core_type = #tpu.core_type<tc>, window_params = [{transform_indices = @transform_0, window_bounds = array<i64: 1, 16, 128>}, {transform_indices = @transform_1, window_bounds = array<i64: 1, 16, 128>}, {pipeline_mode = #tpu.pipeline_mode<synchronous>, transform_indices = @transform_2, window_bounds = array<i64: 8, 4>}, {pipeline_mode = #tpu.pipeline_mode<synchronous>, transform_indices = @transform_3, window_bounds = array<i64: 9, 128, 128>}, {pipeline_mode = #tpu.pipeline_mode<synchronous>, transform_indices = @transform_4, window_bounds = array<i64: 1, 128>}, {pipeline_mode = #tpu.pipeline_mode<synchronous>, transform_indices = @transform_5, window_bounds = array<i64: 1, 128>}, {transform_indices = @transform_6, window_bounds = array<i64: 1, 64, 128>}]} {
    %cst = arith.constant 0.000000e+00 : f32
    %0 = vector.broadcast %cst : f32 to vector<16x128xf32>
    %c0 = arith.constant 0 : index
    %c0_0 = arith.constant 0 : index
    %1 = vector.load %arg8[%c0, %c0_0] : memref<96x128xf32, #tpu.memory_space<vmem>>, vector<16x128xf32>
    tpu.vector_store %arg8[%c0, %c0_0], %0 {strides = array<i32>} : memref<96x128xf32, #tpu.memory_space<vmem>>, vector<16x128xf32>,
    %cst_1 = arith.constant 0.000000e+00 : f32
    %2 = vector.broadcast %cst_1 : f32 to vector<16x128xf32>
    %c80 = arith.constant 80 : index
    %c0_2 = arith.constant 0 : index
    %3 = vector.load %arg8[%c80, %c0_2] : memref<96x128xf32, #tpu.memory_space<vmem>>, vector<16x128xf32>
    tpu.vector_store %arg8[%c80, %c0_2], %2 {strides = array<i32>} : memref<96x128xf32, #tpu.memory_space<vmem>>, vector<16x128xf32>,
    %c0_3 = arith.constant 0 : index
    %c0_4 = arith.constant 0 : index
    %c0_5 = arith.constant 0 : index
    %4 = vector.load %arg1[%c0_3, %c0_4, %c0_5] : memref<1x16x128xf32, #tpu.memory_space<vmem>>, vector<1x16x128xf32>
    %5 = vector.shape_cast %4 : vector<1x16x128xf32> to vector<16x128xf32>
    %c0_6 = arith.constant 0 : index
    %c0_7 = arith.constant 0 : index
    %c0_8 = arith.constant 0 : index
    %6 = vector.load %arg2[%c0_6, %c0_7, %c0_8] : memref<1x16x128xf32, #tpu.memory_space<vmem>>, vector<1x16x128xf32>
    %7 = vector.shape_cast %6 : vector<1x16x128xf32> to vector<16x128xf32>
    %8 = arith.addf %5, %7 : vector<16x128xf32>
    %c0_9 = arith.constant 0 : index
    %c0_10 = arith.constant 0 : index
    %9 = vector.load %arg3[%c0_9, %c0_10] : memref<8x4xf32, #tpu.memory_space<vmem>>, vector<8x4xf32>
    %10 = vector.extract_strided_slice %8 {offsets = [0, 0], sizes = [4, 128], strides = [1, 1]} : vector<16x128xf32> to vector<4x128xf32>
    %cst_11 = arith.constant dense<0.000000e+00> : vector<8x128xf32>
    %11 = tpu.matmul %9, %10, %cst_11 {dimension_numbers = #tpu.dot_dimension_numbers<[1], [0], [0], [1], [0, 0, 1, 1], [], []>} : vector<8x4xf32>, vector<4x128xf32>, vector<8x128xf32> -> vector<8x128xf32>
    %12 = vector.extract_strided_slice %8 {offsets = [4, 0], sizes = [4, 128], strides = [1, 1]} : vector<16x128xf32> to vector<4x128xf32>
    %cst_12 = arith.constant dense<0.000000e+00> : vector<8x128xf32>
    %13 = tpu.matmul %9, %12, %cst_12 {dimension_numbers = #tpu.dot_dimension_numbers<[1], [0], [0], [1], [0, 0, 1, 1], [], []>} : vector<8x4xf32>, vector<4x128xf32>, vector<8x128xf32> -> vector<8x128xf32>
    %14 = vector.extract_strided_slice %8 {offsets = [8, 0], sizes = [4, 128], strides = [1, 1]} : vector<16x128xf32> to vector<4x128xf32>
    %cst_13 = arith.constant dense<0.000000e+00> : vector<8x128xf32>
    %15 = tpu.matmul %9, %14, %cst_13 {dimension_numbers = #tpu.dot_dimension_numbers<[1], [0], [0], [1], [0, 0, 1, 1], [], []>} : vector<8x4xf32>, vector<4x128xf32>, vector<8x128xf32> -> vector<8x128xf32>
    %16 = vector.extract_strided_slice %8 {offsets = [12, 0], sizes = [4, 128], strides = [1, 1]} : vector<16x128xf32> to vector<4x128xf32>
    %cst_14 = arith.constant dense<0.000000e+00> : vector<8x128xf32>
    %17 = tpu.matmul %9, %16, %cst_14 {dimension_numbers = #tpu.dot_dimension_numbers<[1], [0], [0], [1], [0, 0, 1, 1], [], []>} : vector<8x4xf32>, vector<4x128xf32>, vector<8x128xf32> -> vector<8x128xf32>
    %cst_15 = arith.constant 1.000000e+00 : f32
    %18 = vector.broadcast %cst_15 : f32 to vector<8x128xf32>
    %19 = arith.mulf %18, %11 : vector<8x128xf32>
    %c16 = arith.constant 16 : index
    %c0_16 = arith.constant 0 : index
    %20 = vector.load %arg8[%c16, %c0_16] : memref<96x128xf32, #tpu.memory_space<vmem>>, vector<8x128xf32>
    tpu.vector_store %arg8[%c16, %c0_16], %19 {strides = array<i32>} : memref<96x128xf32, #tpu.memory_space<vmem>>, vector<8x128xf32>,
    %cst_17 = arith.constant 0.571428597 : f32
    %21 = vector.broadcast %cst_17 : f32 to vector<8x128xf32>
    %22 = arith.mulf %21, %11 : vector<8x128xf32>
    %cst_18 = arith.constant 0.428571433 : f32
    %23 = vector.broadcast %cst_18 : f32 to vector<8x128xf32>
    %24 = arith.mulf %23, %13 : vector<8x128xf32>
    %25 = arith.addf %22, %24 : vector<8x128xf32>
    %c24 = arith.constant 24 : index
    %c0_19 = arith.constant 0 : index
    %26 = vector.load %arg8[%c24, %c0_19] : memref<96x128xf32, #tpu.memory_space<vmem>>, vector<8x128xf32>
    tpu.vector_store %arg8[%c24, %c0_19], %25 {strides = array<i32>} : memref<96x128xf32, #tpu.memory_space<vmem>>, vector<8x128xf32>,
    %cst_20 = arith.constant 0.142857149 : f32
    %27 = vector.broadcast %cst_20 : f32 to vector<8x128xf32>
    %28 = arith.mulf %27, %11 : vector<8x128xf32>
    %cst_21 = arith.constant 0.857142865 : f32
    %29 = vector.broadcast %cst_21 : f32 to vector<8x128xf32>
    %30 = arith.mulf %29, %13 : vector<8x128xf32>
    %31 = arith.addf %28, %30 : vector<8x128xf32>
    %c32 = arith.constant 32 : index
    %c0_22 = arith.constant 0 : index
    %32 = vector.load %arg8[%c32, %c0_22] : memref<96x128xf32, #tpu.memory_space<vmem>>, vector<8x128xf32>
    tpu.vector_store %arg8[%c32, %c0_22], %31 {strides = array<i32>} : memref<96x128xf32, #tpu.memory_space<vmem>>, vector<8x128xf32>,
    %cst_23 = arith.constant 0.714285731 : f32
    %33 = vector.broadcast %cst_23 : f32 to vector<8x128xf32>
    %34 = arith.mulf %33, %13 : vector<8x128xf32>
    %cst_24 = arith.constant 0.285714298 : f32
    %35 = vector.broadcast %cst_24 : f32 to vector<8x128xf32>
    %36 = arith.mulf %35, %15 : vector<8x128xf32>
    %37 = arith.addf %34, %36 : vector<8x128xf32>
    %c40 = arith.constant 40 : index
    %c0_25 = arith.constant 0 : index
    %38 = vector.load %arg8[%c40, %c0_25] : memref<96x128xf32, #tpu.memory_space<vmem>>, vector<8x128xf32>
    tpu.vector_store %arg8[%c40, %c0_25], %37 {strides = array<i32>} : memref<96x128xf32, #tpu.memory_space<vmem>>, vector<8x128xf32>,
    %cst_26 = arith.constant 0.285714298 : f32
    %39 = vector.broadcast %cst_26 : f32 to vector<8x128xf32>
    %40 = arith.mulf %39, %13 : vector<8x128xf32>
    %cst_27 = arith.constant 0.714285731 : f32
    %41 = vector.broadcast %cst_27 : f32 to vector<8x128xf32>
    %42 = arith.mulf %41, %15 : vector<8x128xf32>
    %43 = arith.addf %40, %42 : vector<8x128xf32>
    %c48 = arith.constant 48 : index
    %c0_28 = arith.constant 0 : index
    %44 = vector.load %arg8[%c48, %c0_28] : memref<96x128xf32, #tpu.memory_space<vmem>>, vector<8x128xf32>
    tpu.vector_store %arg8[%c48, %c0_28], %43 {strides = array<i32>} : memref<96x128xf32, #tpu.memory_space<vmem>>, vector<8x128xf32>,
    %cst_29 = arith.constant 0.857142865 : f32
    %45 = vector.broadcast %cst_29 : f32 to vector<8x128xf32>
    %46 = arith.mulf %45, %15 : vector<8x128xf32>
    %cst_30 = arith.constant 0.142857149 : f32
    %47 = vector.broadcast %cst_30 : f32 to vector<8x128xf32>
    %48 = arith.mulf %47, %17 : vector<8x128xf32>
    %49 = arith.addf %46, %48 : vector<8x128xf32>
    %c56 = arith.constant 56 : index
    %c0_31 = arith.constant 0 : index
    %50 = vector.load %arg8[%c56, %c0_31] : memref<96x128xf32, #tpu.memory_space<vmem>>, vector<8x128xf32>
    tpu.vector_store %arg8[%c56, %c0_31], %49 {strides = array<i32>} : memref<96x128xf32, #tpu.memory_space<vmem>>, vector<8x128xf32>,
    %cst_32 = arith.constant 0.428571433 : f32
    %51 = vector.broadcast %cst_32 : f32 to vector<8x128xf32>
    %52 = arith.mulf %51, %15 : vector<8x128xf32>
    %cst_33 = arith.constant 0.571428597 : f32
    %53 = vector.broadcast %cst_33 : f32 to vector<8x128xf32>
    %54 = arith.mulf %53, %17 : vector<8x128xf32>
    %55 = arith.addf %52, %54 : vector<8x128xf32>
    %c64 = arith.constant 64 : index
    %c0_34 = arith.constant 0 : index
    %56 = vector.load %arg8[%c64, %c0_34] : memref<96x128xf32, #tpu.memory_space<vmem>>, vector<8x128xf32>
    tpu.vector_store %arg8[%c64, %c0_34], %55 {strides = array<i32>} : memref<96x128xf32, #tpu.memory_space<vmem>>, vector<8x128xf32>,
    %cst_35 = arith.constant 1.000000e+00 : f32
    %57 = vector.broadcast %cst_35 : f32 to vector<8x128xf32>
    %58 = arith.mulf %57, %17 : vector<8x128xf32>
    %c72 = arith.constant 72 : index
    %c0_36 = arith.constant 0 : index
    %59 = vector.load %arg8[%c72, %c0_36] : memref<96x128xf32, #tpu.memory_space<vmem>>, vector<8x128xf32>
    tpu.vector_store %arg8[%c72, %c0_36], %58 {strides = array<i32>} : memref<96x128xf32, #tpu.memory_space<vmem>>, vector<8x128xf32>,
    %60 = tpu.iota {dimensions = array<i32: 0>} : vector<64x128xi32>
    %c7_i32 = arith.constant 7 : i32
    %61 = vector.broadcast %c7_i32 : i32 to vector<64x128xi32>
    %62 = arith.andi %60, %61 : vector<64x128xi32>
    %c8 = arith.constant 8 : index
    %c0_37 = arith.constant 0 : index
    %63 = vector.load %arg8[%c8, %c0_37] : memref<96x128xf32, #tpu.memory_space<vmem>>, vector<64x128xf32>
    %64 = arith.truncf %63 : vector<64x128xf32> to vector<64x128xbf16>
    %c1 = arith.constant 1 : index
    %c0_38 = arith.constant 0 : index
    %c0_39 = arith.constant 0 : index
    %65 = vector.load %arg4[%c1, %c0_38, %c0_39] : memref<9x128x128xbf16, #tpu.memory_space<vmem>>, vector<1x128x128xbf16>
    %66 = vector.shape_cast %65 : vector<1x128x128xbf16> to vector<128x128xbf16>
    %cst_40 = arith.constant dense<0.000000e+00> : vector<64x128xf32>
    %67 = tpu.matmul %64, %66, %cst_40 {dimension_numbers = #tpu.dot_dimension_numbers<[1], [0], [0], [1], [0, 0, 1, 1], [], []>} : vector<64x128xbf16>, vector<128x128xbf16>, vector<64x128xf32> -> vector<64x128xf32>
    %c16_41 = arith.constant 16 : index
    %c0_42 = arith.constant 0 : index
    %68 = vector.load %arg8[%c16_41, %c0_42] : memref<96x128xf32, #tpu.memory_space<vmem>>, vector<64x128xf32>
    %69 = arith.truncf %68 : vector<64x128xf32> to vector<64x128xbf16>
    %c4 = arith.constant 4 : index
    %c0_43 = arith.constant 0 : index
    %c0_44 = arith.constant 0 : index
    %70 = vector.load %arg4[%c4, %c0_43, %c0_44] : memref<9x128x128xbf16, #tpu.memory_space<vmem>>, vector<1x128x128xbf16>
    %71 = vector.shape_cast %70 : vector<1x128x128xbf16> to vector<128x128xbf16>
    %cst_45 = arith.constant dense<0.000000e+00> : vector<64x128xf32>
    %72 = tpu.matmul %69, %71, %cst_45 {dimension_numbers = #tpu.dot_dimension_numbers<[1], [0], [0], [1], [0, 0, 1, 1], [], []>} : vector<64x128xbf16>, vector<128x128xbf16>, vector<64x128xf32> -> vector<64x128xf32>
    %73 = arith.addf %67, %72 : vector<64x128xf32>
    %c24_46 = arith.constant 24 : index
    %c0_47 = arith.constant 0 : index
    %74 = vector.load %arg8[%c24_46, %c0_47] : memref<96x128xf32, #tpu.memory_space<vmem>>, vector<64x128xf32>
    %75 = arith.truncf %74 : vector<64x128xf32> to vector<64x128xbf16>
    %c7 = arith.constant 7 : index
    %c0_48 = arith.constant 0 : index
    %c0_49 = arith.constant 0 : index
    %76 = vector.load %arg4[%c7, %c0_48, %c0_49] : memref<9x128x128xbf16, #tpu.memory_space<vmem>>, vector<1x128x128xbf16>
    %77 = vector.shape_cast %76 : vector<1x128x128xbf16> to vector<128x128xbf16>
    %cst_50 = arith.constant dense<0.000000e+00> : vector<64x128xf32>
    %78 = tpu.matmul %75, %77, %cst_50 {dimension_numbers = #tpu.dot_dimension_numbers<[1], [0], [0], [1], [0, 0, 1, 1], [], []>} : vector<64x128xbf16>, vector<128x128xbf16>, vector<64x128xf32> -> vector<64x128xf32>
    %79 = arith.addf %73, %78 : vector<64x128xf32>
    %c0_i32 = arith.constant 0 : i32
    %80 = vector.broadcast %c0_i32 : i32 to vector<64x128xi32>
    %81 = arith.cmpi eq, %62, %80 : vector<64x128xi32>
    %c7_51 = arith.constant 7 : index
    %c0_52 = arith.constant 0 : index
    %82 = vector.load %arg8[%c7_51, %c0_52] : memref<96x128xf32, #tpu.memory_space<vmem>>, vector<64x128xf32>
    %83 = arith.truncf %82 : vector<64x128xf32> to vector<64x128xbf16>
    %c0_53 = arith.constant 0 : index
    %c0_54 = arith.constant 0 : index
    %c0_55 = arith.constant 0 : index
    %84 = vector.load %arg4[%c0_53, %c0_54, %c0_55] : memref<9x128x128xbf16, #tpu.memory_space<vmem>>, vector<1x128x128xbf16>
    %85 = vector.shape_cast %84 : vector<1x128x128xbf16> to vector<128x128xbf16>
    %cst_56 = arith.constant dense<0.000000e+00> : vector<64x128xf32>
    %86 = tpu.matmul %83, %85, %cst_56 {dimension_numbers = #tpu.dot_dimension_numbers<[1], [0], [0], [1], [0, 0, 1, 1], [], []>} : vector<64x128xbf16>, vector<128x128xbf16>, vector<64x128xf32> -> vector<64x128xf32>
    %c15 = arith.constant 15 : index
    %c0_57 = arith.constant 0 : index
    %87 = vector.load %arg8[%c15, %c0_57] : memref<96x128xf32, #tpu.memory_space<vmem>>, vector<64x128xf32>
    %88 = arith.truncf %87 : vector<64x128xf32> to vector<64x128xbf16>
    %c3 = arith.constant 3 : index
    %c0_58 = arith.constant 0 : index
    %c0_59 = arith.constant 0 : index
    %89 = vector.load %arg4[%c3, %c0_58, %c0_59] : memref<9x128x128xbf16, #tpu.memory_space<vmem>>, vector<1x128x128xbf16>
    %90 = vector.shape_cast %89 : vector<1x128x128xbf16> to vector<128x128xbf16>
    %cst_60 = arith.constant dense<0.000000e+00> : vector<64x128xf32>
    %91 = tpu.matmul %88, %90, %cst_60 {dimension_numbers = #tpu.dot_dimension_numbers<[1], [0], [0], [1], [0, 0, 1, 1], [], []>} : vector<64x128xbf16>, vector<128x128xbf16>, vector<64x128xf32> -> vector<64x128xf32>
    %92 = arith.addf %86, %91 : vector<64x128xf32>
    %c23 = arith.constant 23 : index
    %c0_61 = arith.constant 0 : index
    %93 = vector.load %arg8[%c23, %c0_61] : memref<96x128xf32, #tpu.memory_space<vmem>>, vector<64x128xf32>
    %94 = arith.truncf %93 : vector<64x128xf32> to vector<64x128xbf16>
    %c6 = arith.constant 6 : index
    %c0_62 = arith.constant 0 : index
    %c0_63 = arith.constant 0 : index
    %95 = vector.load %arg4[%c6, %c0_62, %c0_63] : memref<9x128x128xbf16, #tpu.memory_space<vmem>>, vector<1x128x128xbf16>
    %96 = vector.shape_cast %95 : vector<1x128x128xbf16> to vector<128x128xbf16>
    %cst_64 = arith.constant dense<0.000000e+00> : vector<64x128xf32>
    %97 = tpu.matmul %94, %96, %cst_64 {dimension_numbers = #tpu.dot_dimension_numbers<[1], [0], [0], [1], [0, 0, 1, 1], [], []>} : vector<64x128xbf16>, vector<128x128xbf16>, vector<64x128xf32> -> vector<64x128xf32>
    %98 = arith.addf %92, %97 : vector<64x128xf32>
    %cst_65 = arith.constant 0.000000e+00 : f32
    %99 = vector.broadcast %cst_65 : f32 to vector<64x128xf32>
    %100 = arith.select %81, %99, %98 : vector<64x128xi1>, vector<64x128xf32>
    %101 = arith.addf %79, %100 : vector<64x128xf32>
    %c7_i32_66 = arith.constant 7 : i32
    %102 = vector.broadcast %c7_i32_66 : i32 to vector<64x128xi32>
    %103 = arith.cmpi eq, %62, %102 : vector<64x128xi32>
    %c9 = arith.constant 9 : index
    %c0_67 = arith.constant 0 : index
    %104 = vector.load %arg8[%c9, %c0_67] : memref<96x128xf32, #tpu.memory_space<vmem>>, vector<64x128xf32>
    %105 = arith.truncf %104 : vector<64x128xf32> to vector<64x128xbf16>
    %c2 = arith.constant 2 : index
    %c0_68 = arith.constant 0 : index
    %c0_69 = arith.constant 0 : index
    %106 = vector.load %arg4[%c2, %c0_68, %c0_69] : memref<9x128x128xbf16, #tpu.memory_space<vmem>>, vector<1x128x128xbf16>
    %107 = vector.shape_cast %106 : vector<1x128x128xbf16> to vector<128x128xbf16>
    %cst_70 = arith.constant dense<0.000000e+00> : vector<64x128xf32>
    %108 = tpu.matmul %105, %107, %cst_70 {dimension_numbers = #tpu.dot_dimension_numbers<[1], [0], [0], [1], [0, 0, 1, 1], [], []>} : vector<64x128xbf16>, vector<128x128xbf16>, vector<64x128xf32> -> vector<64x128xf32>
    %c17 = arith.constant 17 : index
    %c0_71 = arith.constant 0 : index
    %109 = vector.load %arg8[%c17, %c0_71] : memref<96x128xf32, #tpu.memory_space<vmem>>, vector<64x128xf32>
    %110 = arith.truncf %109 : vector<64x128xf32> to vector<64x128xbf16>
    %c5 = arith.constant 5 : index
    %c0_72 = arith.constant 0 : index
    %c0_73 = arith.constant 0 : index
    %111 = vector.load %arg4[%c5, %c0_72, %c0_73] : memref<9x128x128xbf16, #tpu.memory_space<vmem>>, vector<1x128x128xbf16>
    %112 = vector.shape_cast %111 : vector<1x128x128xbf16> to vector<128x128xbf16>
    %cst_74 = arith.constant dense<0.000000e+00> : vector<64x128xf32>
    %113 = tpu.matmul %110, %112, %cst_74 {dimension_numbers = #tpu.dot_dimension_numbers<[1], [0], [0], [1], [0, 0, 1, 1], [], []>} : vector<64x128xbf16>, vector<128x128xbf16>, vector<64x128xf32> -> vector<64x128xf32>
    %114 = arith.addf %108, %113 : vector<64x128xf32>
    %c25 = arith.constant 25 : index
    %c0_75 = arith.constant 0 : index
    %115 = vector.load %arg8[%c25, %c0_75] : memref<96x128xf32, #tpu.memory_space<vmem>>, vector<64x128xf32>
    %116 = arith.truncf %115 : vector<64x128xf32> to vector<64x128xbf16>
    %c8_76 = arith.constant 8 : index
    %c0_77 = arith.constant 0 : index
    %c0_78 = arith.constant 0 : index
    %117 = vector.load %arg4[%c8_76, %c0_77, %c0_78] : memref<9x128x128xbf16, #tpu.memory_space<vmem>>, vector<1x128x128xbf16>
    %118 = vector.shape_cast %117 : vector<1x128x128xbf16> to vector<128x128xbf16>
    %cst_79 = arith.constant dense<0.000000e+00> : vector<64x128xf32>
    %119 = tpu.matmul %116, %118, %cst_79 {dimension_numbers = #tpu.dot_dimension_numbers<[1], [0], [0], [1], [0, 0, 1, 1], [], []>} : vector<64x128xbf16>, vector<128x128xbf16>, vector<64x128xf32> -> vector<64x128xf32>
    %120 = arith.addf %114, %119 : vector<64x128xf32>
    %cst_80 = arith.constant 0.000000e+00 : f32
    %121 = vector.broadcast %cst_80 : f32 to vector<64x128xf32>
    %122 = arith.select %103, %121, %120 : vector<64x128xi1>, vector<64x128xf32>
    %123 = arith.addf %101, %122 : vector<64x128xf32>
    %c0_81 = arith.constant 0 : index
    %c0_82 = arith.constant 0 : index
    %124 = vector.load %arg5[%c0_81, %c0_82] : memref<1x128xf32, #tpu.memory_space<vmem>>, vector<1x128xf32>
    %125 = vector.broadcast %124 : vector<1x128xf32> to vector<64x128xf32>
    %126 = arith.mulf %123, %125 : vector<64x128xf32>
    %c0_83 = arith.constant 0 : index
    %c0_84 = arith.constant 0 : index
    %127 = vector.load %arg6[%c0_83, %c0_84] : memref<1x128xf32, #tpu.memory_space<vmem>>, vector<1x128xf32>
    %128 = vector.broadcast %127 : vector<1x128xf32> to vector<64x128xf32>
    %129 = arith.addf %126, %128 : vector<64x128xf32>
    %cst_85 = arith.constant 0.000000e+00 : f32
    %130 = vector.broadcast %cst_85 : f32 to vector<64x128xf32>
    %131 = arith.maximumf %129, %130 : vector<64x128xf32>
    %c0_86 = arith.constant 0 : index
    %c0_87 = arith.constant 0 : index
    %c0_88 = arith.constant 0 : index
    %132 = vector.load %arg7[%c0_86, %c0_87, %c0_88] : memref<1x64x128xf32, #tpu.memory_space<vmem>>, vector<1x64x128xf32>
    %133 = vector.shape_cast %132 : vector<1x64x128xf32> to vector<64x128xf32>
    %134 = vector.shape_cast %131 : vector<64x128xf32> to vector<1x64x128xf32>
    tpu.vector_store %arg7[%c0_86, %c0_87, %c0_88], %134 {strides = array<i32>} : memref<1x64x128xf32, #tpu.memory_space<vmem>>, vector<1x64x128xf32>,
    return
  }
  func.func @transform_0(%arg0: i32) -> (i32, i32, i32) {
    %c0_i32 = arith.constant 0 : i32
    %c0_i32_0 = arith.constant 0 : i32
    %c0_i32_1 = arith.constant 0 : i32
    return %arg0, %c0_i32, %c0_i32_0 : i32, i32, i32
  }
  func.func @transform_1(%arg0: i32) -> (i32, i32, i32) {
    %c0_i32 = arith.constant 0 : i32
    %c0_i32_0 = arith.constant 0 : i32
    %c0_i32_1 = arith.constant 0 : i32
    return %arg0, %c0_i32, %c0_i32_0 : i32, i32, i32
  }
  func.func @transform_2(%arg0: i32) -> (i32, i32) {
    %c0_i32 = arith.constant 0 : i32
    %c0_i32_0 = arith.constant 0 : i32
    %c0_i32_1 = arith.constant 0 : i32
    return %c0_i32, %c0_i32_0 : i32, i32
  }
  func.func @transform_3(%arg0: i32) -> (i32, i32, i32) {
    %c0_i32 = arith.constant 0 : i32
    %c0_i32_0 = arith.constant 0 : i32
    %c0_i32_1 = arith.constant 0 : i32
    %c0_i32_2 = arith.constant 0 : i32
    return %c0_i32, %c0_i32_0, %c0_i32_1 : i32, i32, i32
  }
  func.func @transform_4(%arg0: i32) -> (i32, i32) {
    %c0_i32 = arith.constant 0 : i32
    %c0_i32_0 = arith.constant 0 : i32
    %c0_i32_1 = arith.constant 0 : i32
    return %c0_i32, %c0_i32_0 : i32, i32
  }
  func.func @transform_5(%arg0: i32) -> (i32, i32) {
    %c0_i32 = arith.constant 0 : i32
    %c0_i32_0 = arith.constant 0 : i32
    %c0_i32_1 = arith.constant 0 : i32
    return %c0_i32, %c0_i32_0 : i32, i32
  }
  func.func @transform_6(%arg0: i32) -> (i32, i32, i32) {
    %c0_i32 = arith.constant 0 : i32
    %c0_i32_0 = arith.constant 0 : i32
    %c0_i32_1 = arith.constant 0 : i32
    return %arg0, %c0_i32, %c0_i32_0 : i32, i32, i32
  }
}

</mosaic_0001>

<bundles_post_ra>
// kernel: _lambda_.4
= control target key start
LH: loop header
LB: loop body
LE: loop exit
PB: predicated region body
PF: predicated region fallthrough
CT: control target
= control target key end

     0   :  { %s1649_s24 = smov 0   ;;  %s1940_s0 = inlined_call_operand.vmem [shape: f32[2,16,64], index: 0, kind: input, shape index: {}]   ;;  %s1941_s1 = inlined_call_operand.vmem [shape: bf16[9,64,128], index: 1, kind: input, shape index: {}]   ;;  %s1942_s2 = inlined_call_operand.vmem [shape: f32[1,128], index: 2, kind: input, shape index: {}]   ;;  %s1943_s3 = inlined_call_operand.vmem [shape: f32[1,128], index: 3, kind: input, shape index: {}]   ;;  %s1944_s4 = inlined_call_operand.vmem [shape: f32[128,128], index: 4, kind: input, shape index: {}]   ;;  %s1945_s5 = inlined_call_operand.vmem [shape: f32[1,128], index: 5, kind: input, shape index: {}]   ;;  %s1946_s6 = inlined_call_operand.vmem [shape: f32[1,128], index: 6, kind: input, shape index: {}]   ;;  %s1947_s7 = inlined_call_operand.vmem [shape: f32[2,16,128], index: 7, kind: output, shape index: {}]  }
   0x1 LB: > { %s1219_s25 = sadd.s32 4294967295, %s1605_s24   ;;  %p1223_p0 = scmp.ge.s32.totalorder %s1605_s24, 1  ;;  %s1605_s24 = sphi %s1649_s24, %s17_s24  }
   0x2   : > { %p237_p1 = scmp.lt.s32.totalorder %s1605_s24, 3 }
   0x4   : > { %p238_p2 = pnand %p1223_p0, %p237_p1 }
   0x5   : > { %p269_p3 = scmp.lt.s32.totalorder (!%p238_p2), %s1219_s25, 1 }
   0x6   : > { %241 = sbr.rel (%p238_p2) target bundleno = 550 (0x226), region = 48 }
   0xb   : > { %v1559_v0 = vld [vmem:[%s1941_s1 + $0x98] sm:$0xff]   ;;  %v1607_v1 = vmov 0.0   ;;  %v1561_v3 = vld [vmem:[%s1941_s1 + $0x90] sm:$0xff]   ;;  %vm1608_vm0 = vmmov 0   ;;  %vm282_vm1 = vcmask 523264   ;;  %s1951_s25 = smov (!%p269_p3, %s1219_s25), 1 }
   0xc   : > { %1406 = vmatprep.subr.bf16.mxu0 %v1607_v1  ;;  %1418 = vmatprep.subr.bf16.mxu1 %v1607_v1  ;;  %v1560_v2 = vld [vmem:[%s1941_s1 + $0x38] sm:$0xff]   ;;  %v1562_v4 = vld [vmem:[%s1941_s1 + $0x30] sm:$0xff]   ;;  %283 = vst.msk [vmem:[#allocation2] sm:$0xff] %vm282_vm1, %v1607_v1  ;;  %286 = vst.msk [vmem:[#allocation2 + $0x1c] sm:$0xff] %vm282_vm1, %v1607_v1  ;;  %vm284_vm2 = vcmask 519168   ;;  %s1342_s13 = sshll.u32 %s1951_s25, 4 }
   0xd   : > { %1407 = vmatpush3.bf16.msra.mxu0 %v1559_v0  ;;  %1414 = vmatprep.mubr.msk.bf16.mxu0 %vm1608_vm0, %v1607_v1  ;;  %v1563_v5 = vld [vmem:[%s1941_s1 + $0x88] sm:$0xff]   ;;  %285 = vst.msk [vmem:[#allocation2 + $0x8] sm:$0xf] %vm284_vm2, %v1607_v1  ;;  %s273_s18 = scalar_lea.vmem %s1940_s0, %s1342_s13  ;;  %v1565_v9 = vld [vmem:[%s1941_s1 + $0x80] sm:$0xff]   ;;  %v1567_v11 = vld [vmem:[%s1941_s1 + $0xf8] sm:$0xff]   ;;  %s278_s21 = scalar_lea.vmem %s1947_s7, %s1342_s13 }
   0xe   : > { %1419 = vmatpush3.bf16.msra.mxu1 %v1560_v2  ;;  %1408 = vmatprep.subr.bf16.mxu0 %v1607_v1  ;;  %v1564_v6 = vld [vmem:[%s1941_s1 + $0x28] sm:$0xff]   ;;  %v280_v7 = vld [vmem:[%s273_s18] sm:$0xff]  ;;  %v1568_v17 = vld [vmem:[%s1941_s1 + $0x78] sm:$0xff]  }
   0xf   : > { %1420 = vmatprep.subr.bf16.mxu1 %v1607_v1  ;;  %1426 = vmatprep.mubr.msk.bf16.mxu1 %vm1608_vm0, %v1607_v1  ;;  %v281_v8 = vld [vmem:[%s273_s18 + $0x8] sm:$0xff]  ;;  %288 = vst.msk [vmem:[#allocation2 + $0xc] sm:$0xff] %vm282_vm1, %v280_v7  ;;  %v1566_v10 = vld [vmem:[%s1941_s1 + $0x20] sm:$0xff]   ;;  %v1569_v19 = vld [vmem:[%s1941_s1 + $0xf0] sm:$0xff]  }
  0x10   : > { %289 = vst.msk [vmem:[#allocation2 + $0x14] sm:$0xff] %vm282_vm1, %v281_v8  ;;  %v1570_v20 = vld [vmem:[%s1941_s1 + $0x70] sm:$0xff]   ;;  %v1571_v21 = vld [vmem:[%s1941_s1 + $0xe8] sm:$0xff]   ;;  %v1573_v23 = vld [vmem:[%s1941_s1 + $0xe0] sm:$0xff]  }
  0x11   : > { %1409 = vmatpush3.bf16.msra.mxu0 %v1561_v3  ;;  %v1572_v22 = vld [vmem:[%s1941_s1 + $0x68] sm:$0xff]   ;;  %v1574_v24 = vld [vmem:[%s1941_s1 + $0x60] sm:$0xff]   ;;  %v1575_v30 = vld [vmem:[%s1941_s1 + $0x18] sm:$0xff]  }
  0x12   : > { %1421 = vmatpush3.bf16.msra.mxu1 %v1562_v4  ;;  %1410 = vmatprep.subr.bf16.mxu0 %v1607_v1  ;;  %v1576_v31 = vld [vmem:[%s1941_s1 + $0xd8] sm:$0xff]   ;;  %v1577_v32 = vld [vmem:[%s1941_s1 + $0x10] sm:$0xff]   ;;  %v1579_v34 = vld [vmem:[%s1941_s1 + $0x8] sm:$0xff]  }
  0x13   : > { %1422 = vmatprep.subr.bf16.mxu1 %v1607_v1  ;;  %v1578_v33 = vld [vmem:[%s1941_s1 + $0xd0] sm:$0xff]   ;;  %v1580_v35 = vld [vmem:[%s1941_s1 + $0xc8] sm:$0xff]   ;;  %v1581_v36 = vld [vmem:[%s1941_s1] sm:$0xff]  }
  0x14   : > { %v1582_v39 = vld [vmem:[%s1941_s1 + $0xc0] sm:$0xff]   ;;  %v1583_v43 = vld [vmem:[%s1941_s1 + $0xb8] sm:$0xff]   ;;  %v1585_v45 = vld [vmem:[%s1941_s1 + $0xb0] sm:$0xff]  }
  0x15   : > { %1411 = vmatpush3.bf16.msra.mxu0 %v1563_v5  ;;  %v1584_v44 = vld [vmem:[%s1941_s1 + $0x58] sm:$0xff]   ;;  %v1586_v46 = vld [vmem:[%s1941_s1 + $0x50] sm:$0xff]   ;;  %v1587_v47 = vld [vmem:[%s1941_s1 + $0xa8] sm:$0xff]  }
  0x16   : > { %1423 = vmatpush3.bf16.msra.mxu1 %v1564_v6  ;;  %1412 = vmatprep.subr.bf16.mxu0 %v1607_v1  ;;  %v307_v12 = vld [vmem:[#allocation2 + $0xc] sm:$0xff]  ;;  %v1589_v49 = vld [vmem:[%s1941_s1 + $0xa0] sm:$0xff]   ;;  %v1591_v57 = vld [vmem:[%s1941_s1 + $0x118] sm:$0xff]  }
  0x17   : > { %1424 = vmatprep.subr.bf16.mxu1 %v1607_v1  ;;  %v308_v13 = vld [vmem:[#allocation2 + $0x14] sm:$0xff]  ;;  %v295_v14 = vld [vmem:[#allocation2 + $0x8] sm:$0xff]  ;;  %v1590_v52 = vld [vmem:[%s1941_s1 + $0x40] sm:$0xff]  }
  0x18   : > { %v309_v15 = vpack.c.bf16 %v308_v13, %v307_v12  ;;  %v296_v16 = vld [vmem:[#allocation2 + $0x10] sm:$0xff]  ;;  %v456_v25 = vld [vmem:[#allocation2 + $0x18] sm:$0xff]  ;;  %v539_v37 = vld [vmem:[#allocation2 + $0x7] sm:$0xff] }
  0x19   : > { %1413 = vmatpush3.bf16.msra.mxu0 %v1565_v9  ;;  %v297_v18 = vpack.c.bf16 %v296_v16, %v295_v14  ;;  %v550_v26 = vld [vmem:[#allocation2 + $0xb] sm:$0xff]  ;;  %v551_v27 = vld [vmem:[#allocation2 + $0x13] sm:$0xff]  ;;  %v457_v28 = vpack.c.bf16 %v456_v25, %v296_v16  ;;  %v1594_v60 = vld [vmem:[%s1941_s1 + $0x100] sm:$0xff]  }
  0x1a   : > { %1425 = vmatpush3.bf16.msra.mxu1 %v1566_v10  ;;  %1430 = vmatprep.subr.bf16.mxu0 %v1607_v1  ;;  %v552_v29 = vpack.c.bf16 %v551_v27, %v550_v26  ;;  %v540_v38 = vld [vmem:[#allocation2 + $0xf] sm:$0xff]  ;;  %v699_v40 = vld [vmem:[#allocation2 + $0x17] sm:$0xff]  ;;  %v1072_v3 = vld [vmem:[%s1944_s4 + $0x60] sm:$0xff] }
  0x1b   : > { %1442 = vmatprep.subr.bf16.mxu1 %v1607_v1  ;;  %v541_v41 = vpack.c.bf16 %v540_v38, %v539_v37  ;;  %v700_v42 = vpack.c.bf16 %v699_v40, %v540_v38  ;;  %v1588_v48 = vld [vmem:[%s1941_s1 + $0x48] sm:$0xff]   ;;  %v799_v51 = vld [vmem:[#allocation2 + $0x15] sm:$0xff]  ;;  %v1068_v7 = vld [vmem:[%s1944_s4 + $0x40] sm:$0xff]  ;;  %v290_v40 = vlaneseq }
  0x1c   : > { %1415 = vmatmul.mubr.msk.bf16.vlgmr.msra.gmra.mxu0 %vm282_vm1, %v309_v15  ;;  %v798_v50 = vld [vmem:[#allocation2 + $0xd] sm:$0xff]  ;;  %v947_v61 = vld [vmem:[#allocation2 + $0x19] sm:$0xff] }
  0x1d   : > { %1427 = vmatmul.mubr.msk.bf16.vlgmr.msra.gmra.mxu1 %vm282_vm1, %v297_v18  ;;  %1431 = vmatpush3.bf16.msra.mxu0 %v1567_v11  ;;  %v786_v53 = vld [vmem:[#allocation2 + $0x9] sm:$0xff]  ;;  %v787_v54 = vld [vmem:[#allocation2 + $0x11] sm:$0xff]  ;;  %v800_v55 = vpack.c.bf16 %v799_v51, %v798_v50  ;;  %v1064_v11 = vld [vmem:[%s1944_s4 + $0x20] sm:$0xff] }
  0x1e   : > { %1443 = vmatpush3.bf16.msra.mxu1 %v1568_v17  ;;  %1432 = vmatprep.subr.bf16.mxu0 %v1607_v1  ;;  %v788_v56 = vpack.c.bf16 %v787_v54, %v786_v53  ;;  %v1592_v58 = vld [vmem:[%s1941_s1 + $0x110] sm:$0xff]   ;;  %v1593_v59 = vld [vmem:[%s1941_s1 + $0x108] sm:$0xff]   ;;  %v948_v62 = vpack.c.bf16 %v947_v61, %v787_v54  ;;  %v1075_v63 = vld [vmem:[%s1944_s4 + $0x78] sm:$0xff] }
  0x1f   : > { %1444 = vmatprep.subr.bf16.mxu1 %v1607_v1  ;;  %1438 = vmatprep.mubr.msk.bf16.mxu0 %vm1608_vm0, %v1607_v1  ;;  %v1074_v0 = vld [vmem:[%s1944_s4 + $0x70] sm:$0xff]  ;;  %v1073_v2 = vld [vmem:[%s1944_s4 + $0x68] sm:$0xff]  ;;  %v1071_v4 = vld [vmem:[%s1944_s4 + $0x58] sm:$0xff] }
  0x20   : > { %1450 = vmatprep.mubr.msk.bf16.mxu1 %vm1608_vm0, %v1607_v1  ;;  %v1070_v5 = vld [vmem:[%s1944_s4 + $0x50] sm:$0xff]  ;;  %v1069_v6 = vld [vmem:[%s1944_s4 + $0x48] sm:$0xff]  ;;  %v1067_v8 = vld [vmem:[%s1944_s4 + $0x38] sm:$0xff] }
  0x21   : > { %1433 = vmatpush3.bf16.msra.mxu0 %v1569_v19  ;;  %v1066_v9 = vld [vmem:[%s1944_s4 + $0x30] sm:$0xff]  ;;  %v1065_v10 = vld [vmem:[%s1944_s4 + $0x28] sm:$0xff]  ;;  %v1063_v12 = vld [vmem:[%s1944_s4 + $0x18] sm:$0xff] }
  0x22   : > { %1445 = vmatpush3.bf16.msra.mxu1 %v1570_v20  ;;  %1434 = vmatprep.subr.bf16.mxu0 %v1607_v1  ;;  %v1062_v13 = vld [vmem:[%s1944_s4 + $0x10] sm:$0xff]  ;;  %v1061_v14 = vld [vmem:[%s1944_s4 + $0x8] sm:$0xff]  ;;  %v1060_v15 = vld [vmem:[%s1944_s4] sm:$0xff] }
  0x23   : > { %1446 = vmatprep.subr.bf16.mxu1 %v1607_v1 }
  0x25   : > { %1435 = vmatpush3.bf16.msra.mxu0 %v1571_v21 }
  0x26   : > { %1447 = vmatpush3.bf16.msra.mxu1 %v1572_v22  ;;  %1436 = vmatprep.subr.bf16.mxu0 %v1607_v1 }
  0x27   : > { %1448 = vmatprep.subr.bf16.mxu1 %v1607_v1 }
  0x29   : > { %1437 = vmatpush3.bf16.msra.mxu0 %v1573_v23 }
  0x2a   : > { %1449 = vmatpush3.bf16.msra.mxu1 %v1574_v24  ;;  %1454 = vmatprep.subr.bf16.mxu0 %v1607_v1 }
  0x2b   : > { %1466 = vmatprep.subr.bf16.mxu1 %v1607_v1 }
  0x2c   : > { %1439 = vmatmul.mubr.msk.bf16.vlgmr.msra.gmra.mxu0 %vm282_vm1, %v457_v28 }
  0x2d   : > { %1451 = vmatmul.mubr.msk.bf16.vlgmr.msra.gmra.mxu1 %vm282_vm1, %v552_v29  ;;  %1455 = vmatpush3.bf16.msra.mxu0 %v1575_v30 }
  0x2e   : > { %1467 = vmatpush3.bf16.msra.mxu1 %v1576_v31  ;;  %1456 = vmatprep.subr.bf16.mxu0 %v1607_v1 }
  0x2f   : > { %1468 = vmatprep.subr.bf16.mxu1 %v1607_v1  ;;  %1462 = vmatprep.mubr.msk.bf16.mxu0 %vm1608_vm0, %v1607_v1 }
  0x30   : > { %1474 = vmatprep.mubr.msk.bf16.mxu1 %vm1608_vm0, %v1607_v1 }
  0x31   : > { %1457 = vmatpush3.bf16.msra.mxu0 %v1577_v32 }
  0x32   : > { %1469 = vmatpush3.bf16.msra.mxu1 %v1578_v33  ;;  %1458 = vmatprep.subr.bf16.mxu0 %v1607_v1 }
  0x33   : > { %1470 = vmatprep.subr.bf16.mxu1 %v1607_v1 }
  0x35   : > { %1459 = vmatpush3.bf16.msra.mxu0 %v1579_v34 }
  0x36   : > { %1471 = vmatpush3.bf16.msra.mxu1 %v1580_v35  ;;  %1460 = vmatprep.subr.bf16.mxu0 %v1607_v1 }
  0x37   : > { %1472 = vmatprep.subr.bf16.mxu1 %v1607_v1 }
  0x39   : > { %1461 = vmatpush3.bf16.msra.mxu0 %v1581_v36 }
  0x3a   : > { %1473 = vmatpush3.bf16.msra.mxu1 %v1582_v39  ;;  %1478 = vmatprep.subr.bf16.mxu0 %v1607_v1 }
  0x3b   : > { %1490 = vmatprep.subr.bf16.mxu1 %v1607_v1 }
  0x3c   : > { %1463 = vmatmul.mubr.msk.bf16.vlgmr.msra.gmra.mxu0 %vm282_vm1, %v541_v41 }
  0x3d   : > { %1475 = vmatmul.mubr.msk.bf16.vlgmr.msra.gmra.mxu1 %vm282_vm1, %v700_v42  ;;  %1479 = vmatpush3.bf16.msra.mxu0 %v1583_v43 }
  0x3e   : > { %1491 = vmatpush3.bf16.msra.mxu1 %v1584_v44  ;;  %1480 = vmatprep.subr.bf16.mxu0 %v1607_v1 }
  0x3f   : > { %1492 = vmatprep.subr.bf16.mxu1 %v1607_v1  ;;  %1486 = vmatprep.mubr.msk.bf16.mxu0 %vm1608_vm0, %v1607_v1 }
  0x40   : > { %1498 = vmatprep.mubr.msk.bf16.mxu1 %vm1608_vm0, %v1607_v1 }
  0x41   : > { %1481 = vmatpush3.bf16.msra.mxu0 %v1585_v45  ;;  %v1909_v45 = vshrl.u32 %v290_v40, 7 }
  0x42   : > { %1493 = vmatpush3.bf16.msra.mxu1 %v1586_v46  ;;  %1482 = vmatprep.subr.bf16.mxu0 %v1607_v1 }
  0x43   : > { %1494 = vmatprep.subr.bf16.mxu1 %v1607_v1  ;;  %v293_v51 = vand.u32 3, %v1909_v45 }
  0x45   : > { %1483 = vmatpush3.bf16.msra.mxu0 %v1587_v47  ;;  %vm537_vm3 = vcmp.eq.s32.totalorder %v293_v51, 0  ;;  %vm784_vm5 = vcmp.eq.s32.totalorder %v293_v51, 3 }
  0x46   : > { %1495 = vmatpush3.bf16.msra.mxu1 %v1588_v48  ;;  %1484 = vmatprep.subr.bf16.mxu0 %v1607_v1 }
  0x47   : > { %1496 = vmatprep.subr.bf16.mxu1 %v1607_v1 }
  0x49   : > { %1485 = vmatpush3.bf16.msra.mxu0 %v1589_v49 }
  0x4a   : > { %1497 = vmatpush3.bf16.msra.mxu1 %v1590_v52  ;;  %1502 = vmatprep.subr.bf16.mxu0 %v1607_v1  ;;  %v292_v52 = vadd.s32 8, %v1909_v45 }
  0x4b   : > { %1514 = vmatprep.subr.mxu1 %v1607_v1 }
  0x4c   : > { %1487 = vmatmul.mubr.msk.bf16.vlgmr.msra.gmra.mxu0 %vm282_vm1, %v800_v55  ;;  %v294_v55 = vand.u32 3, %v292_v52 }
  0x4d   : > { %1499 = vmatmul.mubr.msk.bf16.vlgmr.msra.gmra.mxu1 %vm282_vm1, %v788_v56  ;;  %1503 = vmatpush3.bf16.msra.mxu0 %v1591_v57 }
  0x4e   : > { %1504 = vmatprep.subr.bf16.mxu0 %v1607_v1  ;;  %1510 = vmatprep.mubr.msk.bf16.mxu0 %vm1608_vm0, %v1607_v1  ;;  %vm1913_vm4 = vcmp.eq.s32.totalorder %v294_v55, 0  ;;  %vm785_vm6 = vcmp.eq.s32.totalorder %v294_v55, 3 }
  0x4f   : > { %1546 = vmatprep.mubr.msk.f32.mxu1 %vm1608_vm0, %v1607_v1  ;;  %1515 = vmatpush3.msra.mxu1 %v1075_v63 }
  0x50   : > { %1516 = vmatprep.subr.mxu1 %v1607_v1 }
  0x51   : > { %1505 = vmatpush3.bf16.msra.mxu0 %v1592_v58  ;;  %1517 = vmatpush3.msra.mxu1 %v1074_v0 }
  0x52   : > { %1506 = vmatprep.subr.bf16.mxu0 %v1607_v1  ;;  %1518 = vmatprep.subr.mxu1 %v1607_v1 }
  0x53   : > { %1519 = vmatpush3.msra.mxu1 %v1073_v2 }
  0x54   : > { %1520 = vmatprep.subr.mxu1 %v1607_v1 }
  0x55   : > { %1507 = vmatpush3.bf16.msra.mxu0 %v1593_v59  ;;  %1521 = vmatpush3.msra.mxu1 %v1072_v3 }
  0x56   : > { %1508 = vmatprep.subr.bf16.mxu0 %v1607_v1  ;;  %1522 = vmatprep.subr.mxu1 %v1607_v1 }
  0x57   : > { %1523 = vmatpush3.msra.mxu1 %v1071_v4 }
  0x58   : > { %1524 = vmatprep.subr.mxu1 %v1607_v1 }
  0x59   : > { %1509 = vmatpush3.bf16.msra.mxu0 %v1594_v60  ;;  %1525 = vmatpush3.msra.mxu1 %v1070_v5 }
  0x5a   : > { %1526 = vmatprep.subr.mxu1 %v1607_v1 }
  0x5b   : > { %1527 = vmatpush3.msra.mxu1 %v1069_v6  ;;  %v1337_v6 = vld [vmem:[%s1942_s2] ss:$0 sm:$0xff] }
  0x5c   : > { %1511 = vmatmul.mubr.msk.bf16.vlgmr.msra.gmra.mxu0 %vm282_vm1, %v948_v62  ;;  %1528 = vmatprep.subr.mxu1 %v1607_v1 }
  0x5d   : > { %1529 = vmatpush3.msra.mxu1 %v1068_v7 }
  0x5e   : > { %1530 = vmatprep.subr.mxu1 %v1607_v1 }
  0x5f   : > { %1531 = vmatpush3.msra.mxu1 %v1067_v8 }
  0x60   : > { %1532 = vmatprep.subr.mxu1 %v1607_v1 }
  0x61   : > { %1533 = vmatpush3.msra.mxu1 %v1066_v9 }
  0x62   : > { %1534 = vmatprep.subr.mxu1 %v1607_v1 }
  0x63   : > { %1535 = vmatpush3.msra.mxu1 %v1065_v10 }
  0x64   : > { %1536 = vmatprep.subr.mxu1 %v1607_v1 }
  0x65   : > { %1537 = vmatpush3.msra.mxu1 %v1064_v11 }
  0x66   : > { %1538 = vmatprep.subr.mxu1 %v1607_v1 }
  0x67   : > { %1539 = vmatpush3.msra.mxu1 %v1063_v12 }
  0x68   : > { %1540 = vmatprep.subr.mxu1 %v1607_v1 }
  0x69   : > { %1541 = vmatpush3.msra.mxu1 %v1062_v13 }
  0x6a   : > { %1542 = vmatprep.subr.mxu1 %v1607_v1 }
  0x6b   : > { %1543 = vmatpush3.msra.mxu1 %v1061_v14  ;;  %v1338_v14 = vld [vmem:[%s1943_s3] ss:$0 sm:$0xff] }
  0x6c   : > { %1544 = vmatprep.subr.mxu1 %v1607_v1 }
  0x6d   : > { %1545 = vmatpush3.msra.mxu1 %v1060_v15 }
  0xdc   : > { %v380_v16 = vpop.f32.mrf.mxu0 }
  0xdd   : > { %v448_v17 = vpop.f32.mrf.mxu1 }
  0xde   : > { %v449_v18 = vadd.f32 %v448_v17, %v380_v16  ;;  %v1416_v19 = vpop.f32.mrf.mxu0 }
  0xdf   : > { %v1428_v20 = vpop.f32.mrf.mxu1 }
  0xe0   : > { %v383_v21 = vpop.f32.mrf.mxu0 }
  0xe1   : > { %v451_v22 = vpop.f32.mrf.mxu1 }
  0xe2   : > { %v1417_v23 = vpop.f32.mrf.mxu0  ;;  %v452_v63 = vadd.f32 %v451_v22, %v383_v21 }
  0xe3   : > { %v1429_v24 = vpop.f32.mrf.mxu1 }
  0xec   : > { %v528_v25 = vpop.f32.mrf.mxu0 }
  0xed   : > { %v623_v26 = vpop.f32.mrf.mxu1  ;;  %v535_v59 = vadd.f32 %v528_v25, %v449_v18 }
  0xee   : > { %v1440_v27 = vpop.f32.mrf.mxu0 }
  0xef   : > { %v1452_v28 = vpop.f32.mrf.mxu1 }
  0xf0   : > { %v531_v29 = vpop.f32.mrf.mxu0 }
  0xf1   : > { %v626_v30 = vpop.f32.mrf.mxu1  ;;  %v536_v7 = vadd.f32 %v531_v29, %v452_v63 }
  0xf2   : > { %v1441_v31 = vpop.f32.mrf.mxu0 }
  0xf3   : > { %v1453_v32 = vpop.f32.mrf.mxu1 }
  0xf4   : > { %v1148_v32 = vld [vmem:[%s1946_s6] sm:$0x1] }
  0xfc   : > { %v691_v33 = vpop.f32.mrf.mxu0 }
  0xfd   : > { %v771_v1 = vpop.f32.mrf.mxu1  ;;  %v692_v49 = vadd.f32 %v691_v33, %v623_v26 }
  0xfe   : > { %v1464_v34 = vpop.f32.mrf.mxu0 }
  0xff   : > { %v1476_v35 = vpop.f32.mrf.mxu1  ;;  %v778_v53 = vadd.f32 %v771_v1, %v692_v49 }
 0x100   : > { %v694_v36 = vpop.f32.mrf.mxu0 }
 0x101   : > { %v774_v37 = vpop.f32.mrf.mxu1  ;;  %v695_v54 = vadd.f32 %v694_v36, %v626_v30  ;;  %v780_v56 = vsel %vm537_vm3, 0.0, %v778_v53  ;;  %v1146_v30 = vld [vmem:[%s1945_s5] sm:$0x1] }
 0x102   : > { %v1465_v38 = vpop.f32.mrf.mxu0  ;;  %v782_v0 = vadd.f32 %v780_v56, %v535_v59 }
 0x103   : > { %v1477_v39 = vpop.f32.mrf.mxu1  ;;  %v779_v57 = vadd.f32 %v774_v37, %v695_v54  ;;  %v1158_v38 = vsub.s32 0, %v1909_v45 }
 0x105   : > { %v781_v3 = vsel %vm1913_vm4, 0.0, %v779_v57 }
 0x106   : > { %v783_v11 = vadd.f32 %v781_v3, %v536_v7 }
 0x10c   : > { %v871_v41 = vpop.f32.mrf.mxu0 }
 0x10d   : > { %v939_v42 = vpop.f32.mrf.mxu1 }
 0x10e   : > { %v1488_v43 = vpop.f32.mrf.mxu0  ;;  %v940_v58 = vadd.f32 %v939_v42, %v871_v41 }
 0x10f   : > { %v1500_v44 = vpop.f32.mrf.mxu1 }
 0x110   : > { %v874_v46 = vpop.f32.mrf.mxu0 }
 0x111   : > { %v942_v47 = vpop.f32.mrf.mxu1 }
 0x112   : > { %v1489_v48 = vpop.f32.mrf.mxu0  ;;  %v943_v4 = vadd.f32 %v942_v47, %v874_v46 }
 0x113   : > { %v1501_v50 = vpop.f32.mrf.mxu1 }
 0x11c   : > { %v1019_v61 = vpop.f32.mrf.mxu0 }
 0x11d   : > { %v1026_v62 = vadd.f32 %v1019_v61, %v940_v58 }
 0x11e   : > { %v1512_v2 = vpop.f32.mrf.mxu0 }
 0x11f   : > { %v1028_v5 = vsel %vm784_vm5, 0.0, %v1026_v62 }
 0x120   : > { %v1030_v8 = vadd.f32 %v1028_v5, %v782_v0  ;;  %v1022_v9 = vpop.f32.mrf.mxu0 }
 0x121   : > { %v1027_v10 = vadd.f32 %v1022_v9, %v943_v4 }
 0x122   : > { %v1039_v12 = vmul.f32 %v1337_v6, %v1030_v8  ;;  %v1513_v13 = vpop.f32.mrf.mxu0 }
 0x123   : > { %v1029_v15 = vsel %vm785_vm6, 0.0, %v1027_v10 }
 0x124   : > { %v1031_v16 = vadd.f32 %v1029_v15, %v783_v11  ;;  %v1048_v17 = vadd.f32 %v1338_v14, %v1039_v12 }
 0x126   : > { %v1040_v18 = vmul.f32 %v1337_v6, %v1031_v16  ;;  %v1050_v20 = vmax.f32 %v1048_v17, 0.0 }
 0x128   : > { %v1049_v19 = vadd.f32 %v1338_v14, %v1040_v18 }
 0x12a   : > { %v1051_v21 = vmax.f32 %v1049_v19, 0.0 }
 0x12c   : > { %v1052_v22 = vadd.f32 %v1051_v21, %v1050_v20 }
 0x12e   : > { %v1053_v23 = vrot.slane %v1052_v22, 4 }
 0x130   : > { %v1054_v24 = vadd.f32 %v1053_v23, %v1052_v22 }
 0x132   : > { %v1055_v25 = vrot.slane %v1054_v24, 2 }
 0x134   : > { %v1056_v26 = vadd.f32 %v1055_v25, %v1054_v24 }
 0x136   : > { %v1057_v27 = vrot.slane %v1056_v26, 1 }
 0x138   : > { %v1058_v28 = vadd.f32 %v1057_v27, %v1056_v26 }
 0x13a   : > { %v1059_v29 = vmul.f32 0.0625, %v1058_v28 }
 0x13c   : > { %1547 = vmatmul.mubr.f32.vlgmr.msra.gmra.mxu1 %v1059_v29 }
 0x1fc   : > { %v1142_v31 = vpop.f32.mrf.mxu1 }
 0x1fd   : > { %v1147_v33 = vmul.f32 %v1146_v30, %v1142_v31 }
 0x1fe   : > { %v1548_v1 = vpop.f32.mrf.mxu1 }
 0x1ff   : > { %v1149_v34 = vadd.f32 %v1148_v32, %v1147_v33 }
 0x201   : > { %v1339_v35 = vmul.f32 -1.442695, %v1149_v34 }
 0x203   : > { %1595 = vpow2.f32 %v1339_v35 }
 0x210   : > { %v1596_v36 = vpop.eup %1595 }
 0x211   : > { %v1153_v37 = vadd.f32 1.0, %v1596_v36 }
 0x213   : > { %1597 = vrcp.f32 %v1153_v37 }
 0x220   : > { %v1598_v39 = vpop.eup %1597 }
 0x221   : > { %v1159_v40 = vrot.slane %v1598_v39, %v1158_v38 }
 0x223   : > { %v1160_v41 = vmul.f32 %v1159_v40, %v1050_v20  ;;  %v1161_v42 = vmul.f32 %v1159_v40, %v1051_v21 }
 0x225   : > { %1162 = vst [vmem:[%s278_s21] sm:$0xff] %v1160_v41  ;;  %1163 = vst [vmem:[%s278_s21 + $0x8] sm:$0xff] %v1161_v42 }
 0x226 PF: > { %s17_s24 = sadd.s32 1, %s1605_s24  }
 0x227   : > { %p14_p4 = scmp.ge.s32.totalorder %s17_s24, 4  }
 0x229   :  { %16 = sbr.rel (!%p14_p4) target bundleno = 1 (0x1), region = 86 }

// kernel: _lambda_.6
= control target key start
LH: loop header
LB: loop body
LE: loop exit
PB: predicated region body
PF: predicated region fallthrough
CT: control target
= control target key end

     0   :  { %s2084_s18 = smov 0   ;;  %s2431_s0 = inlined_call_operand.vmem [shape: f32[2,4,128], index: 0, kind: input, shape index: {}]   ;;  %s2432_s1 = inlined_call_operand.vmem [shape: f32[4,2], index: 1, kind: input, shape index: {}]   ;;  %s2433_s2 = inlined_call_operand.vmem [shape: bf16[9,128,128], index: 2, kind: input, shape index: {}]   ;;  %s2434_s3 = inlined_call_operand.vmem [shape: f32[1,128], index: 3, kind: input, shape index: {}]   ;;  %s2435_s4 = inlined_call_operand.vmem [shape: f32[1,128], index: 4, kind: input, shape index: {}]   ;;  %s2436_s5 = inlined_call_operand.vmem [shape: f32[2,16,128], index: 5, kind: output, shape index: {}]  }
   0x1 LB: > { %s1470_s19 = sadd.s32 4294967295, %s2050_s18   ;;  %p1474_p0 = scmp.ge.s32.totalorder %s2050_s18, 1  ;;  %s2050_s18 = sphi %s2084_s18, %s15_s18  }
   0x2   : > { %p186_p1 = scmp.lt.s32.totalorder %s2050_s18, 3 }
   0x4   : > { %p187_p2 = pnand %p1474_p0, %p186_p1 }
   0x5   : > { %p213_p3 = scmp.lt.s32.totalorder (!%p187_p2), %s1470_s19, 1 }
   0x6   : > { %190 = sbr.rel (%p187_p2) target bundleno = 564 (0x234), region = 40 }
   0xb   : > { %v2052_v0 = vmov 0.0   ;;  %vm2053_vm0 = vmmov 0   ;;  %v1972_v1 = vld [vmem:[%s2433_s2 + $0x138] sm:$0xff]   ;;  %s2438_s19 = smov (!%p213_p3, %s1470_s19), 1  ;;  %v228_v2 = vld [vmem:[%s2432_s1] sm:$0xf] }
   0xc   : > { %1772 = vmatprep.subr.mxu1 %v2052_v0  ;;  %223 = vst [vmem:[#allocation2] sm:$0xff] %v2052_v0  ;;  %224 = vst [vmem:[#allocation2 + $0x8] sm:$0xf] %v2052_v0  ;;  %1774 = vmatprep.mubr.msk.f32.mxu1 %vm2053_vm0, %v2052_v0  ;;  %v1974_v3 = vld [vmem:[%s2433_s2 + $0x130] sm:$0xff]   ;;  %s1475_s26 = sshll.u32 %s2438_s19, 2  ;;  %vm233_vm1 = vcmask 1041408  }
   0xd   : > { %225 = vst [vmem:[#allocation2 + $0x1c] sm:$0xff] %v2052_v0  ;;  %1782 = vmatprep.subr.bf16.mxu0 %v2052_v0  ;;  %1798 = vmatprep.mubr.msk.bf16.mxu0 %vm2053_vm0, %v2052_v0  ;;  %s216_s29 = scalar_lea.vmem %s2431_s0, %s1475_s26  ;;  %vm229_vm2 = vcmask 15360   ;;  %v1976_v6 = vld [vmem:[%s2433_s2 + $0x128] sm:$0xff]   ;;  %v1973_v7 = vld [vmem:[%s2433_s2 + $0x78] sm:$0xff]   ;;  %v1978_v8 = vld [vmem:[%s2433_s2 + $0x120] sm:$0xff]   ;;  %s1686_s11 = sshll.u32 %s2438_s19, 4 }
   0xe   : > { %1783 = vmatpush3.bf16.msra.mxu0 %v1972_v1  ;;  %v227_v4 = vld [vmem:[%s216_s29] sm:$0xf]  ;;  %v1975_v9 = vld [vmem:[%s2433_s2 + $0x70] sm:$0xff]   ;;  %v1977_v10 = vld [vmem:[%s2433_s2 + $0x68] sm:$0xff]   ;;  %s221_s14 = scalar_lea.vmem %s2436_s5, %s1686_s11 }
   0xf   : > { %1784 = vmatprep.subr.bf16.mxu0 %v2052_v0  ;;  %1773 = vmatpush3.msk.msra.mxu1 %vm233_vm1, %v227_v4  ;;  %v307_v5 = vrot.slane %v227_v4, 2  ;;  %v1979_v11 = vld [vmem:[%s2433_s2 + $0x60] sm:$0xff]   ;;  %v1980_v12 = vld [vmem:[%s2433_s2 + $0x118] sm:$0xff]   ;;  %v1982_v14 = vld [vmem:[%s2433_s2 + $0x110] sm:$0xff]  }
  0x10   : > { %1775 = vmatmul.mubr.msk.f32.vlgmr.msra.gmra.mxu1 %vm229_vm2, %v228_v2  ;;  %1777 = vmatprep.subr.mxu1 %v2052_v0  ;;  %v1981_v13 = vld [vmem:[%s2433_s2 + $0x58] sm:$0xff]   ;;  %v1983_v15 = vld [vmem:[%s2433_s2 + $0x50] sm:$0xff]   ;;  %v1984_v16 = vld [vmem:[%s2433_s2 + $0x108] sm:$0xff]  }
  0x11   : > { %1778 = vmatpush3.msk.msra.mxu1 %vm233_vm1, %v307_v5  ;;  %1779 = vmatprep.mubr.msk.f32.mxu1 %vm2053_vm0, %v2052_v0  ;;  %v1985_v17 = vld [vmem:[%s2433_s2 + $0x48] sm:$0xff]   ;;  %v1986_v18 = vld [vmem:[%s2433_s2 + $0x100] sm:$0xff]   ;;  %v1988_v31 = vld [vmem:[%s2433_s2 + $0x1f8] sm:$0xff]  }
  0x12   : > { %1785 = vmatpush3.bf16.msra.mxu0 %v1974_v3  ;;  %1802 = vmatprep.subr.bf16.mxu1 %v2052_v0  ;;  %v1987_v19 = vld [vmem:[%s2433_s2 + $0x40] sm:$0xff]   ;;  %v1989_v32 = vld [vmem:[%s2433_s2 + $0xf8] sm:$0xff]   ;;  %v1990_v38 = vld [vmem:[%s2433_s2 + $0x1f0] sm:$0xff]  }
  0x13   : > { %1786 = vmatprep.subr.bf16.mxu0 %v2052_v0  ;;  %v1991_v39 = vld [vmem:[%s2433_s2 + $0xf0] sm:$0xff]   ;;  %v1992_v40 = vld [vmem:[%s2433_s2 + $0x1e8] sm:$0xff]   ;;  %v1994_v42 = vld [vmem:[%s2433_s2 + $0x1e0] sm:$0xff]  }
  0x14   : > { %1780 = vmatmul.mubr.msk.f32.vlgmr.msra.gmra.mxu1 %vm229_vm2, %v228_v2  ;;  %v1993_v41 = vld [vmem:[%s2433_s2 + $0xe8] sm:$0xff]   ;;  %v1995_v43 = vld [vmem:[%s2433_s2 + $0xe0] sm:$0xff]   ;;  %v1996_v44 = vld [vmem:[%s2433_s2 + $0x1d8] sm:$0xff]  }
  0x15   : > { %1803 = vmatpush3.bf16.msra.mxu1 %v1973_v7  ;;  %1818 = vmatprep.mubr.msk.bf16.mxu1 %vm2053_vm0, %v2052_v0  ;;  %v1997_v45 = vld [vmem:[%s2433_s2 + $0xd8] sm:$0xff]   ;;  %v1998_v46 = vld [vmem:[%s2433_s2 + $0x1d0] sm:$0xff]   ;;  %v2000_v48 = vld [vmem:[%s2433_s2 + $0x1c8] sm:$0xff]  }
  0x16   : > { %1787 = vmatpush3.bf16.msra.mxu0 %v1976_v6  ;;  %1804 = vmatprep.subr.bf16.mxu1 %v2052_v0  ;;  %v1999_v47 = vld [vmem:[%s2433_s2 + $0xd0] sm:$0xff]   ;;  %v2001_v49 = vld [vmem:[%s2433_s2 + $0xc8] sm:$0xff]   ;;  %v2002_v50 = vld [vmem:[%s2433_s2 + $0x1c0] sm:$0xff]  }
  0x17   : > { %1788 = vmatprep.subr.bf16.mxu0 %v2052_v0  ;;  %v2003_v51 = vld [vmem:[%s2433_s2 + $0xc0] sm:$0xff]   ;;  %v2004_v55 = vld [vmem:[%s2433_s2 + $0x38] sm:$0xff]   ;;  %v2006_v59 = vld [vmem:[%s2433_s2 + $0x30] sm:$0xff]  }
  0x18   : > { %v2005_v56 = vld [vmem:[%s2433_s2 + $0x1b8] sm:$0xff]   ;;  %v2007_v60 = vld [vmem:[%s2433_s2 + $0x1b0] sm:$0xff]   ;;  %v2008_v61 = vld [vmem:[%s2433_s2 + $0x28] sm:$0xff]  }
  0x19   : > { %1805 = vmatpush3.bf16.msra.mxu1 %v1975_v9  ;;  %v2009_v62 = vld [vmem:[%s2433_s2 + $0x1a8] sm:$0xff]   ;;  %v2010_v63 = vld [vmem:[%s2433_s2 + $0x20] sm:$0xff]   ;;  %v2012_v2 = vld [vmem:[%s2433_s2 + $0x18] sm:$0xff]  }
  0x1a   : > { %1789 = vmatpush3.bf16.msra.mxu0 %v1978_v8  ;;  %1806 = vmatprep.subr.bf16.mxu1 %v2052_v0  ;;  %v2011_v1 = vld [vmem:[%s2433_s2 + $0x1a0] sm:$0xff]   ;;  %v2013_v3 = vld [vmem:[%s2433_s2 + $0x198] sm:$0xff]   ;;  %v2014_v4 = vld [vmem:[%s2433_s2 + $0x10] sm:$0xff]  }
  0x1b   : > { %1790 = vmatprep.subr.bf16.mxu0 %v2052_v0  ;;  %v2015_v5 = vld [vmem:[%s2433_s2 + $0x190] sm:$0xff]   ;;  %v2016_v6 = vld [vmem:[%s2433_s2 + $0x8] sm:$0xff]   ;;  %v2018_v8 = vld [vmem:[%s2433_s2] sm:$0xff]  }
  0x1c   : > { %v2017_v7 = vld [vmem:[%s2433_s2 + $0x188] sm:$0xff]   ;;  %v2019_v9 = vld [vmem:[%s2433_s2 + $0x180] sm:$0xff]  }
  0x1d   : > { %1807 = vmatpush3.bf16.msra.mxu1 %v1977_v10 }
  0x1e   : > { %1808 = vmatprep.subr.bf16.mxu1 %v2052_v0  ;;  %1791 = vmatpush3.bf16.msra.mxu0 %v1980_v12 }
  0x1f   : > { %1792 = vmatprep.subr.bf16.mxu0 %v2052_v0 }
  0x21   : > { %1809 = vmatpush3.bf16.msra.mxu1 %v1979_v11 }
  0x22   : > { %1810 = vmatprep.subr.bf16.mxu1 %v2052_v0  ;;  %1793 = vmatpush3.bf16.msra.mxu0 %v1982_v14  ;;  %v2021_v14 = vld [vmem:[%s2433_s2 + $0xb8] sm:$0xff]  }
  0x23   : > { %1794 = vmatprep.subr.bf16.mxu0 %v2052_v0 }
  0x25   : > { %1811 = vmatpush3.bf16.msra.mxu1 %v1981_v13  ;;  %v2020_v13 = vld [vmem:[%s2433_s2 + $0x178] sm:$0xff]  }
  0x26   : > { %1812 = vmatprep.subr.bf16.mxu1 %v2052_v0  ;;  %1795 = vmatpush3.bf16.msra.mxu0 %v1984_v16 }
  0x27   : > { %1796 = vmatprep.subr.bf16.mxu0 %v2052_v0 }
  0x29   : > { %1813 = vmatpush3.bf16.msra.mxu1 %v1983_v15 }
  0x2a   : > { %1814 = vmatprep.subr.bf16.mxu1 %v2052_v0  ;;  %1797 = vmatpush3.bf16.msra.mxu0 %v1986_v18  ;;  %v2023_v18 = vld [vmem:[%s2433_s2 + $0xb0] sm:$0xff]  }
  0x2b   : > { %1822 = vmatprep.subr.bf16.mxu0 %v2052_v0 }
  0x2d   : > { %1815 = vmatpush3.bf16.msra.mxu1 %v1985_v17  ;;  %v2022_v17 = vld [vmem:[%s2433_s2 + $0x170] sm:$0xff]  }
  0x2e   : > { %1816 = vmatprep.subr.bf16.mxu1 %v2052_v0 }
  0x31   : > { %1817 = vmatpush3.bf16.msra.mxu1 %v1987_v19  ;;  %v2024_v19 = vld [vmem:[%s2433_s2 + $0x168] sm:$0xff]  }
  0x32   : > { %1842 = vmatprep.subr.bf16.mxu1 %v2052_v0 }
  0xd0   : > { %v303_v20 = vpop.f32.mrf.mxu1 }
  0xd1   : > { %380 = vst [vmem:[#allocation2 + $0xc] sm:$0xf] %v303_v20  ;;  %v381_v22 = vmul.f32 0.6666667, %v303_v20  ;;  %v385_v24 = vmul.f32 0.33333334, %v303_v20 }
  0xd2   : > { %v1776_v21 = vpop.f32.mrf.mxu1  ;;  %v2025_v20 = vld [vmem:[%s2433_s2 + $0xa8] sm:$0xff]  }
  0xd3   : > { %v2026_v21 = vld [vmem:[%s2433_s2 + $0x160] sm:$0xff]  }
  0xd4   : > { %v376_v23 = vpop.f32.mrf.mxu1 }
  0xd5   : > { %v382_v25 = vmul.f32 0.33333334, %v376_v23  ;;  %v386_v26 = vmul.f32 0.6666667, %v376_v23  ;;  %389 = vst [vmem:[#allocation2 + $0x18] sm:$0xf] %v376_v23 }
  0xd6   : > { %v1781_v27 = vpop.f32.mrf.mxu1  ;;  %v2028_v23 = vld [vmem:[%s2433_s2 + $0x158] sm:$0xff]  }
  0xd7   : > { %v383_v28 = vadd.f32 %v382_v25, %v381_v22  ;;  %v387_v29 = vadd.f32 %v386_v26, %v385_v24  ;;  %v2027_v22 = vld [vmem:[%s2433_s2 + $0xa0] sm:$0xff]   ;;  %v2029_v24 = vld [vmem:[%s2433_s2 + $0x98] sm:$0xff]   ;;  %v2030_v25 = vld [vmem:[%s2433_s2 + $0x150] sm:$0xff]  }
  0xd8   : > { %v395_v30 = vld [vmem:[#allocation2 + $0x8] sm:$0xff]  ;;  %v2031_v26 = vld [vmem:[%s2433_s2 + $0x90] sm:$0xff]  }
  0xd9   : > { %384 = vst [vmem:[#allocation2 + $0x10] sm:$0xf] %v383_v28  ;;  %388 = vst [vmem:[#allocation2 + $0x14] sm:$0xf] %v387_v29  ;;  %v726_v12 = vld [vmem:[#allocation2 + $0x7] sm:$0xff] }
  0xda   : > { %v2032_v27 = vld [vmem:[%s2433_s2 + $0x148] sm:$0xff]   ;;  %v2034_v29 = vld [vmem:[%s2433_s2 + $0x140] sm:$0xff]  }
  0xdb   : > { %v2033_v28 = vld [vmem:[%s2433_s2 + $0x88] sm:$0xff]  }
  0xdc   : > { %v614_v54 = vld [vmem:[#allocation2 + $0x18] sm:$0xff] }
  0xe0   : > { %v415_v33 = vld [vmem:[#allocation2 + $0xc] sm:$0xff]  ;;  %v416_v34 = vld [vmem:[#allocation2 + $0x14] sm:$0xff] }
  0xe1   : > { %v396_v35 = vld [vmem:[#allocation2 + $0x10] sm:$0xff]  ;;  %v417_v36 = vpack.c.bf16 %v416_v34, %v415_v33 }
  0xe2   : > { %v397_v37 = vpack.c.bf16 %v396_v35, %v395_v30  ;;  %v745_v52 = vld [vmem:[#allocation2 + $0xb] sm:$0xff]  ;;  %v746_v53 = vld [vmem:[#allocation2 + $0x13] sm:$0xff]  ;;  %v615_v57 = vpack.c.bf16 %v614_v54, %v396_v35  ;;  %v2035_v30 = vld [vmem:[%s2433_s2 + $0x80] sm:$0xff]  }
  0xe3   : > { %1799 = vmatmul.mubr.bf16.vlgmr.msra.gmra.mxu0 %v417_v36  ;;  %v747_v58 = vpack.c.bf16 %v746_v53, %v745_v52  ;;  %v727_v10 = vld [vmem:[#allocation2 + $0xf] sm:$0xff]  ;;  %v944_v11 = vld [vmem:[#allocation2 + $0x17] sm:$0xff] }
  0xe4   : > { %1819 = vmatmul.mubr.bf16.vlgmr.msra.gmra.mxu1 %v397_v37  ;;  %1823 = vmatpush3.bf16.msra.mxu0 %v1988_v31  ;;  %v728_v15 = vpack.c.bf16 %v727_v10, %v726_v12  ;;  %v945_v16 = vpack.c.bf16 %v944_v11, %v727_v10  ;;  %v1080_v31 = vld [vmem:[#allocation2 + $0xd] sm:$0xff]  ;;  %v2036_v35 = vld [vmem:[%s2433_s2 + $0x238] sm:$0xff]  }
  0xe5   : > { %1843 = vmatpush3.bf16.msra.mxu1 %v1989_v32  ;;  %1824 = vmatprep.subr.bf16.mxu0 %v2052_v0  ;;  %v1081_v32 = vld [vmem:[#allocation2 + $0x15] sm:$0xff]  ;;  %v1060_v33 = vld [vmem:[#allocation2 + $0x9] sm:$0xff] }
  0xe6   : > { %1844 = vmatprep.subr.bf16.mxu1 %v2052_v0  ;;  %1838 = vmatprep.mubr.msk.bf16.mxu0 %vm2053_vm0, %v2052_v0  ;;  %v1061_v34 = vld [vmem:[#allocation2 + $0x11] sm:$0xff]  ;;  %v1082_v36 = vpack.c.bf16 %v1081_v32, %v1080_v31 }
  0xe7   : > { %1858 = vmatprep.mubr.msk.bf16.mxu1 %vm2053_vm0, %v2052_v0  ;;  %v1062_v37 = vpack.c.bf16 %v1061_v34, %v1060_v33 }
  0xe8   : > { %1825 = vmatpush3.bf16.msra.mxu0 %v1990_v38  ;;  %v2037_v38 = vld [vmem:[%s2433_s2 + $0x230] sm:$0xff]  }
  0xe9   : > { %1845 = vmatpush3.bf16.msra.mxu1 %v1991_v39  ;;  %1826 = vmatprep.subr.bf16.mxu0 %v2052_v0  ;;  %v2038_v39 = vld [vmem:[%s2433_s2 + $0x228] sm:$0xff]  }
  0xea   : > { %1846 = vmatprep.subr.bf16.mxu1 %v2052_v0 }
  0xec   : > { %1827 = vmatpush3.bf16.msra.mxu0 %v1992_v40  ;;  %v2039_v40 = vld [vmem:[%s2433_s2 + $0x220] sm:$0xff]  }
  0xed   : > { %1847 = vmatpush3.bf16.msra.mxu1 %v1993_v41  ;;  %1828 = vmatprep.subr.bf16.mxu0 %v2052_v0  ;;  %v2040_v41 = vld [vmem:[%s2433_s2 + $0x218] sm:$0xff]  }
  0xee   : > { %1848 = vmatprep.subr.bf16.mxu1 %v2052_v0 }
  0xf0   : > { %1829 = vmatpush3.bf16.msra.mxu0 %v1994_v42  ;;  %v2041_v42 = vld [vmem:[%s2433_s2 + $0x210] sm:$0xff]  }
  0xf1   : > { %1849 = vmatpush3.bf16.msra.mxu1 %v1995_v43  ;;  %1830 = vmatprep.subr.bf16.mxu0 %v2052_v0  ;;  %v2042_v43 = vld [vmem:[%s2433_s2 + $0x208] sm:$0xff]  }
  0xf2   : > { %1850 = vmatprep.subr.bf16.mxu1 %v2052_v0 }
  0xf4   : > { %1831 = vmatpush3.bf16.msra.mxu0 %v1996_v44  ;;  %v2043_v44 = vld [vmem:[%s2433_s2 + $0x200] sm:$0xff]  }
  0xf5   : > { %1851 = vmatpush3.bf16.msra.mxu1 %v1997_v45  ;;  %1832 = vmatprep.subr.bf16.mxu0 %v2052_v0  ;;  %v1279_v45 = vld [vmem:[#allocation2 + $0x19] sm:$0xff] }
  0xf6   : > { %1852 = vmatprep.subr.bf16.mxu1 %v2052_v0 }
  0xf8   : > { %1833 = vmatpush3.bf16.msra.mxu0 %v1998_v46  ;;  %v1280_v46 = vpack.c.bf16 %v1279_v45, %v1061_v34 }
  0xf9   : > { %1853 = vmatpush3.bf16.msra.mxu1 %v1999_v47  ;;  %1834 = vmatprep.subr.bf16.mxu0 %v2052_v0 }
  0xfa   : > { %1854 = vmatprep.subr.bf16.mxu1 %v2052_v0 }
  0xfc   : > { %1835 = vmatpush3.bf16.msra.mxu0 %v2000_v48 }
  0xfd   : > { %1855 = vmatpush3.bf16.msra.mxu1 %v2001_v49  ;;  %1836 = vmatprep.subr.bf16.mxu0 %v2052_v0 }
  0xfe   : > { %1856 = vmatprep.subr.bf16.mxu1 %v2052_v0 }
 0x100   : > { %1837 = vmatpush3.bf16.msra.mxu0 %v2002_v50 }
 0x101   : > { %1857 = vmatpush3.bf16.msra.mxu1 %v2003_v51  ;;  %1862 = vmatprep.subr.bf16.mxu0 %v2052_v0 }
 0x102   : > { %1882 = vmatprep.subr.bf16.mxu1 %v2052_v0 }
 0x103   : > { %1839 = vmatmul.mubr.bf16.vlgmr.msra.gmra.mxu0 %v615_v57 }
 0x104   : > { %1859 = vmatmul.mubr.bf16.vlgmr.msra.gmra.mxu1 %v747_v58  ;;  %1863 = vmatpush3.bf16.msra.mxu0 %v2004_v55 }
 0x105   : > { %1883 = vmatpush3.bf16.msra.mxu1 %v2005_v56  ;;  %1864 = vmatprep.subr.bf16.mxu0 %v2052_v0 }
 0x106   : > { %1884 = vmatprep.subr.bf16.mxu1 %v2052_v0  ;;  %1878 = vmatprep.mubr.msk.bf16.mxu0 %vm2053_vm0, %v2052_v0 }
 0x107   : > { %1898 = vmatprep.mubr.msk.bf16.mxu1 %vm2053_vm0, %v2052_v0 }
 0x108   : > { %1865 = vmatpush3.bf16.msra.mxu0 %v2006_v59 }
 0x109   : > { %1885 = vmatpush3.bf16.msra.mxu1 %v2007_v60  ;;  %1866 = vmatprep.subr.bf16.mxu0 %v2052_v0 }
 0x10a   : > { %1886 = vmatprep.subr.bf16.mxu1 %v2052_v0 }
 0x10c   : > { %1867 = vmatpush3.bf16.msra.mxu0 %v2008_v61 }
 0x10d   : > { %1887 = vmatpush3.bf16.msra.mxu1 %v2009_v62  ;;  %1868 = vmatprep.subr.bf16.mxu0 %v2052_v0 }
 0x10e   : > { %1888 = vmatprep.subr.bf16.mxu1 %v2052_v0 }
 0x110   : > { %1869 = vmatpush3.bf16.msra.mxu0 %v2010_v63 }
 0x111   : > { %1889 = vmatpush3.bf16.msra.mxu1 %v2011_v1  ;;  %1870 = vmatprep.subr.bf16.mxu0 %v2052_v0 }
 0x112   : > { %1890 = vmatprep.subr.bf16.mxu1 %v2052_v0 }
 0x114   : > { %1871 = vmatpush3.bf16.msra.mxu0 %v2012_v2 }
 0x115   : > { %1891 = vmatpush3.bf16.msra.mxu1 %v2013_v3  ;;  %1872 = vmatprep.subr.bf16.mxu0 %v2052_v0  ;;  %v390_v3 = vlaneseq }
 0x116   : > { %1892 = vmatprep.subr.bf16.mxu1 %v2052_v0 }
 0x118   : > { %1873 = vmatpush3.bf16.msra.mxu0 %v2014_v4  ;;  %v391_v4 = vshrl.u32 %v390_v3, 7 }
 0x119   : > { %1893 = vmatpush3.bf16.msra.mxu1 %v2015_v5  ;;  %1874 = vmatprep.subr.bf16.mxu0 %v2052_v0 }
 0x11a   : > { %1894 = vmatprep.subr.bf16.mxu1 %v2052_v0  ;;  %v393_v5 = vand.u32 3, %v391_v4 }
 0x11c   : > { %1875 = vmatpush3.bf16.msra.mxu0 %v2016_v6  ;;  %v392_v6 = vadd.s32 8, %v391_v4  ;;  %vm724_vm3 = vcmp.eq.s32.totalorder %v393_v5, 0  ;;  %vm1058_vm5 = vcmp.eq.s32.totalorder %v393_v5, 3 }
 0x11d   : > { %1895 = vmatpush3.bf16.msra.mxu1 %v2017_v7  ;;  %1876 = vmatprep.subr.bf16.mxu0 %v2052_v0 }
 0x11e   : > { %1896 = vmatprep.subr.bf16.mxu1 %v2052_v0  ;;  %v394_v12 = vand.u32 3, %v392_v6 }
 0x120   : > { %1877 = vmatpush3.bf16.msra.mxu0 %v2018_v8  ;;  %vm725_vm4 = vcmp.eq.s32.totalorder %v394_v12, 0  ;;  %vm1059_vm6 = vcmp.eq.s32.totalorder %v394_v12, 3 }
 0x121   : > { %1897 = vmatpush3.bf16.msra.mxu1 %v2019_v9  ;;  %1902 = vmatprep.subr.bf16.mxu0 %v2052_v0 }
 0x122   : > { %1922 = vmatprep.subr.bf16.mxu1 %v2052_v0 }
 0x123   : > { %1879 = vmatmul.mubr.bf16.vlgmr.msra.gmra.mxu0 %v728_v15 }
 0x124   : > { %1899 = vmatmul.mubr.bf16.vlgmr.msra.gmra.mxu1 %v945_v16  ;;  %1903 = vmatpush3.bf16.msra.mxu0 %v2020_v13 }
 0x125   : > { %1923 = vmatpush3.bf16.msra.mxu1 %v2021_v14  ;;  %1904 = vmatprep.subr.bf16.mxu0 %v2052_v0 }
 0x126   : > { %1924 = vmatprep.subr.bf16.mxu1 %v2052_v0  ;;  %1918 = vmatprep.mubr.msk.bf16.mxu0 %vm2053_vm0, %v2052_v0 }
 0x127   : > { %1938 = vmatprep.mubr.msk.bf16.mxu1 %vm2053_vm0, %v2052_v0 }
 0x128   : > { %1905 = vmatpush3.bf16.msra.mxu0 %v2022_v17 }
 0x129   : > { %1925 = vmatpush3.bf16.msra.mxu1 %v2023_v18  ;;  %1906 = vmatprep.subr.bf16.mxu0 %v2052_v0 }
 0x12a   : > { %1926 = vmatprep.subr.bf16.mxu1 %v2052_v0 }
 0x12c   : > { %1907 = vmatpush3.bf16.msra.mxu0 %v2024_v19 }
 0x12d   : > { %1927 = vmatpush3.bf16.msra.mxu1 %v2025_v20  ;;  %1908 = vmatprep.subr.bf16.mxu0 %v2052_v0 }
 0x12e   : > { %1928 = vmatprep.subr.bf16.mxu1 %v2052_v0 }
 0x130   : > { %1909 = vmatpush3.bf16.msra.mxu0 %v2026_v21 }
 0x131   : > { %1929 = vmatpush3.bf16.msra.mxu1 %v2027_v22  ;;  %1910 = vmatprep.subr.bf16.mxu0 %v2052_v0 }
 0x132   : > { %1930 = vmatprep.subr.bf16.mxu1 %v2052_v0 }
 0x134   : > { %1911 = vmatpush3.bf16.msra.mxu0 %v2028_v23 }
 0x135   : > { %1931 = vmatpush3.bf16.msra.mxu1 %v2029_v24  ;;  %1912 = vmatprep.subr.bf16.mxu0 %v2052_v0 }
 0x136   : > { %1932 = vmatprep.subr.bf16.mxu1 %v2052_v0 }
 0x138   : > { %1913 = vmatpush3.bf16.msra.mxu0 %v2030_v25 }
 0x139   : > { %1933 = vmatpush3.bf16.msra.mxu1 %v2031_v26  ;;  %1914 = vmatprep.subr.bf16.mxu0 %v2052_v0 }
 0x13a   : > { %1934 = vmatprep.subr.bf16.mxu1 %v2052_v0 }
 0x13c   : > { %1915 = vmatpush3.bf16.msra.mxu0 %v2032_v27 }
 0x13d   : > { %1935 = vmatpush3.bf16.msra.mxu1 %v2033_v28  ;;  %1916 = vmatprep.subr.bf16.mxu0 %v2052_v0 }
 0x13e   : > { %1936 = vmatprep.subr.bf16.mxu1 %v2052_v0 }
 0x140   : > { %1917 = vmatpush3.bf16.msra.mxu0 %v2034_v29 }
 0x141   : > { %1937 = vmatpush3.bf16.msra.mxu1 %v2035_v30  ;;  %1942 = vmatprep.subr.bf16.mxu0 %v2052_v0 }
 0x143   : > { %1919 = vmatmul.mubr.bf16.vlgmr.msra.gmra.mxu0 %v1082_v36 }
 0x144   : > { %1939 = vmatmul.mubr.bf16.vlgmr.msra.gmra.mxu1 %v1062_v37  ;;  %1943 = vmatpush3.bf16.msra.mxu0 %v2036_v35 }
 0x145   : > { %1958 = vmatprep.mubr.msk.bf16.mxu0 %vm2053_vm0, %v2052_v0  ;;  %1944 = vmatprep.subr.bf16.mxu0 %v2052_v0 }
 0x148   : > { %1945 = vmatpush3.bf16.msra.mxu0 %v2037_v38  ;;  %v1682_v38 = vld [vmem:[%s2434_s3] ss:$0 sm:$0xff] }
 0x149   : > { %1946 = vmatprep.subr.bf16.mxu0 %v2052_v0 }
 0x14c   : > { %1947 = vmatpush3.bf16.msra.mxu0 %v2038_v39 }
 0x14d   : > { %1948 = vmatprep.subr.bf16.mxu0 %v2052_v0 }
 0x150   : > { %1949 = vmatpush3.bf16.msra.mxu0 %v2039_v40 }
 0x151   : > { %1950 = vmatprep.subr.bf16.mxu0 %v2052_v0 }
 0x154   : > { %1951 = vmatpush3.bf16.msra.mxu0 %v2040_v41  ;;  %v1683_v41 = vld [vmem:[%s2435_s4] ss:$0 sm:$0xff] }
 0x155   : > { %1952 = vmatprep.subr.bf16.mxu0 %v2052_v0 }
 0x158   : > { %1953 = vmatpush3.bf16.msra.mxu0 %v2041_v42 }
 0x159   : > { %1954 = vmatprep.subr.bf16.mxu0 %v2052_v0 }
 0x15c   : > { %1955 = vmatpush3.bf16.msra.mxu0 %v2042_v43 }
 0x15d   : > { %1956 = vmatprep.subr.bf16.mxu0 %v2052_v0 }
 0x160   : > { %1957 = vmatpush3.bf16.msra.mxu0 %v2043_v44 }
 0x163   : > { %1959 = vmatmul.mubr.bf16.vlgmr.msra.gmra.mxu0 %v1280_v46 }
 0x1a3   : > { %v517_v47 = vpop.f32.mrf.mxu0 }
 0x1a4   : > { %v606_v48 = vpop.f32.mrf.mxu1 }
 0x1a5   : > { %v607_v49 = vadd.f32 %v606_v48, %v517_v47  ;;  %v1800_v50 = vpop.f32.mrf.mxu0 }
 0x1a6   : > { %v1820_v51 = vpop.f32.mrf.mxu1 }
 0x1a7   : > { %v520_v52 = vpop.f32.mrf.mxu0 }
 0x1a8   : > { %v609_v53 = vpop.f32.mrf.mxu1 }
 0x1a9   : > { %v610_v54 = vadd.f32 %v609_v53, %v520_v52  ;;  %v1801_v55 = vpop.f32.mrf.mxu0 }
 0x1aa   : > { %v1821_v56 = vpop.f32.mrf.mxu1 }
 0x1c3   : > { %v715_v57 = vpop.f32.mrf.mxu0 }
 0x1c4   : > { %v847_v58 = vpop.f32.mrf.mxu1  ;;  %v722_v59 = vadd.f32 %v715_v57, %v607_v49 }
 0x1c5   : > { %v1840_v60 = vpop.f32.mrf.mxu0 }
 0x1c6   : > { %v1860_v61 = vpop.f32.mrf.mxu1 }
 0x1c7   : > { %v718_v0 = vpop.f32.mrf.mxu0 }
 0x1c8   : > { %v850_v62 = vpop.f32.mrf.mxu1  ;;  %v723_v63 = vadd.f32 %v718_v0, %v610_v54 }
 0x1c9   : > { %v1841_v1 = vpop.f32.mrf.mxu0 }
 0x1ca   : > { %v1861_v2 = vpop.f32.mrf.mxu1 }
 0x1e3   : > { %v936_v7 = vpop.f32.mrf.mxu0 }
 0x1e4   : > { %v1045_v8 = vpop.f32.mrf.mxu1  ;;  %v937_v9 = vadd.f32 %v936_v7, %v847_v58 }
 0x1e5   : > { %v1880_v10 = vpop.f32.mrf.mxu0 }
 0x1e6   : > { %v1900_v11 = vpop.f32.mrf.mxu1  ;;  %v1052_v13 = vadd.f32 %v1045_v8, %v937_v9 }
 0x1e7   : > { %v939_v14 = vpop.f32.mrf.mxu0 }
 0x1e8   : > { %v1048_v15 = vpop.f32.mrf.mxu1  ;;  %v1054_v16 = vsel %vm724_vm3, 0.0, %v1052_v13  ;;  %v940_v17 = vadd.f32 %v939_v14, %v850_v62 }
 0x1e9   : > { %v1056_v18 = vadd.f32 %v1054_v16, %v722_v59  ;;  %v1881_v19 = vpop.f32.mrf.mxu0 }
 0x1ea   : > { %v1901_v20 = vpop.f32.mrf.mxu1  ;;  %v1053_v21 = vadd.f32 %v1048_v15, %v940_v17 }
 0x1ec   : > { %v1055_v22 = vsel %vm725_vm4, 0.0, %v1053_v21 }
 0x1ed   : > { %v1057_v23 = vadd.f32 %v1055_v22, %v723_v63 }
 0x203   : > { %v1182_v24 = vpop.f32.mrf.mxu0 }
 0x204   : > { %v1271_v25 = vpop.f32.mrf.mxu1 }
 0x205   : > { %v1920_v26 = vpop.f32.mrf.mxu0  ;;  %v1272_v32 = vadd.f32 %v1271_v25, %v1182_v24 }
 0x206   : > { %v1940_v27 = vpop.f32.mrf.mxu1 }
 0x207   : > { %v1185_v28 = vpop.f32.mrf.mxu0 }
 0x208   : > { %v1274_v29 = vpop.f32.mrf.mxu1 }
 0x209   : > { %v1921_v30 = vpop.f32.mrf.mxu0  ;;  %v1275_v36 = vadd.f32 %v1274_v29, %v1185_v28 }
 0x20a   : > { %v1941_v31 = vpop.f32.mrf.mxu1 }
 0x223   : > { %v1380_v33 = vpop.f32.mrf.mxu0 }
 0x224   : > { %v1387_v34 = vadd.f32 %v1380_v33, %v1272_v32 }
 0x225   : > { %v1960_v35 = vpop.f32.mrf.mxu0 }
 0x226   : > { %v1389_v37 = vsel %vm1058_vm5, 0.0, %v1387_v34 }
 0x227   : > { %v1391_v39 = vadd.f32 %v1389_v37, %v1056_v18  ;;  %v1383_v40 = vpop.f32.mrf.mxu0 }
 0x228   : > { %v1388_v42 = vadd.f32 %v1383_v40, %v1275_v36 }
 0x229   : > { %v1400_v43 = vmul.f32 %v1682_v38, %v1391_v39  ;;  %v1961_v44 = vpop.f32.mrf.mxu0 }
 0x22a   : > { %v1390_v45 = vsel %vm1059_vm6, 0.0, %v1388_v42 }
 0x22b   : > { %v1409_v46 = vadd.f32 %v1683_v41, %v1400_v43  ;;  %v1392_v47 = vadd.f32 %v1390_v45, %v1057_v23 }
 0x22d   : > { %v1411_v48 = vmax.f32 %v1409_v46, 0.0  ;;  %v1401_v49 = vmul.f32 %v1682_v38, %v1392_v47 }
 0x22f   : > { %1413 = vst [vmem:[%s221_s14] sm:$0xff] %v1411_v48  ;;  %v1410_v50 = vadd.f32 %v1683_v41, %v1401_v49 }
 0x231   : > { %v1412_v51 = vmax.f32 %v1410_v50, 0.0 }
 0x233   : > { %1414 = vst [vmem:[%s221_s14 + $0x8] sm:$0xff] %v1412_v51 }
 0x234 PF: > { %s15_s18 = sadd.s32 1, %s2050_s18  }
 0x235   : > { %p12_p4 = scmp.ge.s32.totalorder %s15_s18, 4  }
 0x237   :  { %14 = sbr.rel (!%p12_p4) target bundleno = 1 (0x1), region = 78 }

// kernel: _lambda_.5
= control target key start
LH: loop header
LB: loop body
LE: loop exit
PB: predicated region body
PF: predicated region fallthrough
CT: control target
= control target key end

     0   :  { %s2346_s13 = smov 0   ;;  %s2843_s0 = inlined_call_operand.vmem [shape: f32[2,4,128], index: 0, kind: input, shape index: {}]   ;;  %s2844_s1 = inlined_call_operand.vmem [shape: bf16[9,128,128], index: 1, kind: input, shape index: {}]   ;;  %s2845_s2 = inlined_call_operand.vmem [shape: f32[1,128], index: 2, kind: input, shape index: {}]   ;;  %s2846_s3 = inlined_call_operand.vmem [shape: f32[1,128], index: 3, kind: input, shape index: {}]   ;;  %s2847_s4 = inlined_call_operand.vmem [shape: f32[128,128], index: 4, kind: input, shape index: {}]   ;;  %s2848_s5 = inlined_call_operand.vmem [shape: f32[1,128], index: 5, kind: input, shape index: {}]   ;;  %s2849_s6 = inlined_call_operand.vmem [shape: f32[1,128], index: 6, kind: input, shape index: {}]   ;;  %s2850_s7 = inlined_call_operand.vmem [shape: f32[128,128], index: 7, kind: input, shape index: {}]   ;;  %s2851_s8 = inlined_call_operand.vmem [shape: f32[1,128], index: 8, kind: input, shape index: {}]   ;;  %s2852_s9 = inlined_call_operand.vmem [shape: f32[1,128], index: 9, kind: input, shape index: {}]   ;;  %s2853_s10 = inlined_call_operand.vmem [shape: f32[2,4,128], index: 10, kind: output, shape index: {}]  }
   0x1 LB: > { %s1617_s14 = sadd.s32 4294967295, %s2287_s13   ;;  %p1621_p0 = scmp.ge.s32.totalorder %s2287_s13, 1  ;;  %s2287_s13 = sphi %s2346_s13, %s20_s13  }
   0x2   : > { %p311_p1 = scmp.lt.s32.totalorder %s2287_s13, 3 }
   0x4   : > { %p312_p2 = pnand %p1621_p0, %p311_p1 }
   0x5   : > { %p347_p3 = scmp.lt.s32.totalorder (!%p312_p2), %s1617_s14, 1 }
   0x6   : > { %315 = sbr.rel (%p312_p2) target bundleno = 627 (0x273), region = 60 }
   0xb   : > { %v2204_v0 = vld [vmem:[%s2844_s1 + $0x138] sm:$0xff]   ;;  %v2289_v1 = vmov 0.0   ;;  %v2206_v3 = vld [vmem:[%s2844_s1 + $0x130] sm:$0xff]   ;;  %vm2290_vm0 = vmmov 0   ;;  %v2208_v5 = vld [vmem:[%s2844_s1 + $0x128] sm:$0xff]   ;;  %s2855_s14 = smov (!%p347_p3, %s1617_s14), 1 }
   0xc   : > { %1944 = vmatprep.subr.bf16.mxu0 %v2289_v1  ;;  %357 = vst [vmem:[#allocation2] sm:$0xff] %v2289_v1  ;;  %358 = vst [vmem:[#allocation2 + $0x8] sm:$0x3] %v2289_v1  ;;  %1964 = vmatprep.subr.bf16.mxu1 %v2289_v1  ;;  %v2205_v2 = vld [vmem:[%s2844_s1 + $0x78] sm:$0xff]   ;;  %v2207_v4 = vld [vmem:[%s2844_s1 + $0x70] sm:$0xff]   ;;  %s1622_s29 = sshll.u32 %s2855_s14, 2 }
   0xd   : > { %359 = vst [vmem:[#allocation2 + $0xe] sm:$0xff] %v2289_v1  ;;  %1945 = vmatpush3.bf16.msra.mxu0 %v2204_v0  ;;  %1960 = vmatprep.mubr.msk.bf16.mxu0 %vm2290_vm0, %v2289_v1  ;;  %v2209_v6 = vld [vmem:[%s2844_s1 + $0x68] sm:$0xff]   ;;  %v2210_v7 = vld [vmem:[%s2844_s1 + $0x120] sm:$0xff]   ;;  %s350_s16 = scalar_lea.vmem %s2843_s0, %s1622_s29  ;;  %v2212_v9 = vld [vmem:[%s2844_s1 + $0x118] sm:$0xff]   ;;  %vm1349_vm1 = vcmask 1043456   ;;  %s354_s19 = scalar_lea.vmem %s2853_s10, %s1622_s29 }
   0xe   : > { %1965 = vmatpush3.bf16.msra.mxu1 %v2205_v2  ;;  %1946 = vmatprep.subr.bf16.mxu0 %v2289_v1  ;;  %v2211_v8 = vld [vmem:[%s2844_s1 + $0x60] sm:$0xff]   ;;  %v2213_v10 = vld [vmem:[%s2844_s1 + $0x58] sm:$0xff]   ;;  %v2214_v12 = vld [vmem:[%s2844_s1 + $0x110] sm:$0xff]  }
   0xf   : > { %1966 = vmatprep.subr.bf16.mxu1 %v2289_v1  ;;  %1980 = vmatprep.mubr.msk.bf16.mxu1 %vm2290_vm0, %v2289_v1  ;;  %v2409_v11 = vld [vmem:[%s350_s16] sm:$0xf]  ;;  %v2215_v13 = vld [vmem:[%s2844_s1 + $0x50] sm:$0xff]   ;;  %v2216_v14 = vld [vmem:[%s2844_s1 + $0x108] sm:$0xff]  }
  0x10   : > { %361 = vst [vmem:[#allocation2 + $0xa] sm:$0xf] %v2409_v11  ;;  %v2217_v15 = vld [vmem:[%s2844_s1 + $0x48] sm:$0xff]   ;;  %v2218_v16 = vld [vmem:[%s2844_s1 + $0x100] sm:$0xff]   ;;  %v2220_v22 = vld [vmem:[%s2844_s1 + $0x1f8] sm:$0xff]  }
  0x11   : > { %1947 = vmatpush3.bf16.msra.mxu0 %v2206_v3  ;;  %v2219_v17 = vld [vmem:[%s2844_s1 + $0x40] sm:$0xff]   ;;  %v2221_v23 = vld [vmem:[%s2844_s1 + $0xf8] sm:$0xff]   ;;  %v2222_v24 = vld [vmem:[%s2844_s1 + $0x1f0] sm:$0xff]  }
  0x12   : > { %1967 = vmatpush3.bf16.msra.mxu1 %v2207_v4  ;;  %1948 = vmatprep.subr.bf16.mxu0 %v2289_v1  ;;  %v2223_v25 = vld [vmem:[%s2844_s1 + $0xf0] sm:$0xff]   ;;  %v2224_v26 = vld [vmem:[%s2844_s1 + $0x1e8] sm:$0xff]   ;;  %v2226_v28 = vld [vmem:[%s2844_s1 + $0x1e0] sm:$0xff]  }
  0x13   : > { %1968 = vmatprep.subr.bf16.mxu1 %v2289_v1  ;;  %v2225_v27 = vld [vmem:[%s2844_s1 + $0xe8] sm:$0xff]   ;;  %v2227_v29 = vld [vmem:[%s2844_s1 + $0xe0] sm:$0xff]   ;;  %v2228_v30 = vld [vmem:[%s2844_s1 + $0x1d8] sm:$0xff]  }
  0x14   : > { %v2229_v31 = vld [vmem:[%s2844_s1 + $0xd8] sm:$0xff]   ;;  %v2230_v32 = vld [vmem:[%s2844_s1 + $0x1d0] sm:$0xff]   ;;  %v2232_v34 = vld [vmem:[%s2844_s1 + $0x1c8] sm:$0xff]  }
  0x15   : > { %1949 = vmatpush3.bf16.msra.mxu0 %v2208_v5  ;;  %v2231_v33 = vld [vmem:[%s2844_s1 + $0xd0] sm:$0xff]   ;;  %v2233_v35 = vld [vmem:[%s2844_s1 + $0xc8] sm:$0xff]   ;;  %v2234_v36 = vld [vmem:[%s2844_s1 + $0x1c0] sm:$0xff]  }
  0x16   : > { %1969 = vmatpush3.bf16.msra.mxu1 %v2209_v6  ;;  %1950 = vmatprep.subr.bf16.mxu0 %v2289_v1  ;;  %v2235_v37 = vld [vmem:[%s2844_s1 + $0xc0] sm:$0xff]   ;;  %v2236_v41 = vld [vmem:[%s2844_s1 + $0x38] sm:$0xff]   ;;  %v2238_v44 = vld [vmem:[%s2844_s1 + $0x30] sm:$0xff]  }
  0x17   : > { %1970 = vmatprep.subr.bf16.mxu1 %v2289_v1  ;;  %v384_v18 = vld [vmem:[#allocation2 + $0xa] sm:$0xf]  ;;  %v2237_v43 = vld [vmem:[%s2844_s1 + $0x1b8] sm:$0xff]   ;;  %v2239_v45 = vld [vmem:[%s2844_s1 + $0x1b0] sm:$0xff]  }
  0x18   : > { %v365_v19 = vld [vmem:[#allocation2 + $0x8] sm:$0xf]  ;;  %v385_v20 = vpack.c.bf16 %v384_v18, %v384_v18  ;;  %v579_v38 = vld [vmem:[#allocation2 + $0xc] sm:$0xf]  ;;  %v2242_v48 = vld [vmem:[%s2844_s1 + $0x20] sm:$0xff]  }
  0x19   : > { %1951 = vmatpush3.bf16.msra.mxu0 %v2210_v7  ;;  %v366_v21 = vpack.c.bf16 %v365_v19, %v365_v19  ;;  %v706_v39 = vld [vmem:[#allocation2 + $0x9] sm:$0xf]  ;;  %v580_v40 = vpack.c.bf16 %v579_v38, %v579_v38  ;;  %v2243_v49 = vld [vmem:[%s2844_s1 + $0x1a0] sm:$0xff]   ;;  %v2244_v50 = vld [vmem:[%s2844_s1 + $0x18] sm:$0xff]  }
  0x1a   : > { %1971 = vmatpush3.bf16.msra.mxu1 %v2211_v8  ;;  %1952 = vmatprep.subr.bf16.mxu0 %v2289_v1  ;;  %v2507_v42 = vpack.c.bf16 %v706_v39, %v706_v39  ;;  %v2240_v46 = vld [vmem:[%s2844_s1 + $0x28] sm:$0xff]   ;;  %v2245_v51 = vld [vmem:[%s2844_s1 + $0x198] sm:$0xff]   ;;  %v2246_v52 = vld [vmem:[%s2844_s1 + $0x10] sm:$0xff]  }
  0x1b   : > { %1972 = vmatprep.subr.bf16.mxu1 %v2289_v1  ;;  %v2241_v47 = vld [vmem:[%s2844_s1 + $0x1a8] sm:$0xff]   ;;  %v2247_v53 = vld [vmem:[%s2844_s1 + $0x190] sm:$0xff]   ;;  %v2250_v56 = vld [vmem:[%s2844_s1] sm:$0xff]  }
  0x1c   : > { %v2248_v54 = vld [vmem:[%s2844_s1 + $0x8] sm:$0xff]   ;;  %v2251_v58 = vld [vmem:[%s2844_s1 + $0x180] sm:$0xff]   ;;  %v2252_v61 = vld [vmem:[%s2844_s1 + $0x178] sm:$0xff]  }
  0x1d   : > { %1953 = vmatpush3.bf16.msra.mxu0 %v2212_v9  ;;  %v2249_v55 = vld [vmem:[%s2844_s1 + $0x188] sm:$0xff]   ;;  %v2253_v63 = vld [vmem:[%s2844_s1 + $0xb8] sm:$0xff]   ;;  %v2254_v0 = vld [vmem:[%s2844_s1 + $0x170] sm:$0xff]  }
  0x1e   : > { %1973 = vmatpush3.bf16.msra.mxu1 %v2213_v10  ;;  %1954 = vmatprep.subr.bf16.mxu0 %v2289_v1  ;;  %v688_v57 = vld [vmem:[#allocation2 + $0x7] sm:$0xf]  ;;  %v901_v59 = vld [vmem:[#allocation2 + $0xb] sm:$0xf]  ;;  %v2255_v2 = vld [vmem:[%s2844_s1 + $0xb0] sm:$0xff]  }
  0x1f   : > { %1974 = vmatprep.subr.bf16.mxu1 %v2289_v1  ;;  %v689_v60 = vpack.c.bf16 %v688_v57, %v688_v57  ;;  %v902_v62 = vpack.c.bf16 %v901_v59, %v901_v59  ;;  %v2256_v3 = vld [vmem:[%s2844_s1 + $0x168] sm:$0xff]   ;;  %v2258_v5 = vld [vmem:[%s2844_s1 + $0x160] sm:$0xff]   ;;  %v2260_v7 = vld [vmem:[%s2844_s1 + $0x158] sm:$0xff]  }
  0x20   : > { %v2257_v4 = vld [vmem:[%s2844_s1 + $0xa8] sm:$0xff]   ;;  %v2259_v6 = vld [vmem:[%s2844_s1 + $0xa0] sm:$0xff]   ;;  %v2261_v8 = vld [vmem:[%s2844_s1 + $0x98] sm:$0xff]  }
  0x21   : > { %1955 = vmatpush3.bf16.msra.mxu0 %v2214_v12  ;;  %v2262_v9 = vld [vmem:[%s2844_s1 + $0x150] sm:$0xff]   ;;  %v2264_v12 = vld [vmem:[%s2844_s1 + $0x148] sm:$0xff]   ;;  %v2271_v19 = vld [vmem:[%s2844_s1 + $0x220] sm:$0xff]  }
  0x22   : > { %1975 = vmatpush3.bf16.msra.mxu1 %v2215_v13  ;;  %1956 = vmatprep.subr.bf16.mxu0 %v2289_v1  ;;  %v2263_v10 = vld [vmem:[%s2844_s1 + $0x90] sm:$0xff]   ;;  %v2265_v13 = vld [vmem:[%s2844_s1 + $0x88] sm:$0xff]  }
  0x23   : > { %1976 = vmatprep.subr.bf16.mxu1 %v2289_v1  ;;  %v2270_v18 = vld [vmem:[%s2844_s1 + $0x228] sm:$0xff]   ;;  %v1368_v38 = vld [vmem:[%s2847_s4 + $0x50] sm:$0xff] }
  0x25   : > { %1957 = vmatpush3.bf16.msra.mxu0 %v2216_v14  ;;  %v2266_v14 = vld [vmem:[%s2844_s1 + $0x140] sm:$0xff]  }
  0x26   : > { %1977 = vmatpush3.bf16.msra.mxu1 %v2217_v15  ;;  %1958 = vmatprep.subr.bf16.mxu0 %v2289_v1  ;;  %v2267_v15 = vld [vmem:[%s2844_s1 + $0x80] sm:$0xff]  }
  0x27   : > { %1978 = vmatprep.subr.bf16.mxu1 %v2289_v1 }
  0x29   : > { %1959 = vmatpush3.bf16.msra.mxu0 %v2218_v16  ;;  %v2268_v16 = vld [vmem:[%s2844_s1 + $0x238] sm:$0xff]  }
  0x2a   : > { %1979 = vmatpush3.bf16.msra.mxu1 %v2219_v17  ;;  %1984 = vmatprep.subr.bf16.mxu0 %v2289_v1  ;;  %v2269_v17 = vld [vmem:[%s2844_s1 + $0x230] sm:$0xff]  }
  0x2b   : > { %2004 = vmatprep.subr.bf16.mxu1 %v2289_v1 }
  0x2c   : > { %1961 = vmatmul.mubr.bf16.vlgmr.msra.gmra.mxu0 %v385_v20  ;;  %v2272_v20 = vld [vmem:[%s2844_s1 + $0x218] sm:$0xff]  }
  0x2d   : > { %1981 = vmatmul.mubr.bf16.vlgmr.msra.gmra.mxu1 %v366_v21  ;;  %1985 = vmatpush3.bf16.msra.mxu0 %v2220_v22  ;;  %v2273_v21 = vld [vmem:[%s2844_s1 + $0x210] sm:$0xff]   ;;  %v2274_v22 = vld [vmem:[%s2844_s1 + $0x208] sm:$0xff]  }
  0x2e   : > { %2005 = vmatpush3.bf16.msra.mxu1 %v2221_v23  ;;  %1986 = vmatprep.subr.bf16.mxu0 %v2289_v1  ;;  %v2275_v23 = vld [vmem:[%s2844_s1 + $0x200] sm:$0xff]  }
  0x2f   : > { %2006 = vmatprep.subr.bf16.mxu1 %v2289_v1  ;;  %2000 = vmatprep.mubr.msk.bf16.mxu0 %vm2290_vm0, %v2289_v1 }
  0x30   : > { %2020 = vmatprep.mubr.msk.bf16.mxu1 %vm2290_vm0, %v2289_v1 }
  0x31   : > { %1987 = vmatpush3.bf16.msra.mxu0 %v2222_v24  ;;  %v1222_v24 = vld [vmem:[#allocation2 + $0xd] sm:$0xf] }
  0x32   : > { %2007 = vmatpush3.bf16.msra.mxu1 %v2223_v25  ;;  %1988 = vmatprep.subr.bf16.mxu0 %v2289_v1  ;;  %v1223_v25 = vpack.c.bf16 %v1222_v24, %v1222_v24 }
  0x33   : > { %2008 = vmatprep.subr.bf16.mxu1 %v2289_v1 }
  0x35   : > { %1989 = vmatpush3.bf16.msra.mxu0 %v2224_v26  ;;  %v1373_v26 = vld [vmem:[%s2847_s4 + $0x78] sm:$0xff] }
  0x36   : > { %2009 = vmatpush3.bf16.msra.mxu1 %v2225_v27  ;;  %1990 = vmatprep.subr.bf16.mxu0 %v2289_v1  ;;  %v1372_v27 = vld [vmem:[%s2847_s4 + $0x70] sm:$0xff] }
  0x37   : > { %2010 = vmatprep.subr.bf16.mxu1 %v2289_v1 }
  0x39   : > { %1991 = vmatpush3.bf16.msra.mxu0 %v2226_v28  ;;  %v1371_v28 = vld [vmem:[%s2847_s4 + $0x68] sm:$0xff] }
  0x3a   : > { %2011 = vmatpush3.bf16.msra.mxu1 %v2227_v29  ;;  %1992 = vmatprep.subr.bf16.mxu0 %v2289_v1 }
  0x3b   : > { %2012 = vmatprep.subr.bf16.mxu1 %v2289_v1 }
  0x3d   : > { %1993 = vmatpush3.bf16.msra.mxu0 %v2228_v30 }
  0x3e   : > { %2013 = vmatpush3.bf16.msra.mxu1 %v2229_v31  ;;  %1994 = vmatprep.subr.bf16.mxu0 %v2289_v1  ;;  %v1370_v31 = vld [vmem:[%s2847_s4 + $0x60] sm:$0xff] }
  0x3f   : > { %2014 = vmatprep.subr.bf16.mxu1 %v2289_v1 }
  0x41   : > { %1995 = vmatpush3.bf16.msra.mxu0 %v2230_v32 }
  0x42   : > { %2015 = vmatpush3.bf16.msra.mxu1 %v2231_v33  ;;  %1996 = vmatprep.subr.bf16.mxu0 %v2289_v1 }
  0x43   : > { %2016 = vmatprep.subr.bf16.mxu1 %v2289_v1 }
  0x45   : > { %1997 = vmatpush3.bf16.msra.mxu0 %v2232_v34 }
  0x46   : > { %2017 = vmatpush3.bf16.msra.mxu1 %v2233_v35  ;;  %1998 = vmatprep.subr.bf16.mxu0 %v2289_v1  ;;  %v1369_v35 = vld [vmem:[%s2847_s4 + $0x58] sm:$0xff] }
  0x47   : > { %2018 = vmatprep.subr.bf16.mxu1 %v2289_v1 }
  0x49   : > { %1999 = vmatpush3.bf16.msra.mxu0 %v2234_v36 }
  0x4a   : > { %2019 = vmatpush3.bf16.msra.mxu1 %v2235_v37  ;;  %2024 = vmatprep.subr.bf16.mxu0 %v2289_v1 }
  0x4b   : > { %2044 = vmatprep.subr.bf16.mxu1 %v2289_v1 }
  0x4c   : > { %2001 = vmatmul.mubr.bf16.vlgmr.msra.gmra.mxu0 %v580_v40 }
  0x4d   : > { %2025 = vmatpush3.bf16.msra.mxu0 %v2236_v41  ;;  %2021 = vmatmul.mubr.bf16.vlgmr.msra.gmra.mxu1 %v2507_v42  ;;  %v1367_v41 = vld [vmem:[%s2847_s4 + $0x48] sm:$0xff] }
  0x4e   : > { %2045 = vmatpush3.bf16.msra.mxu1 %v2237_v43  ;;  %2026 = vmatprep.subr.bf16.mxu0 %v2289_v1  ;;  %v1365_v43 = vld [vmem:[%s2847_s4 + $0x38] sm:$0xff] }
  0x4f   : > { %2046 = vmatprep.subr.bf16.mxu1 %v2289_v1  ;;  %2040 = vmatprep.mubr.msk.bf16.mxu0 %vm2290_vm0, %v2289_v1 }
  0x50   : > { %2060 = vmatprep.mubr.msk.bf16.mxu1 %vm2290_vm0, %v2289_v1 }
  0x51   : > { %2027 = vmatpush3.bf16.msra.mxu0 %v2238_v44  ;;  %v1364_v44 = vld [vmem:[%s2847_s4 + $0x30] sm:$0xff] }
  0x52   : > { %2047 = vmatpush3.bf16.msra.mxu1 %v2239_v45  ;;  %2028 = vmatprep.subr.bf16.mxu0 %v2289_v1  ;;  %v1363_v45 = vld [vmem:[%s2847_s4 + $0x28] sm:$0xff] }
  0x53   : > { %2048 = vmatprep.subr.bf16.mxu1 %v2289_v1 }
  0x55   : > { %2029 = vmatpush3.bf16.msra.mxu0 %v2240_v46  ;;  %v1362_v46 = vld [vmem:[%s2847_s4 + $0x20] sm:$0xff] }
  0x56   : > { %2049 = vmatpush3.bf16.msra.mxu1 %v2241_v47  ;;  %2030 = vmatprep.subr.bf16.mxu0 %v2289_v1  ;;  %v1361_v47 = vld [vmem:[%s2847_s4 + $0x18] sm:$0xff] }
  0x57   : > { %2050 = vmatprep.subr.bf16.mxu1 %v2289_v1 }
  0x59   : > { %2031 = vmatpush3.bf16.msra.mxu0 %v2242_v48  ;;  %v1482_v48 = vld [vmem:[%s2850_s7 + $0x78] sm:$0xff] }
  0x5a   : > { %2051 = vmatpush3.bf16.msra.mxu1 %v2243_v49  ;;  %2032 = vmatprep.subr.bf16.mxu0 %v2289_v1  ;;  %v1360_v49 = vld [vmem:[%s2847_s4 + $0x10] sm:$0xff] }
  0x5b   : > { %2052 = vmatprep.subr.bf16.mxu1 %v2289_v1 }
  0x5d   : > { %2033 = vmatpush3.bf16.msra.mxu0 %v2244_v50  ;;  %v1359_v50 = vld [vmem:[%s2847_s4 + $0x8] sm:$0xff] }
  0x5e   : > { %2053 = vmatpush3.bf16.msra.mxu1 %v2245_v51  ;;  %2034 = vmatprep.subr.bf16.mxu0 %v2289_v1  ;;  %v1358_v51 = vld [vmem:[%s2847_s4] sm:$0xff] }
  0x5f   : > { %2054 = vmatprep.subr.bf16.mxu1 %v2289_v1 }
  0x61   : > { %2035 = vmatpush3.bf16.msra.mxu0 %v2246_v52  ;;  %v1459_v52 = vsel %vm1349_vm1, %v2409_v11, 0.0  ;;  %v1478_v11 = vld [vmem:[%s2850_s7 + $0x58] sm:$0xff] }
  0x62   : > { %2055 = vmatpush3.bf16.msra.mxu1 %v2247_v53  ;;  %2036 = vmatprep.subr.bf16.mxu0 %v2289_v1  ;;  %v1481_v53 = vld [vmem:[%s2850_s7 + $0x70] sm:$0xff] }
  0x63   : > { %2056 = vmatprep.subr.bf16.mxu1 %v2289_v1 }
  0x65   : > { %2037 = vmatpush3.bf16.msra.mxu0 %v2248_v54  ;;  %v1480_v54 = vld [vmem:[%s2850_s7 + $0x68] sm:$0xff] }
  0x66   : > { %2057 = vmatpush3.bf16.msra.mxu1 %v2249_v55  ;;  %2038 = vmatprep.subr.bf16.mxu0 %v2289_v1  ;;  %v1460_v55 = vrot.slane %v1459_v52, 4 }
  0x67   : > { %2058 = vmatprep.subr.bf16.mxu1 %v2289_v1 }
  0x69   : > { %2039 = vmatpush3.bf16.msra.mxu0 %v2250_v56  ;;  %v1479_v56 = vld [vmem:[%s2850_s7 + $0x60] sm:$0xff] }
  0x6a   : > { %2059 = vmatpush3.bf16.msra.mxu1 %v2251_v58  ;;  %2064 = vmatprep.subr.bf16.mxu0 %v2289_v1 }
  0x6b   : > { %2084 = vmatprep.subr.bf16.mxu1 %v2289_v1 }
  0x6c   : > { %2041 = vmatmul.mubr.bf16.vlgmr.msra.gmra.mxu0 %v689_v60  ;;  %v1477_v60 = vld [vmem:[%s2850_s7 + $0x50] sm:$0xff] }
  0x6d   : > { %2065 = vmatpush3.bf16.msra.mxu0 %v2252_v61  ;;  %2061 = vmatmul.mubr.bf16.vlgmr.msra.gmra.mxu1 %v902_v62  ;;  %v1461_v61 = vadd.f32 %v1460_v55, %v1459_v52  ;;  %v1825_v52 = vld [vmem:[%s2846_s3] ss:$0 sm:$0xff] }
  0x6e   : > { %2085 = vmatpush3.bf16.msra.mxu1 %v2253_v63  ;;  %2066 = vmatprep.subr.bf16.mxu0 %v2289_v1 }
  0x6f   : > { %2086 = vmatprep.subr.bf16.mxu1 %v2289_v1  ;;  %2080 = vmatprep.mubr.msk.bf16.mxu0 %vm2290_vm0, %v2289_v1 }
  0x70   : > { %2100 = vmatprep.mubr.msk.bf16.mxu1 %vm2290_vm0, %v2289_v1 }
  0x71   : > { %2067 = vmatpush3.bf16.msra.mxu0 %v2254_v0  ;;  %v1476_v0 = vld [vmem:[%s2850_s7 + $0x48] sm:$0xff] }
  0x72   : > { %2087 = vmatpush3.bf16.msra.mxu1 %v2255_v2  ;;  %2068 = vmatprep.subr.bf16.mxu0 %v2289_v1 }
  0x73   : > { %2088 = vmatprep.subr.bf16.mxu1 %v2289_v1 }
  0x75   : > { %2069 = vmatpush3.bf16.msra.mxu0 %v2256_v3 }
  0x76   : > { %2089 = vmatpush3.bf16.msra.mxu1 %v2257_v4  ;;  %2070 = vmatprep.subr.bf16.mxu0 %v2289_v1  ;;  %v1475_v4 = vld [vmem:[%s2850_s7 + $0x40] sm:$0xff] }
  0x77   : > { %2090 = vmatprep.subr.bf16.mxu1 %v2289_v1 }
  0x79   : > { %2071 = vmatpush3.bf16.msra.mxu0 %v2258_v5  ;;  %v1462_v5 = vrot.slane %v1461_v61, 2 }
  0x7a   : > { %2091 = vmatpush3.bf16.msra.mxu1 %v2259_v6  ;;  %2072 = vmatprep.subr.bf16.mxu0 %v2289_v1 }
  0x7b   : > { %2092 = vmatprep.subr.bf16.mxu1 %v2289_v1 }
  0x7d   : > { %2073 = vmatpush3.bf16.msra.mxu0 %v2260_v7 }
  0x7e   : > { %2093 = vmatpush3.bf16.msra.mxu1 %v2261_v8  ;;  %2074 = vmatprep.subr.bf16.mxu0 %v2289_v1  ;;  %v1474_v8 = vld [vmem:[%s2850_s7 + $0x38] sm:$0xff] }
  0x7f   : > { %2094 = vmatprep.subr.bf16.mxu1 %v2289_v1 }
  0x81   : > { %2075 = vmatpush3.bf16.msra.mxu0 %v2262_v9  ;;  %v1473_v9 = vld [vmem:[%s2850_s7 + $0x30] sm:$0xff] }
  0x82   : > { %2095 = vmatpush3.bf16.msra.mxu1 %v2263_v10  ;;  %2076 = vmatprep.subr.bf16.mxu0 %v2289_v1  ;;  %v1463_v10 = vadd.f32 %v1462_v5, %v1461_v61  ;;  %v1446_v5 = vld [vmem:[%s2849_s6] sm:$0x1] }
  0x83   : > { %2096 = vmatprep.subr.bf16.mxu1 %v2289_v1 }
  0x85   : > { %2077 = vmatpush3.bf16.msra.mxu0 %v2264_v12  ;;  %v1472_v12 = vld [vmem:[%s2850_s7 + $0x28] sm:$0xff] }
  0x86   : > { %2097 = vmatpush3.bf16.msra.mxu1 %v2265_v13  ;;  %2078 = vmatprep.subr.bf16.mxu0 %v2289_v1  ;;  %v1471_v13 = vld [vmem:[%s2850_s7 + $0x20] sm:$0xff] }
  0x87   : > { %2098 = vmatprep.subr.bf16.mxu1 %v2289_v1 }
  0x89   : > { %2079 = vmatpush3.bf16.msra.mxu0 %v2266_v14  ;;  %v1464_v14 = vrot.slane %v1463_v10, 1 }
  0x8a   : > { %2099 = vmatpush3.bf16.msra.mxu1 %v2267_v15  ;;  %2104 = vmatprep.subr.bf16.mxu0 %v2289_v1  ;;  %v1470_v15 = vld [vmem:[%s2850_s7 + $0x18] sm:$0xff] }
  0x8b   : > { %2124 = vmatprep.subr.mxu1 %v2289_v1 }
  0x8c   : > { %2081 = vmatmul.mubr.bf16.vlgmr.msra.gmra.mxu0 %v902_v62 }
  0x8d   : > { %2101 = vmatmul.mubr.bf16.vlgmr.msra.gmra.mxu1 %v2507_v42  ;;  %2105 = vmatpush3.bf16.msra.mxu0 %v2268_v16  ;;  %v1366_v42 = vld [vmem:[%s2847_s4 + $0x40] sm:$0xff]  ;;  %v1469_v16 = vld [vmem:[%s2850_s7 + $0x10] sm:$0xff] }
  0x8e   : > { %2106 = vmatprep.subr.bf16.mxu0 %v2289_v1  ;;  %2120 = vmatprep.mubr.msk.bf16.mxu0 %vm2290_vm0, %v2289_v1 }
  0x8f   : > { %2156 = vmatprep.mubr.msk.f32.mxu1 %vm2290_vm0, %v2289_v1  ;;  %2125 = vmatpush3.msra.mxu1 %v1373_v26 }
  0x90   : > { %2126 = vmatprep.subr.mxu1 %v2289_v1 }
  0x91   : > { %2107 = vmatpush3.bf16.msra.mxu0 %v2269_v17  ;;  %2127 = vmatpush3.msra.mxu1 %v1372_v27  ;;  %v1465_v17 = vadd.f32 %v1464_v14, %v1463_v10 }
  0x92   : > { %2108 = vmatprep.subr.bf16.mxu0 %v2289_v1  ;;  %2128 = vmatprep.subr.mxu1 %v2289_v1 }
  0x93   : > { %2129 = vmatpush3.msra.mxu1 %v1371_v28 }
  0x94   : > { %2130 = vmatprep.subr.mxu1 %v2289_v1 }
  0x95   : > { %2109 = vmatpush3.bf16.msra.mxu0 %v2270_v18  ;;  %2131 = vmatpush3.msra.mxu1 %v1370_v31  ;;  %v2280_v18 = vld [vmem:[#allocation2] sm:$0xff] }
  0x96   : > { %2110 = vmatprep.subr.bf16.mxu0 %v2289_v1  ;;  %2132 = vmatprep.subr.mxu1 %v2289_v1 }
  0x97   : > { %2133 = vmatpush3.msra.mxu1 %v1369_v35 }
  0x98   : > { %2134 = vmatprep.subr.mxu1 %v2289_v1 }
  0x99   : > { %2111 = vmatpush3.bf16.msra.mxu0 %v2271_v19  ;;  %2135 = vmatpush3.msra.mxu1 %v1368_v38  ;;  %v1468_v19 = vld [vmem:[%s2850_s7 + $0x8] sm:$0xff] }
  0x9a   : > { %2112 = vmatprep.subr.bf16.mxu0 %v2289_v1  ;;  %2136 = vmatprep.subr.mxu1 %v2289_v1 }
  0x9b   : > { %2137 = vmatpush3.msra.mxu1 %v1367_v41 }
  0x9c   : > { %2138 = vmatprep.subr.mxu1 %v2289_v1 }
  0x9d   : > { %2113 = vmatpush3.bf16.msra.mxu0 %v2272_v20  ;;  %2139 = vmatpush3.msra.mxu1 %v1366_v42  ;;  %v1467_v20 = vld [vmem:[%s2850_s7] sm:$0xff] }
  0x9e   : > { %2114 = vmatprep.subr.bf16.mxu0 %v2289_v1  ;;  %2140 = vmatprep.subr.mxu1 %v2289_v1 }
  0x9f   : > { %2141 = vmatpush3.msra.mxu1 %v1365_v43 }
  0xa0   : > { %2142 = vmatprep.subr.mxu1 %v2289_v1 }
  0xa1   : > { %2115 = vmatpush3.bf16.msra.mxu0 %v2273_v21  ;;  %2143 = vmatpush3.msra.mxu1 %v1364_v44  ;;  %v1466_v21 = vmul.f32 0.25, %v1465_v17 }
  0xa2   : > { %2116 = vmatprep.subr.bf16.mxu0 %v2289_v1  ;;  %2144 = vmatprep.subr.mxu1 %v2289_v1 }
  0xa3   : > { %2145 = vmatpush3.msra.mxu1 %v1363_v45 }
  0xa4   : > { %2146 = vmatprep.subr.mxu1 %v2289_v1 }
  0xa5   : > { %2117 = vmatpush3.bf16.msra.mxu0 %v2274_v22  ;;  %2147 = vmatpush3.msra.mxu1 %v1362_v46 }
  0xa6   : > { %2118 = vmatprep.subr.bf16.mxu0 %v2289_v1  ;;  %2148 = vmatprep.subr.mxu1 %v2289_v1 }
  0xa7   : > { %2149 = vmatpush3.msra.mxu1 %v1361_v47 }
  0xa8   : > { %2150 = vmatprep.subr.mxu1 %v2289_v1 }
  0xa9   : > { %2119 = vmatpush3.bf16.msra.mxu0 %v2275_v23  ;;  %2151 = vmatpush3.msra.mxu1 %v1360_v49  ;;  %v1824_v49 = vld [vmem:[%s2845_s2] ss:$0 sm:$0xff] }
  0xaa   : > { %2159 = vmatprep.subr.mxu0 %v2289_v1  ;;  %2152 = vmatprep.subr.mxu1 %v2289_v1 }
  0xab   : > { %2153 = vmatpush3.msra.mxu1 %v1359_v50 }
  0xac   : > { %2121 = vmatmul.mubr.bf16.vlgmr.msra.gmra.mxu0 %v1223_v25  ;;  %2154 = vmatprep.subr.mxu1 %v2289_v1 }
  0xad   : > { %2191 = vmatprep.mubr.msk.f32.mxu0 %vm2290_vm0, %v2289_v1  ;;  %2160 = vmatpush3.msra.mxu0 %v1482_v48 }
  0xae   : > { %2161 = vmatprep.subr.mxu0 %v2289_v1  ;;  %2155 = vmatpush3.msra.mxu1 %v1358_v51 }
  0xaf   : > { %2162 = vmatpush3.msra.mxu0 %v1481_v53 }
  0xb0   : > { %2163 = vmatprep.subr.mxu0 %v2289_v1 }
  0xb1   : > { %2164 = vmatpush3.msra.mxu0 %v1480_v54 }
  0xb2   : > { %2165 = vmatprep.subr.mxu0 %v2289_v1 }
  0xb3   : > { %2166 = vmatpush3.msra.mxu0 %v1479_v56 }
  0xb4   : > { %2167 = vmatprep.subr.mxu0 %v2289_v1 }
  0xb5   : > { %2168 = vmatpush3.msra.mxu0 %v1478_v11 }
  0xb6   : > { %2169 = vmatprep.subr.mxu0 %v2289_v1 }
  0xb7   : > { %2170 = vmatpush3.msra.mxu0 %v1477_v60 }
  0xb8   : > { %2171 = vmatprep.subr.mxu0 %v2289_v1 }
  0xb9   : > { %2172 = vmatpush3.msra.mxu0 %v1476_v0 }
  0xba   : > { %2173 = vmatprep.subr.mxu0 %v2289_v1 }
  0xbb   : > { %2174 = vmatpush3.msra.mxu0 %v1475_v4 }
  0xbc   : > { %2175 = vmatprep.subr.mxu0 %v2289_v1 }
  0xbd   : > { %2176 = vmatpush3.msra.mxu0 %v1474_v8 }
  0xbe   : > { %2177 = vmatprep.subr.mxu0 %v2289_v1 }
  0xbf   : > { %2178 = vmatpush3.msra.mxu0 %v1473_v9 }
  0xc0   : > { %2179 = vmatprep.subr.mxu0 %v2289_v1 }
  0xc1   : > { %2180 = vmatpush3.msra.mxu0 %v1472_v12 }
  0xc2   : > { %2181 = vmatprep.subr.mxu0 %v2289_v1 }
  0xc3   : > { %2182 = vmatpush3.msra.mxu0 %v1471_v13  ;;  %v1553_v13 = vld [vmem:[%s2851_s8] sm:$0x1] }
  0xc4   : > { %2183 = vmatprep.subr.mxu0 %v2289_v1  ;;  %v362_v1 = vlaneseq }
  0xc5   : > { %2184 = vmatpush3.msra.mxu0 %v1470_v15  ;;  %v1555_v15 = vld [vmem:[%s2852_s9] sm:$0x1] }
  0xc6   : > { %2185 = vmatprep.subr.mxu0 %v2280_v18  ;;  %v2811_v22 = vshrl.u32 %v362_v1, 7 }
  0xc7   : > { %2186 = vmatpush3.msra.mxu0 %v1469_v16 }
  0xc8   : > { %2187 = vmatprep.subr.mxu0 %v2280_v18  ;;  %v364_v23 = vand.u32 1, %v2811_v22  ;;  %v1456_v17 = vsub.s32 0, %v2811_v22 }
  0xc9   : > { %2188 = vmatpush3.msra.mxu0 %v1468_v19 }
  0xca   : > { %2189 = vmatprep.subr.mxu0 %v2280_v18  ;;  %vm687_vm2 = vcmp.eq.s32.totalorder %v364_v23, 0  ;;  %vm1011_vm3 = vcmp.eq.s32.totalorder %v364_v23, 1 }
  0xcb   : > { %2190 = vmatpush3.msra.mxu0 %v1467_v20 }
  0xcc   : > { %2192 = vmatmul.mubr.f32.vlgmr.msra.gmra.mxu0 %v1466_v21 }
  0xec   : > { %v485_v29 = vpop.f32.mrf.mxu0 }
  0xed   : > { %v573_v30 = vpop.f32.mrf.mxu1 }
  0xee   : > { %v574_v32 = vadd.f32 %v573_v30, %v485_v29  ;;  %v1962_v33 = vpop.f32.mrf.mxu0 }
  0xef   : > { %v1982_v34 = vpop.f32.mrf.mxu1 }
  0xf0   : > { %v488_v36 = vpop.f32.mrf.mxu0 }
  0xf1   : > { %v576_v37 = vpop.f32.mrf.mxu1 }
  0xf2   : > { %v1963_v39 = vpop.f32.mrf.mxu0 }
  0xf3   : > { %v1983_v40 = vpop.f32.mrf.mxu1 }
 0x10c   : > { %v680_v57 = vpop.f32.mrf.mxu0 }
 0x10d   : > { %v2767_v58 = vadd.f32 %v680_v57, %v574_v32  ;;  %v807_v59 = vpop.f32.mrf.mxu1 }
 0x10e   : > { %v2002_v62 = vpop.f32.mrf.mxu0 }
 0x10f   : > { %v2022_v63 = vpop.f32.mrf.mxu1 }
 0x110   : > { %v683_v2 = vpop.f32.mrf.mxu0 }
 0x111   : > { %v810_v3 = vpop.f32.mrf.mxu1 }
 0x112   : > { %v2003_v6 = vpop.f32.mrf.mxu0  ;;  %v1444_v3 = vld [vmem:[%s2848_s5] sm:$0x1] }
 0x113   : > { %v2023_v7 = vpop.f32.mrf.mxu1 }
 0x12c   : > { %v895_v24 = vpop.f32.mrf.mxu0 }
 0x12d   : > { %v896_v25 = vadd.f32 %v895_v24, %v807_v59  ;;  %v1002_v26 = vpop.f32.mrf.mxu1 }
 0x12e   : > { %v2042_v27 = vpop.f32.mrf.mxu0 }
 0x12f   : > { %v1008_v28 = vadd.f32 %v1002_v26, %v896_v25  ;;  %v2062_v29 = vpop.f32.mrf.mxu1 }
 0x130   : > { %v898_v30 = vpop.f32.mrf.mxu0 }
 0x131   : > { %v1009_v31 = vsel %vm687_vm2, 0.0, %v1008_v28  ;;  %v1005_v32 = vpop.f32.mrf.mxu1 }
 0x132   : > { %v1010_v33 = vadd.f32 %v1009_v31, %v2767_v58  ;;  %v2043_v34 = vpop.f32.mrf.mxu0 }
 0x133   : > { %v2063_v35 = vpop.f32.mrf.mxu1 }
 0x14c   : > { %v1128_v36 = vpop.f32.mrf.mxu0 }
 0x14d   : > { %v1216_v37 = vpop.f32.mrf.mxu1 }
 0x14e   : > { %v2082_v38 = vpop.f32.mrf.mxu0  ;;  %v1217_v44 = vadd.f32 %v1216_v37, %v1128_v36 }
 0x14f   : > { %v2102_v39 = vpop.f32.mrf.mxu1 }
 0x150   : > { %v1131_v40 = vpop.f32.mrf.mxu0 }
 0x151   : > { %v1219_v41 = vpop.f32.mrf.mxu1 }
 0x152   : > { %v2083_v42 = vpop.f32.mrf.mxu0 }
 0x153   : > { %v2103_v43 = vpop.f32.mrf.mxu1 }
 0x16c   : > { %v1323_v45 = vpop.f32.mrf.mxu0 }
 0x16d   : > { %v1329_v46 = vadd.f32 %v1323_v45, %v1217_v44 }
 0x16e   : > { %v2122_v47 = vpop.f32.mrf.mxu0 }
 0x16f   : > { %v1330_v48 = vsel %vm1011_vm3, 0.0, %v1329_v46 }
 0x170   : > { %v1331_v50 = vadd.f32 %v1330_v48, %v1010_v33  ;;  %v1326_v51 = vpop.f32.mrf.mxu0 }
 0x172   : > { %v1339_v53 = vmul.f32 %v1824_v49, %v1331_v50  ;;  %v2123_v54 = vpop.f32.mrf.mxu0 }
 0x174   : > { %v1347_v55 = vadd.f32 %v1825_v52, %v1339_v53 }
 0x176   : > { %v1348_v56 = vmax.f32 %v1347_v55, 0.0 }
 0x178   : > { %v1350_v11 = vsel %vm1349_vm1, %v1348_v56, 0.0 }
 0x179   : > { %v1351_v57 = vrot.slane %v1350_v11, 4 }
 0x17b   : > { %v1352_v58 = vadd.f32 %v1351_v57, %v1350_v11 }
 0x17d   : > { %v1353_v59 = vrot.slane %v1352_v58, 2 }
 0x17f   : > { %v1354_v60 = vadd.f32 %v1353_v59, %v1352_v58 }
 0x181   : > { %v1355_v61 = vrot.slane %v1354_v60, 1 }
 0x183   : > { %v1356_v62 = vadd.f32 %v1355_v61, %v1354_v60 }
 0x185   : > { %v1357_v63 = vmul.f32 0.25, %v1356_v62 }
 0x187   : > { %2157 = vmatmul.mubr.f32.vlgmr.msra.gmra.mxu1 %v1357_v63 }
 0x18c   : > { %v1549_v0 = vpop.f32.mrf.mxu0 }
 0x18d   : > { %v1554_v14 = vmul.f32 %v1553_v13, %v1549_v0 }
 0x18e   : > { %v2193_v2 = vpop.f32.mrf.mxu0 }
 0x18f   : > { %v1556_v16 = vadd.f32 %v1555_v15, %v1554_v14 }
 0x191   : > { %v1557_v18 = vmax.f32 %v1556_v16, 0.0 }
 0x193   : > { %v1561_v21 = vrot.slane %v1557_v18, %v1456_v17 }
 0x247   : > { %v1440_v4 = vpop.f32.mrf.mxu1 }
 0x248   : > { %v1445_v6 = vmul.f32 %v1444_v3, %v1440_v4 }
 0x249   : > { %v2158_v7 = vpop.f32.mrf.mxu1 }
 0x24a   : > { %v1447_v8 = vadd.f32 %v1446_v5, %v1445_v6 }
 0x24c   : > { %v1826_v9 = vmul.f32 -1.442695, %v1447_v8 }
 0x24e   : > { %2276 = vpow2.f32 %v1826_v9 }
 0x25b   : > { %v2277_v10 = vpop.eup %2276 }
 0x25c   : > { %v1451_v12 = vadd.f32 1.0, %v2277_v10 }
 0x25e   : > { %2278 = vrcp.f32 %v1451_v12 }
 0x26b   : > { %v2279_v19 = vpop.eup %2278 }
 0x26c   : > { %v1457_v20 = vrot.slane %v2279_v19, %v1456_v17 }
 0x26e   : > { %v1458_v1 = vmul.f32 %v1457_v20, %v1348_v56 }
 0x270   : > { %v1562_v23 = vadd.f32 %v1561_v21, %v1458_v1 }
 0x272   : > { %1563 = vst [vmem:[%s354_s19] sm:$0xf] %v1562_v23 }
 0x273 PF: > { %s20_s13 = sadd.s32 1, %s2287_s13  }
 0x274   : > { %p17_p4 = scmp.ge.s32.totalorder %s20_s13, 4  }
 0x276   :  { %19 = sbr.rel (!%p17_p4) target bundleno = 1 (0x1), region = 98 }

// kernel: _lambda_.7
= control target key start
LH: loop header
LB: loop body
LE: loop exit
PB: predicated region body
PF: predicated region fallthrough
CT: control target
= control target key end

     0   :  { %11 = vsyncpa [#allocation4], 0  ;;  %s3539_s0 = inlined_call_operand.vmem [shape: f32[2,16,128], index: 0, kind: input, shape index: {}]   ;;  %s3540_s1 = inlined_call_operand.vmem [shape: f32[2,16,128], index: 1, kind: input, shape index: {}]   ;;  %s3541_s2 = inlined_call_operand.vmem [shape: f32[8,4], index: 2, kind: input, shape index: {}]   ;;  %s3542_s3 = inlined_call_operand.vmem [shape: bf16[9,128,128], index: 3, kind: input, shape index: {}]   ;;  %s3543_s4 = inlined_call_operand.vmem [shape: f32[1,128], index: 4, kind: input, shape index: {}]   ;;  %s3544_s5 = inlined_call_operand.vmem [shape: f32[1,128], index: 5, kind: input, shape index: {}]   ;;  %s3545_s6 = inlined_call_operand.hbm [shape: f32[2,64,128], index: 6, kind: output, shape index: {}]  }
   0x1   :  { %13 = vsyncpa [#allocation4 + $0x1], 0  ;;  %s2896_s21 = smov 0   ;;  %s2898_s22 = smov 0  }
   0x2   :  { %s2900_s23 = smov 0   ;;  %s2902_s24 = smov 0  }
   0x3 LB: > { %s2917_s25 = sadd.s32 4294967295, %s2854_s24   ;;  %s2084_s26 = sadd.s32 4294967294, %s2854_s24   ;;  %s2854_s24 = sphi %s2902_s24, %s3621_s24   ;;  %s2850_s23 = sphi %s2900_s23, %s3620_s23   ;;  %s2846_s22 = sphi %s2898_s22, %s3619_s22   ;;  %s2842_s21 = sphi %s2896_s21, %s3618_s21  }
   0x4   : > { %s2921_s27 = sadd.s32 1, %s2854_s24   ;;  %s162_s28 = sadd.s32 1, %s2850_s23 }
   0x5   : > { %s159_s29 = ssub.s32 %s2854_s24, %s2921_s27  ;;  %p172_p0 = scmp.ne.s32.totalorder %s2850_s23, %s2846_s22 }
   0x6   : > { %p160_p1 = scmp.eq.s32.totalorder %s159_s29, 0  ;;  %p173_p2 = scmp.eq.s32.totalorder %s2917_s25, 1 }
   0x7   : > { %p178_p3 = scmp.ne.s32.totalorder %s2846_s22, %s2842_s21  ;;  %p179_p4 = scmp.eq.s32.totalorder %s2084_s26, 1 }
   0x8   : > { %s2932_s30 = scalar_select %p160_p1, %s2850_s23, %s162_s28  }
   0x9   : > { %p2934_p5 = por %p173_p2, %p172_p0  ;;  %p2938_p6 = por %p179_p4, %p178_p3 }
   0xa   : > { %p2087_p7 = scmp.ge.s32.totalorder %s2854_s24, 1  ;;  %p225_p8 = scmp.lt.s32.totalorder %s2854_s24, 3 }
   0xc   : > { %p226_p9 = pnand %p2087_p7, %p225_p8 }
   0xe   : > { %229 = sbr.rel (%p226_p9) target bundleno = 586 (0x24a), region = 44 }
  0x13   : > { %p260_p10 = scmp.lt.s32.totalorder %s2917_s25, 1  ;;  %v2856_v0 = vmov 0.0   ;;  %vm2857_vm0 = vmmov 0   ;;  %v281_v1 = vld [vmem:[%s3541_s2] sm:$0xff]  ;;  %vm286_vm1 = vcmask 1043456   ;;  %vm282_vm2 = vcmask 31744  }
  0x14   : > { %2427 = vmatprep.subr.mxu0 %v2856_v0  ;;  %271 = vst [vmem:[#allocation2] sm:$0xff] %v2856_v0  ;;  %272 = vst [vmem:[#allocation2 + $0x8] sm:$0xff] %v2856_v0  ;;  %2429 = vmatprep.mubr.msk.f32.mxu0 %vm2857_vm0, %v2856_v0  ;;  %v2722_v9 = vld [vmem:[%s3542_s3 + $0x78] sm:$0xff]   ;;  %v2725_v12 = vld [vmem:[%s3542_s3 + $0x130] sm:$0xff]   ;;  %s2310_s20 = sshll.u32 %s2917_s25, 10  ;;  %s2858_s11 = smov [#allocation3]  }
  0x15   : > { %273 = vst [vmem:[#allocation2 + $0x50] sm:$0xff] %v2856_v0  ;;  %274 = vst [vmem:[#allocation2 + $0x58] sm:$0xff] %v2856_v0  ;;  %s261_s9 = scalar_select %p260_p10, %s2917_s25, 1  ;;  %2432 = vmatprep.subr.mxu1 %v2856_v0  ;;  %2434 = vmatprep.mubr.msk.f32.mxu1 %vm2857_vm0, %v2856_v0  ;;  %v2723_v11 = vld [vmem:[%s3542_s3 + $0x138] sm:$0xff]   ;;  %v2724_v13 = vld [vmem:[%s3542_s3 + $0x70] sm:$0xff]  }
  0x16   : > { %v2727_v14 = vld [vmem:[%s3542_s3 + $0x128] sm:$0xff]   ;;  %v2729_v16 = vld [vmem:[%s3542_s3 + $0x120] sm:$0xff]   ;;  %v2730_v18 = vld [vmem:[%s3542_s3 + $0x58] sm:$0xff]   ;;  %s2798_s12 = sshll.u32 %s2858_s11, 4  ;;  %s2799_s12 = int_to_ptr.vmem [resolvable:$false] %s2798_s12 }
  0x17   : > { %s2308_s10 = sshll.u32 %s261_s9, 4  ;;  %v2726_v15 = vld [vmem:[%s3542_s3 + $0x68] sm:$0xff]   ;;  %v2728_v17 = vld [vmem:[%s3542_s3 + $0x60] sm:$0xff]   ;;  %v2731_v19 = vld [vmem:[%s3542_s3 + $0x118] sm:$0xff]   ;;  %s3493_s9 = scalar_lea.hbm %s3545_s6, %s2310_s20 }
  0x18   : > { %s264_s13 = scalar_lea.vmem %s3539_s0, %s2308_s10  ;;  %s269_s16 = scalar_lea.vmem %s3540_s1, %s2308_s10  ;;  %v2732_v20 = vld [vmem:[%s3542_s3 + $0x50] sm:$0xff]   ;;  %v2734_v22 = vld [vmem:[%s3542_s3 + $0x48] sm:$0xff]   ;;  %v2736_v24 = vld [vmem:[%s3542_s3 + $0x40] sm:$0xff]  }
  0x19   : > { %v275_v2 = vld [vmem:[%s264_s13] sm:$0xff]  ;;  %v276_v3 = vld [vmem:[%s264_s13 + $0x8] sm:$0xff]  ;;  %v2733_v21 = vld [vmem:[%s3542_s3 + $0x110] sm:$0xff]   ;;  %s257_s13 = sand.u32 1, %s2846_s22   ;;  %s2800_s14 = scalar_lea.vmem %s2799_s12, 2048 }
  0x1a   : > { %v277_v4 = vld [vmem:[%s269_s16] sm:$0xff]  ;;  %v278_v5 = vld [vmem:[%s269_s16 + $0x8] sm:$0xff]  ;;  %v2738_v26 = vld [vmem:[%s3542_s3 + $0xf8] sm:$0xff]   ;;  %s2088_s18 = sshll.u32 %s257_s13, 6  ;;  %s3499_s25 = scalar_lea.sflag [#allocation4], %s257_s13 }
  0x1b   : > { %v279_v6 = vadd.f32 %v277_v4, %v275_v2  ;;  %v280_v7 = vadd.f32 %v278_v5, %v276_v3  ;;  %v2735_v23 = vld [vmem:[%s3542_s3 + $0x108] sm:$0xff]   ;;  %v2737_v25 = vld [vmem:[%s3542_s3 + $0x100] sm:$0xff]   ;;  %v2739_v27 = vld [vmem:[%s3542_s3 + $0x1f8] sm:$0xff]   ;;  %s259_s19 = scalar_lea.vmem [#allocation3], %s2088_s18 }
  0x1c   : > { %v2740_v59 = vld [vmem:[%s3542_s3 + $0xf0] sm:$0xff]   ;;  %v2742_v62 = vld [vmem:[%s3542_s3 + $0xe8] sm:$0xff]   ;;  %v2744_v5 = vld [vmem:[%s3542_s3 + $0xe0] sm:$0xff]   ;;  %s2010_s26 = sshll.u32 %s259_s19, 4  ;;  %s3495_s26 = int_to_ptr.vmem [resolvable:$true] %s2010_s26 }
  0x1d   : > { %2428 = vmatpush3.msk.msra.mxu0 %vm286_vm1, %v279_v6  ;;  %v360_v8 = vrot.slane %v279_v6, 4  ;;  %v506_v10 = vrot.slane %v280_v7, 4  ;;  %v2741_v60 = vld [vmem:[%s3542_s3 + $0x1f0] sm:$0xff]   ;;  %v2743_v63 = vld [vmem:[%s3542_s3 + $0x1e8] sm:$0xff]   ;;  %s2794_s10 = scalar_lea.vmem %s3495_s26, 1024  ;;  %p2801_p0 = scmp.lt.s32.totalorder %s3495_s26, %s2799_s12 }
  0x1e   : > { %2430 = vmatmul.mubr.msk.f32.vlgmr.msra.gmra.mxu0 %vm282_vm2, %v281_v1  ;;  %2437 = vmatprep.subr.mxu0 %v2856_v0  ;;  %p2795_p11 = scmp.ne.s32.totalorder %s3495_s26, %s2794_s10  ;;  %p2802_p1 = scmp.lt.s32.totalorder %s2800_s14, %s2794_s10 }
  0x1f   : > { %2433 = vmatpush3.msk.msra.mxu1 %vm286_vm1, %v360_v8  ;;  %2438 = vmatpush3.msk.msra.mxu0 %vm286_vm1, %v280_v7  ;;  %v2745_v7 = vld [vmem:[%s3542_s3 + $0x1e0] sm:$0xff]   ;;  %v2746_v8 = vld [vmem:[%s3542_s3 + $0xd8] sm:$0xff]  }
  0x20   : > { %2435 = vmatmul.mubr.msk.f32.vlgmr.msra.gmra.mxu1 %vm282_vm2, %v281_v1  ;;  %2439 = vmatprep.mubr.msk.f32.mxu0 %vm2857_vm0, %v2856_v0  ;;  %p2796_p12 = pnand %p2795_p11, %p2934_p5  ;;  %p2803_p2 = por %p2802_p1, %p2801_p0 }
  0x21   : > { %2442 = vmatprep.subr.mxu1 %v2856_v0  ;;  %2444 = vmatprep.mubr.msk.f32.mxu1 %vm2857_vm0, %v2856_v0 }
  0x22   : > { %2440 = vmatmul.mubr.msk.f32.vlgmr.msra.gmra.mxu0 %vm282_vm2, %v281_v1  ;;  %2443 = vmatpush3.msk.msra.mxu1 %vm286_vm1, %v506_v10  ;;  %v2748_v10 = vld [vmem:[%s3542_s3 + $0xd0] sm:$0xff]   ;;  %p2797_p13 = pneg %p2796_p12 }
  0x23   : > { %2471 = vmatprep.subr.bf16.mxu1 %v2722_v9  ;;  %2447 = vmatprep.subr.bf16.mxu0 %v2723_v11 }
  0x24   : > { %2445 = vmatmul.mubr.msk.f32.vlgmr.msra.gmra.mxu1 %vm282_vm2, %v281_v1  ;;  %2448 = vmatpush3.bf16.msra.mxu0 %v2723_v11  ;;  %v2749_v11 = vld [vmem:[%s3542_s3 + $0x1d0] sm:$0xff]   ;;  %p2804_p3 = pnand %p2803_p2, %p2797_p13 }
  0x25   : > { %2472 = vmatpush3.bf16.msra.mxu1 %v2722_v9  ;;  %2449 = vmatprep.subr.bf16.mxu0 %v2725_v12  ;;  %v2747_v9 = vld [vmem:[%s3542_s3 + $0x1d8] sm:$0xff]  }
  0x26   : > { %2473 = vmatprep.subr.bf16.mxu1 %v2724_v13 }
  0x28   : > { %2450 = vmatpush3.bf16.msra.mxu0 %v2725_v12  ;;  %v2750_v12 = vld [vmem:[%s3542_s3 + $0xc8] sm:$0xff]  }
  0x29   : > { %2474 = vmatpush3.bf16.msra.mxu1 %v2724_v13  ;;  %2451 = vmatprep.subr.bf16.mxu0 %v2727_v14  ;;  %v2751_v13 = vld [vmem:[%s3542_s3 + $0x1c8] sm:$0xff]  }
  0x2a   : > { %2475 = vmatprep.subr.bf16.mxu1 %v2726_v15 }
  0x2c   : > { %2452 = vmatpush3.bf16.msra.mxu0 %v2727_v14  ;;  %v2752_v14 = vld [vmem:[%s3542_s3 + $0xc0] sm:$0xff]  }
  0x2d   : > { %2476 = vmatpush3.bf16.msra.mxu1 %v2726_v15  ;;  %2453 = vmatprep.subr.bf16.mxu0 %v2729_v16  ;;  %v2753_v15 = vld [vmem:[%s3542_s3 + $0x1c0] sm:$0xff]  }
  0x2e   : > { %2477 = vmatprep.subr.bf16.mxu1 %v2728_v17 }
  0x30   : > { %2454 = vmatpush3.bf16.msra.mxu0 %v2729_v16  ;;  %v2754_v16 = vld [vmem:[%s3542_s3 + $0x1b8] sm:$0xff]  }
  0x31   : > { %2478 = vmatpush3.bf16.msra.mxu1 %v2728_v17  ;;  %2455 = vmatprep.subr.bf16.mxu0 %v2731_v19 }
  0x32   : > { %2479 = vmatprep.subr.bf16.mxu1 %v2730_v18 }
  0x34   : > { %2456 = vmatpush3.bf16.msra.mxu0 %v2731_v19  ;;  %v2755_v19 = vld [vmem:[%s3542_s3 + $0x38] sm:$0xff]  }
  0x35   : > { %2480 = vmatpush3.bf16.msra.mxu1 %v2730_v18  ;;  %2457 = vmatprep.subr.bf16.mxu0 %v2733_v21 }
  0x36   : > { %2481 = vmatprep.subr.bf16.mxu1 %v2732_v20 }
  0x38   : > { %2458 = vmatpush3.bf16.msra.mxu0 %v2733_v21 }
  0x39   : > { %2482 = vmatpush3.bf16.msra.mxu1 %v2732_v20  ;;  %2459 = vmatprep.subr.bf16.mxu0 %v2735_v23 }
  0x3a   : > { %2483 = vmatprep.subr.bf16.mxu1 %v2734_v22 }
  0x3c   : > { %2460 = vmatpush3.bf16.msra.mxu0 %v2735_v23  ;;  %v2756_v23 = vld [vmem:[%s3542_s3 + $0x1b0] sm:$0xff]  }
  0x3d   : > { %2484 = vmatpush3.bf16.msra.mxu1 %v2734_v22  ;;  %2461 = vmatprep.subr.bf16.mxu0 %v2737_v25 }
  0x3e   : > { %2485 = vmatprep.subr.bf16.mxu1 %v2736_v24 }
  0x40   : > { %2462 = vmatpush3.bf16.msra.mxu0 %v2737_v25  ;;  %v2757_v25 = vld [vmem:[%s3542_s3 + $0x30] sm:$0xff]  }
  0x41   : > { %2486 = vmatpush3.bf16.msra.mxu1 %v2736_v24  ;;  %2495 = vmatprep.subr.bf16.mxu0 %v2739_v27 }
  0x42   : > { %2519 = vmatprep.subr.bf16.mxu1 %v2738_v26 }
  0xde   : > { %v356_v28 = vpop.f32.mrf.mxu0 }
  0xdf   : > { %579 = vst [vmem:[#allocation2 + $0x10] sm:$0xff] %v356_v28  ;;  %v630_v29 = vpack.c.bf16 %v356_v28, %v2856_v0  ;;  %v580_v30 = vmul.f32 0.5714286, %v356_v28  ;;  %v584_v31 = vmul.f32 0.14285715, %v356_v28 }
  0xe0   : > { %v2431_v32 = vpop.f32.mrf.mxu0  ;;  %v429_v33 = vpop.f32.mrf.mxu1 }
  0xe1   : > { %v581_v34 = vmul.f32 0.42857143, %v429_v33  ;;  %v585_v35 = vmul.f32 0.85714287, %v429_v33  ;;  %v588_v36 = vmul.f32 0.71428573, %v429_v33  ;;  %2487 = vmatprep.mubr.bf16.mxu1 %v630_v29 }
  0xe2   : > { %v592_v37 = vmul.f32 0.2857143, %v429_v33  ;;  %v2436_v38 = vpop.f32.mrf.mxu1  ;;  %v502_v39 = vpop.f32.mrf.mxu0  ;;  %v2759_v29 = vld [vmem:[%s3542_s3 + $0x28] sm:$0xff]   ;;  %v2760_v32 = vld [vmem:[%s3542_s3 + $0x1a0] sm:$0xff]  }
  0xe3   : > { %v582_v40 = vadd.f32 %v581_v34, %v580_v30  ;;  %v586_v41 = vadd.f32 %v585_v35, %v584_v31  ;;  %v589_v42 = vmul.f32 0.2857143, %v502_v39  ;;  %v593_v43 = vmul.f32 0.71428573, %v502_v39  ;;  %v1057_v31 = vld [vmem:[#allocation2 + $0x7] sm:$0xff]  ;;  %v2764_v38 = vld [vmem:[%s3542_s3 + $0x190] sm:$0xff]  }
  0xe4   : > { %v596_v44 = vmul.f32 0.85714287, %v502_v39  ;;  %v600_v45 = vmul.f32 0.42857143, %v502_v39  ;;  %v2441_v46 = vpop.f32.mrf.mxu0  ;;  %v3034_v47 = vpop.f32.mrf.mxu1  ;;  %v2761_v35 = vld [vmem:[%s3542_s3 + $0x20] sm:$0xff]   ;;  %v2765_v39 = vld [vmem:[%s3542_s3 + $0x10] sm:$0xff]  }
  0xe5   : > { %583 = vst [vmem:[#allocation2 + $0x18] sm:$0xff] %v582_v40  ;;  %587 = vst [vmem:[#allocation2 + $0x20] sm:$0xff] %v586_v41  ;;  %v590_v48 = vadd.f32 %v589_v42, %v588_v36  ;;  %v594_v49 = vadd.f32 %v593_v43, %v592_v37  ;;  %v597_v50 = vmul.f32 0.14285715, %v3034_v47  ;;  %v601_v51 = vmul.f32 0.5714286, %v3034_v47 }
  0xe6   : > { %604 = vst [vmem:[#allocation2 + $0x48] sm:$0xff] %v3034_v47  ;;  %v631_v52 = vpack.c.bf16 %v586_v41, %v582_v40  ;;  %v652_v53 = vpack.c.bf16 %v582_v40, %v356_v28  ;;  %v2446_v54 = vpop.f32.mrf.mxu1  ;;  %v3054_v1 = vld [vmem:[#allocation2 + $0xf] sm:$0xff]  ;;  %v910_v34 = vpack.c.bf16 %v2856_v0, %v3034_v47  ;;  %v2762_v37 = vld [vmem:[%s3542_s3 + $0x198] sm:$0xff]   ;;  %v2768_v42 = vld [vmem:[%s3542_s3 + $0x180] sm:$0xff]  }
  0xe7   : > { %591 = vst [vmem:[#allocation2 + $0x28] sm:$0xff] %v590_v48  ;;  %595 = vst [vmem:[#allocation2 + $0x30] sm:$0xff] %v594_v49  ;;  %v598_v55 = vadd.f32 %v597_v50, %v596_v44  ;;  %v602_v56 = vadd.f32 %v601_v51, %v600_v45  ;;  %v653_v57 = vpack.c.bf16 %v590_v48, %v586_v41  ;;  %v2763_v0 = vld [vmem:[%s3542_s3 + $0x18] sm:$0xff]   ;;  %v2766_v40 = vld [vmem:[%s3542_s3 + $0x188] sm:$0xff]  }
  0xe8   : > { %v3039_v58 = vpack.c.bf16 %v594_v49, %v590_v48  ;;  %2463 = vmatprep.mubr.bf16.mxu0 %v652_v53  ;;  %2488 = vmatmul.mubr.bf16.vlgmr.msra.gmra.mxu1 %v631_v52  ;;  %v1065_v36 = vpack.c.bf16 %v3054_v1, %v1057_v31  ;;  %v2767_v41 = vld [vmem:[%s3542_s3 + $0x8] sm:$0xff]   ;;  %v2769_v43 = vld [vmem:[%s3542_s3] sm:$0xff]   ;;  %v2770_v44 = vld [vmem:[%s3542_s3 + $0xb8] sm:$0xff]  }
  0xe9   : > { %599 = vst [vmem:[#allocation2 + $0x38] sm:$0xff] %v598_v55  ;;  %603 = vst [vmem:[#allocation2 + $0x40] sm:$0xff] %v602_v56  ;;  %2520 = vmatpush3.bf16.msra.mxu1 %v2738_v26  ;;  %2464 = vmatmul.mubr.bf16.vlgmr.msra.gmra.mxu0 %v653_v57  ;;  %v654_v61 = vpack.c.bf16 %v598_v55, %v594_v49  ;;  %v633_v4 = vpack.c.bf16 %v602_v56, %v598_v55  ;;  %v2758_v26 = vld [vmem:[%s3542_s3 + $0x1a8] sm:$0xff]   ;;  %v2771_v45 = vld [vmem:[%s3542_s3 + $0x178] sm:$0xff]  }
  0xea   : > { %2491 = vmatprep.mubr.bf16.mxu1 %v3039_v58  ;;  %2496 = vmatpush3.bf16.msra.mxu0 %v2739_v27  ;;  %v655_v6 = vpack.c.bf16 %v3034_v47, %v602_v56  ;;  %v2772_v47 = vld [vmem:[%s3542_s3 + $0xb0] sm:$0xff]   ;;  %v2774_v50 = vld [vmem:[%s3542_s3 + $0xa8] sm:$0xff]   ;;  %v2776_v57 = vld [vmem:[%s3542_s3 + $0xa0] sm:$0xff]  }
  0xeb   : > { %2521 = vmatprep.subr.bf16.mxu1 %v2740_v59  ;;  %2467 = vmatprep.mubr.bf16.mxu0 %v654_v61  ;;  %v2773_v49 = vld [vmem:[%s3542_s3 + $0x170] sm:$0xff]   ;;  %v2775_v53 = vld [vmem:[%s3542_s3 + $0x168] sm:$0xff]   ;;  %v2778_v61 = vld [vmem:[%s3542_s3 + $0x98] sm:$0xff]  }
  0xec   : > { %2497 = vmatprep.subr.bf16.mxu0 %v2741_v60  ;;  %v3056_v2 = vld [vmem:[#allocation2 + $0x17] sm:$0xff]  ;;  %v1060_v20 = vld [vmem:[#allocation2 + $0x1f] sm:$0xff]  ;;  %v1507_v55 = vld [vmem:[#allocation2 + $0x9] sm:$0xff] }
  0xed   : > { %2522 = vmatpush3.bf16.msra.mxu1 %v2740_v59  ;;  %v1086_v3 = vpack.c.bf16 %v3056_v2, %v3054_v1  ;;  %v1066_v33 = vpack.c.bf16 %v1060_v20, %v3056_v2  ;;  %v1340_v51 = vld [vmem:[#allocation2 + $0x4f] sm:$0xff]  ;;  %v1509_v56 = vld [vmem:[#allocation2 + $0x19] sm:$0xff] }
  0xee   : > { %2498 = vmatpush3.bf16.msra.mxu0 %v2741_v60  ;;  %2523 = vmatprep.subr.bf16.mxu1 %v2742_v62  ;;  %v3094_v17 = vld [vmem:[#allocation2 + $0x27] sm:$0xff]  ;;  %v3102_v22 = vld [vmem:[#allocation2 + $0x2f] sm:$0xff] }
  0xef   : > { %2499 = vmatprep.subr.bf16.mxu0 %v2743_v63  ;;  %v1087_v21 = vpack.c.bf16 %v3094_v17, %v1060_v20  ;;  %v1342_v46 = vpack.c.bf16 %v3102_v22, %v3094_v17  ;;  %v2777_v59 = vld [vmem:[%s3542_s3 + $0x160] sm:$0xff]   ;;  %v2781_v1 = vld [vmem:[%s3542_s3 + $0x150] sm:$0xff]   ;;  %v2782_v2 = vld [vmem:[%s3542_s3 + $0x88] sm:$0xff]  }
  0xf0   : > { %2492 = vmatmul.mubr.bf16.gmra.mxu1 %v633_v4  ;;  %v3096_v18 = vld [vmem:[#allocation2 + $0x37] sm:$0xff]  ;;  %v1064_v27 = vld [vmem:[#allocation2 + $0x3f] sm:$0xff]  ;;  %v3116_v28 = vld [vmem:[#allocation2 + $0x47] sm:$0xff] }
  0xf1   : > { %2524 = vmatpush3.bf16.msra.mxu1 %v2742_v62  ;;  %2535 = vmatprep.mubr.bf16.mxu1 %v1086_v3  ;;  %v1088_v24 = vpack.c.bf16 %v3096_v18, %v3102_v22  ;;  %v1089_v30 = vpack.c.bf16 %v3116_v28, %v1064_v27  ;;  %v1343_v48 = vpack.c.bf16 %v1064_v27, %v3096_v18  ;;  %v2779_v62 = vld [vmem:[%s3542_s3 + $0x158] sm:$0xff]   ;;  %v2783_v3 = vld [vmem:[%s3542_s3 + $0x148] sm:$0xff]   ;;  %v2789_v20 = vld [vmem:[%s3542_s3 + $0x220] sm:$0xff]  }
  0xf2   : > { %2468 = vmatmul.mubr.bf16.gmra.mxu0 %v655_v6  ;;  %2525 = vmatprep.subr.bf16.mxu1 %v2744_v5  ;;  %v1344_v54 = vpack.c.bf16 %v1340_v51, %v3116_v28  ;;  %v2786_v6 = vld [vmem:[%s3542_s3 + $0x238] sm:$0xff]   ;;  %v1514_v17 = vld [vmem:[#allocation2 + $0x41] sm:$0xff]  ;;  %v1536_v18 = vld [vmem:[#allocation2 + $0x49] sm:$0xff] }
  0xf3   : > { %2500 = vmatpush3.bf16.msra.mxu0 %v2743_v63  ;;  %2511 = vmatprep.mubr.bf16.mxu0 %v631_v52  ;;  %v1508_v52 = vld [vmem:[#allocation2 + $0x11] sm:$0xff] }
  0xf4   : > { %2501 = vmatprep.subr.bf16.mxu0 %v2745_v7  ;;  %v1537_v60 = vpack.c.bf16 %v1509_v56, %v1508_v52  ;;  %v2780_v63 = vld [vmem:[%s3542_s3 + $0x90] sm:$0xff]   ;;  %v2790_v22 = vld [vmem:[%s3542_s3 + $0x218] sm:$0xff]  }
  0xf5   : > { %2526 = vmatpush3.bf16.msra.mxu1 %v2744_v5  ;;  %v2785_v5 = vld [vmem:[%s3542_s3 + $0x140] sm:$0xff]  }
  0xf6   : > { %2527 = vmatprep.subr.bf16.mxu1 %v2746_v8 }
  0xf7   : > { %2502 = vmatpush3.bf16.msra.mxu0 %v2745_v7  ;;  %v1510_v7 = vld [vmem:[#allocation2 + $0x21] sm:$0xff] }
  0xf8   : > { %2503 = vmatprep.subr.bf16.mxu0 %v2747_v9 }
  0xf9   : > { %2528 = vmatpush3.bf16.msra.mxu1 %v2746_v8  ;;  %v1512_v8 = vld [vmem:[#allocation2 + $0x31] sm:$0xff] }
  0xfa   : > { %2529 = vmatprep.subr.bf16.mxu1 %v2748_v10 }
  0xfb   : > { %2504 = vmatpush3.bf16.msra.mxu0 %v2747_v9  ;;  %v1511_v9 = vld [vmem:[#allocation2 + $0x29] sm:$0xff] }
  0xfc   : > { %2505 = vmatprep.subr.bf16.mxu0 %v2749_v11 }
  0xfd   : > { %2530 = vmatpush3.bf16.msra.mxu1 %v2748_v10  ;;  %v1516_v10 = vpack.c.bf16 %v1510_v7, %v1509_v56 }
  0xfe   : > { %2531 = vmatprep.subr.bf16.mxu1 %v2750_v12 }
  0xff   : > { %2506 = vmatpush3.bf16.msra.mxu0 %v2749_v11  ;;  %v1513_v11 = vld [vmem:[#allocation2 + $0x39] sm:$0xff] }
 0x100   : > { %2507 = vmatprep.subr.bf16.mxu0 %v2751_v13 }
 0x101   : > { %2532 = vmatpush3.bf16.msra.mxu1 %v2750_v12  ;;  %v2787_v12 = vld [vmem:[%s3542_s3 + $0x230] sm:$0xff]  }
 0x102   : > { %2533 = vmatprep.subr.bf16.mxu1 %v2752_v14 }
 0x103   : > { %2508 = vmatpush3.bf16.msra.mxu0 %v2751_v13  ;;  %v1517_v13 = vpack.c.bf16 %v1512_v8, %v1511_v9 }
 0x104   : > { %2509 = vmatprep.subr.bf16.mxu0 %v2753_v15 }
 0x105   : > { %2534 = vmatpush3.bf16.msra.mxu1 %v2752_v14  ;;  %v1538_v14 = vpack.c.bf16 %v1511_v9, %v1510_v7 }
 0x106   : > { %2567 = vmatprep.subr.bf16.mxu1 %v2754_v16 }
 0x107   : > { %2510 = vmatpush3.bf16.msra.mxu0 %v2753_v15  ;;  %v1539_v15 = vpack.c.bf16 %v1513_v11, %v1512_v8 }
 0x108   : > { %2536 = vmatmul.mubr.bf16.vlgmr.msra.gmra.mxu1 %v1087_v21  ;;  %2543 = vmatprep.subr.bf16.mxu0 %v2755_v19  ;;  %v1540_v21 = vpack.c.bf16 %v1536_v18, %v1514_v17 }
 0x109   : > { %2539 = vmatprep.mubr.bf16.mxu1 %v1088_v24  ;;  %2568 = vmatpush3.bf16.msra.mxu1 %v2754_v16  ;;  %v2788_v16 = vld [vmem:[%s3542_s3 + $0x228] sm:$0xff]  }
 0x10a   : > { %2512 = vmatmul.mubr.bf16.vlgmr.msra.gmra.mxu0 %v3039_v58  ;;  %2569 = vmatprep.subr.bf16.mxu1 %v2756_v23  ;;  %v1515_v58 = vpack.c.bf16 %v1508_v52, %v1507_v55  ;;  %v2792_v24 = vld [vmem:[%s3542_s3 + $0x208] sm:$0xff]  }
 0x10b   : > { %2515 = vmatprep.mubr.bf16.mxu0 %v633_v4  ;;  %2544 = vmatpush3.bf16.msra.mxu0 %v2755_v19  ;;  %v2784_v4 = vld [vmem:[%s3542_s3 + $0x80] sm:$0xff]   ;;  %v1518_v19 = vpack.c.bf16 %v1514_v17, %v1513_v11 }
 0x10c   : > { %2545 = vmatprep.subr.bf16.mxu0 %v2757_v25 }
 0x10d   : > { %2570 = vmatpush3.bf16.msra.mxu1 %v2756_v23  ;;  %v2791_v23 = vld [vmem:[%s3542_s3 + $0x210] sm:$0xff]  }
 0x10e   : > { %2571 = vmatprep.subr.bf16.mxu1 %v2758_v26 }
 0x10f   : > { %2546 = vmatpush3.bf16.msra.mxu0 %v2757_v25  ;;  %v2793_v25 = vld [vmem:[%s3542_s3 + $0x200] sm:$0xff]  }
 0x110   : > { %2540 = vmatmul.mubr.bf16.gmra.mxu1 %v1089_v30  ;;  %2547 = vmatprep.subr.bf16.mxu0 %v2759_v29 }
 0x111   : > { %2572 = vmatpush3.bf16.msra.mxu1 %v2758_v26  ;;  %2583 = vmatprep.mubr.bf16.mxu1 %v1066_v33  ;;  %v1791_v26 = vld [vmem:[#allocation2 + $0x51] sm:$0xff] }
 0x112   : > { %2516 = vmatmul.mubr.bf16.gmra.mxu0 %v910_v34  ;;  %2573 = vmatprep.subr.bf16.mxu1 %v2760_v32  ;;  %v1795_v27 = vpack.c.bf16 %v1791_v26, %v1536_v18 }
 0x113   : > { %2548 = vmatpush3.bf16.msra.mxu0 %v2759_v29  ;;  %2559 = vmatprep.mubr.bf16.mxu0 %v1065_v36 }
 0x114   : > { %2549 = vmatprep.subr.bf16.mxu0 %v2761_v35 }
 0x115   : > { %2574 = vmatpush3.bf16.msra.mxu1 %v2760_v32 }
 0x116   : > { %2575 = vmatprep.subr.bf16.mxu1 %v2762_v37 }
 0x117   : > { %2550 = vmatpush3.bf16.msra.mxu0 %v2761_v35 }
 0x118   : > { %2551 = vmatprep.subr.bf16.mxu0 %v2763_v0 }
 0x119   : > { %2576 = vmatpush3.bf16.msra.mxu1 %v2762_v37 }
 0x11a   : > { %2577 = vmatprep.subr.bf16.mxu1 %v2764_v38 }
 0x11b   : > { %2552 = vmatpush3.bf16.msra.mxu0 %v2763_v0 }
 0x11c   : > { %2553 = vmatprep.subr.bf16.mxu0 %v2765_v39 }
 0x11d   : > { %2578 = vmatpush3.bf16.msra.mxu1 %v2764_v38 }
 0x11e   : > { %2579 = vmatprep.subr.bf16.mxu1 %v2766_v40 }
 0x11f   : > { %2554 = vmatpush3.bf16.msra.mxu0 %v2765_v39 }
 0x120   : > { %2555 = vmatprep.subr.bf16.mxu0 %v2767_v41 }
 0x121   : > { %2580 = vmatpush3.bf16.msra.mxu1 %v2766_v40 }
 0x122   : > { %2581 = vmatprep.subr.bf16.mxu1 %v2768_v42 }
 0x123   : > { %2556 = vmatpush3.bf16.msra.mxu0 %v2767_v41 }
 0x124   : > { %2557 = vmatprep.subr.bf16.mxu0 %v2769_v43 }
 0x125   : > { %2582 = vmatpush3.bf16.msra.mxu1 %v2768_v42 }
 0x126   : > { %2615 = vmatprep.subr.bf16.mxu1 %v2770_v44 }
 0x127   : > { %2558 = vmatpush3.bf16.msra.mxu0 %v2769_v43 }
 0x128   : > { %2584 = vmatmul.mubr.bf16.vlgmr.msra.gmra.mxu1 %v1342_v46  ;;  %2591 = vmatprep.subr.bf16.mxu0 %v2771_v45 }
 0x129   : > { %2587 = vmatprep.mubr.bf16.mxu1 %v1343_v48  ;;  %2616 = vmatpush3.bf16.msra.mxu1 %v2770_v44 }
 0x12a   : > { %2560 = vmatmul.mubr.bf16.vlgmr.msra.gmra.mxu0 %v1066_v33  ;;  %2617 = vmatprep.subr.bf16.mxu1 %v2772_v47 }
 0x12b   : > { %2563 = vmatprep.mubr.bf16.mxu0 %v1342_v46  ;;  %2592 = vmatpush3.bf16.msra.mxu0 %v2771_v45 }
 0x12c   : > { %2593 = vmatprep.subr.bf16.mxu0 %v2773_v49 }
 0x12d   : > { %2618 = vmatpush3.bf16.msra.mxu1 %v2772_v47 }
 0x12e   : > { %2619 = vmatprep.subr.bf16.mxu1 %v2774_v50 }
 0x12f   : > { %2594 = vmatpush3.bf16.msra.mxu0 %v2773_v49 }
 0x130   : > { %2588 = vmatmul.mubr.bf16.gmra.mxu1 %v1344_v54  ;;  %2595 = vmatprep.subr.bf16.mxu0 %v2775_v53 }
 0x131   : > { %2620 = vmatpush3.bf16.msra.mxu1 %v2774_v50  ;;  %2631 = vmatprep.mubr.bf16.mxu1 %v1515_v58 }
 0x132   : > { %2564 = vmatmul.mubr.bf16.gmra.mxu0 %v1343_v48  ;;  %2621 = vmatprep.subr.bf16.mxu1 %v2776_v57 }
 0x133   : > { %2596 = vmatpush3.bf16.msra.mxu0 %v2775_v53  ;;  %2607 = vmatprep.mubr.bf16.mxu0 %v1537_v60 }
 0x134   : > { %2597 = vmatprep.subr.bf16.mxu0 %v2777_v59 }
 0x135   : > { %2622 = vmatpush3.bf16.msra.mxu1 %v2776_v57 }
 0x136   : > { %2623 = vmatprep.subr.bf16.mxu1 %v2778_v61 }
 0x137   : > { %2598 = vmatpush3.bf16.msra.mxu0 %v2777_v59 }
 0x138   : > { %2599 = vmatprep.subr.bf16.mxu0 %v2779_v62 }
 0x139   : > { %2624 = vmatpush3.bf16.msra.mxu1 %v2778_v61 }
 0x13a   : > { %2625 = vmatprep.subr.bf16.mxu1 %v2780_v63 }
 0x13b   : > { %2600 = vmatpush3.bf16.msra.mxu0 %v2779_v62 }
 0x13c   : > { %2601 = vmatprep.subr.bf16.mxu0 %v2781_v1 }
 0x13d   : > { %2626 = vmatpush3.bf16.msra.mxu1 %v2780_v63 }
 0x13e   : > { %2627 = vmatprep.subr.bf16.mxu1 %v2782_v2 }
 0x13f   : > { %2602 = vmatpush3.bf16.msra.mxu0 %v2781_v1 }
 0x140   : > { %2603 = vmatprep.subr.bf16.mxu0 %v2783_v3 }
 0x141   : > { %2628 = vmatpush3.bf16.msra.mxu1 %v2782_v2 }
 0x142   : > { %2629 = vmatprep.subr.bf16.mxu1 %v2784_v4 }
 0x143   : > { %2604 = vmatpush3.bf16.msra.mxu0 %v2783_v3 }
 0x144   : > { %2605 = vmatprep.subr.bf16.mxu0 %v2785_v5 }
 0x145   : > { %2630 = vmatpush3.bf16.msra.mxu1 %v2784_v4 }
 0x146   : > { %2663 = vmatprep.subr.bf16.mxu1 %v2786_v6 }
 0x147   : > { %2606 = vmatpush3.bf16.msra.mxu0 %v2785_v5 }
 0x148   : > { %2632 = vmatmul.mubr.bf16.vlgmr.msra.gmra.mxu1 %v1516_v10  ;;  %2639 = vmatprep.subr.bf16.mxu0 %v2786_v6 }
 0x149   : > { %2635 = vmatprep.mubr.bf16.mxu1 %v1517_v13  ;;  %2671 = vmatpush3.bf16.msra.mxu1 %v2786_v6 }
 0x14a   : > { %2608 = vmatmul.mubr.bf16.vlgmr.msra.gmra.mxu0 %v1538_v14  ;;  %2664 = vmatprep.subr.bf16.mxu1 %v2787_v12 }
 0x14b   : > { %2611 = vmatprep.mubr.bf16.mxu0 %v1539_v15  ;;  %2640 = vmatpush3.bf16.msra.mxu0 %v2786_v6 }
 0x14c   : > { %2641 = vmatprep.subr.bf16.mxu0 %v2787_v12 }
 0x14d   : > { %2672 = vmatpush3.bf16.msra.mxu1 %v2787_v12 }
 0x14e   : > { %2665 = vmatprep.subr.bf16.mxu1 %v2788_v16 }
 0x14f   : > { %2642 = vmatpush3.bf16.msra.mxu0 %v2787_v12 }
 0x150   : > { %2636 = vmatmul.mubr.bf16.gmra.mxu1 %v1518_v19  ;;  %2643 = vmatprep.subr.bf16.mxu0 %v2788_v16 }
 0x151   : > { %2673 = vmatpush3.bf16.msra.mxu1 %v2788_v16  ;;  %2659 = vmatprep.mubr.bf16.mxu1 %v1518_v19 }
 0x152   : > { %2612 = vmatmul.mubr.bf16.gmra.mxu0 %v1540_v21  ;;  %2666 = vmatprep.subr.bf16.mxu1 %v2789_v20 }
 0x153   : > { %2644 = vmatpush3.bf16.msra.mxu0 %v2788_v16  ;;  %2655 = vmatprep.mubr.bf16.mxu0 %v1516_v10 }
 0x154   : > { %2645 = vmatprep.subr.bf16.mxu0 %v2789_v20 }
 0x155   : > { %2674 = vmatpush3.bf16.msra.mxu1 %v2789_v20 }
 0x156   : > { %2667 = vmatprep.subr.bf16.mxu1 %v2790_v22 }
 0x157   : > { %2646 = vmatpush3.bf16.msra.mxu0 %v2789_v20 }
 0x158   : > { %2647 = vmatprep.subr.bf16.mxu0 %v2790_v22 }
 0x159   : > { %2675 = vmatpush3.bf16.msra.mxu1 %v2790_v22 }
 0x15a   : > { %2668 = vmatprep.subr.bf16.mxu1 %v2791_v23 }
 0x15b   : > { %2648 = vmatpush3.bf16.msra.mxu0 %v2790_v22 }
 0x15c   : > { %2649 = vmatprep.subr.bf16.mxu0 %v2791_v23 }
 0x15d   : > { %2676 = vmatpush3.bf16.msra.mxu1 %v2791_v23 }
 0x15e   : > { %2669 = vmatprep.subr.bf16.mxu1 %v2792_v24 }
 0x15f   : > { %2650 = vmatpush3.bf16.msra.mxu0 %v2791_v23 }
 0x160   : > { %2651 = vmatprep.subr.bf16.mxu0 %v2792_v24 }
 0x161   : > { %2677 = vmatpush3.bf16.msra.mxu1 %v2792_v24 }
 0x162   : > { %2670 = vmatprep.subr.bf16.mxu1 %v2793_v25 }
 0x163   : > { %2652 = vmatpush3.bf16.msra.mxu0 %v2792_v24 }
 0x164   : > { %2653 = vmatprep.subr.bf16.mxu0 %v2793_v25 }
 0x165   : > { %2678 = vmatpush3.bf16.msra.mxu1 %v2793_v25 }
 0x167   : > { %2654 = vmatpush3.bf16.msra.mxu0 %v2793_v25 }
 0x168   : > { %2660 = vmatmul.mubr.bf16.vlgmr.msra.gmra.mxu1 %v1795_v27 }
 0x16a   : > { %2656 = vmatmul.mubr.bf16.vlgmr.msra.gmra.mxu0 %v1517_v13  ;;  %v605_v13 = vlaneseq }
 0x16c   : > { %v3308_v16 = vshrl.u32 %v605_v13, 7 }
 0x16e   : > { %v608_v19 = vadd.s32 16, %v3308_v16  ;;  %v3316_v20 = vadd.s32 24, %v3308_v16  ;;  %v3321_v22 = vadd.s32 8, %v3308_v16  ;;  %v612_v23 = vadd.s32 48, %v3308_v16 }
 0x16f   : > { %v610_v24 = vadd.s32 32, %v3308_v16  ;;  %v613_v25 = vadd.s32 56, %v3308_v16  ;;  %v3327_v26 = vadd.s32 40, %v3308_v16 }
 0x170   : > { %3563 = vst [vmem:[#allocation16_spill] sm:$0xff] %v3321_v22  ;;  %v616_v13 = vand.u32 7, %v608_v19 }
 0x172   : > { %vm3337_vm3 = vcmp.eq.s32.totalorder %v616_v13, 0  ;;  %vm3398_vm12 = vcmp.eq.s32.totalorder %v616_v13, 7 }
 0x1a8   : > { %v3232_v28 = vpop.f32.mrf.mxu1 }
 0x1a9   : > { %v3234_v29 = vpop.f32.mrf.mxu0 }
 0x1aa   : > { %v3236_v30 = vpop.f32.mrf.mxu1 }
 0x1ab   : > { %v3238_v31 = vpop.f32.mrf.mxu0 }
 0x1ac   : > { %v3240_v32 = vpop.f32.mrf.mxu1 }
 0x1ad   : > { %v3242_v33 = vpop.f32.mrf.mxu0 }
 0x1ae   : > { %v3244_v34 = vpop.f32.mrf.mxu1 }
 0x1af   : > { %v3246_v35 = vpop.f32.mrf.mxu0 }
 0x1b0   : > { %v3248_v36 = vpop.f32.mrf.mxu1 }
 0x1b2   : > { %v3250_v37 = vpop.f32.mrf.mxu0  ;;  %v3252_v0 = vpop.f32.mrf.mxu1 }
 0x1b4   : > { %v3254_v38 = vpop.f32.mrf.mxu0  ;;  %v3256_v39 = vpop.f32.mrf.mxu1 }
 0x1b6   : > { %v3258_v40 = vpop.f32.mrf.mxu0  ;;  %v3260_v41 = vpop.f32.mrf.mxu1 }
 0x1b8   : > { %v3262_v42 = vpop.f32.mrf.mxu0 }
 0x1c8   : > { %v2537_v43 = vpop.f32.mrf.mxu1 }
 0x1ca   : > { %v3264_v44 = vpop.f32.mrf.mxu0  ;;  %v1189_v45 = vpop.f32.mrf.mxu1 }
 0x1cc   : > { %v3266_v46 = vpop.f32.mrf.mxu0  ;;  %v2538_v47 = vpop.f32.mrf.mxu1 }
 0x1ce   : > { %v3268_v48 = vpop.f32.mrf.mxu0  ;;  %v1192_v49 = vpop.f32.mrf.mxu1 }
 0x1d0   : > { %v3270_v50 = vpop.f32.mrf.mxu0  ;;  %v3272_v51 = vpop.f32.mrf.mxu1 }
 0x1d2   : > { %v3274_v52 = vpop.f32.mrf.mxu0  ;;  %v3276_v53 = vpop.f32.mrf.mxu1 }
 0x1d3   : > { %3553 = vst [vmem:[#allocation6_spill] sm:$0xff] %v3274_v52 }
 0x1d4   : > { %v3278_v54 = vpop.f32.mrf.mxu0  ;;  %v3280_v55 = vpop.f32.mrf.mxu1 }
 0x1d5   : > { %3554 = vst [vmem:[#allocation7_spill] sm:$0xff] %v3278_v54 }
 0x1d6   : > { %v3282_v56 = vpop.f32.mrf.mxu0  ;;  %v3284_v57 = vpop.f32.mrf.mxu1 }
 0x1d7   : > { %3555 = vst [vmem:[#allocation8_spill] sm:$0xff] %v3282_v56  ;;  %v619_v56 = vand.u32 7, %v3327_v26 }
 0x1d8   : > { %v3286_v58 = vpop.f32.mrf.mxu0 }
 0x1d9   : > { %3556 = vst [vmem:[#allocation9_spill] sm:$0xff] %v3286_v58  ;;  %v621_v58 = vand.u32 7, %v613_v25  ;;  %vm3367_vm10 = vcmp.eq.s32.totalorder %v619_v56, 0  ;;  %vm3438_vm1 = vcmp.eq.s32.totalorder %v619_v56, 7 }
 0x1da   : > { %v3595_v52 = vld [vmem:[#allocation6_spill] sm:$0xff] }
 0x1db   : > { %vm3363_vm9 = vcmp.eq.s32.totalorder %v621_v58, 0  ;;  %vm3419_vm15 = vcmp.eq.s32.totalorder %v621_v58, 7 }
 0x1e8   : > { %v3288_v59 = vpop.f32.mrf.mxu1 }
 0x1ea   : > { %v2561_v60 = vpop.f32.mrf.mxu0  ;;  %v3290_v61 = vpop.f32.mrf.mxu1 }
 0x1ec   : > { %v1302_v62 = vpop.f32.mrf.mxu0  ;;  %v3292_v63 = vpop.f32.mrf.mxu1 }
 0x1ee   : > { %v2562_v1 = vpop.f32.mrf.mxu0  ;;  %v1447_v2 = vpop.f32.mrf.mxu1 }
 0x1f0   : > { %v1305_v3 = vpop.f32.mrf.mxu0  ;;  %v3294_v4 = vpop.f32.mrf.mxu1 }
 0x1f1   : > { %v1306_v26 = vadd.f32 %v1305_v3, %v1192_v49  ;;  %v877_v49 = vadd.f32 %v3232_v28, %v3234_v29  ;;  %v2302_v28 = vld [vmem:[%s3544_s5] ss:$0 sm:$0xff] }
 0x1f2   : > { %v2565_v5 = vpop.f32.mrf.mxu0  ;;  %v3296_v6 = vpop.f32.mrf.mxu1 }
 0x1f4   : > { %v1318_v7 = vpop.f32.mrf.mxu0  ;;  %v3298_v8 = vpop.f32.mrf.mxu1 }
 0x1f6   : > { %v2566_v9 = vpop.f32.mrf.mxu0  ;;  %v3300_v10 = vpop.f32.mrf.mxu1 }
 0x1f7   : > { %v1330_v3 = vadd.f32 %v2566_v9, %v3280_v55 }
 0x1f8   : > { %v1321_v11 = vpop.f32.mrf.mxu0 }
 0x208   : > { %v3302_v12 = vpop.f32.mrf.mxu1 }
 0x209   : > { %3557 = vst [vmem:[#allocation10_spill] sm:$0xff] %v3302_v12  ;;  %v620_v12 = vand.u32 7, %v612_v23  ;;  %v1303_v23 = vadd.f32 %v1302_v62, %v1189_v45  ;;  %v3582_v45 = vmov 0  ;;  %v1327_v62 = vadd.f32 %v2565_v5, %v3272_v51 }
 0x20a   : > { %v3304_v14 = vpop.f32.mrf.mxu0  ;;  %v3306_v15 = vpop.f32.mrf.mxu1  ;;  %v3583_v45 = vsel %vm3367_vm10, 4294967295, %v3582_v45 }
 0x20b   : > { %3558 = vst [vmem:[#allocation11_spill] sm:$0xff] %v3304_v14  ;;  %3559 = vst [vmem:[#allocation12_spill] sm:$0xff] %v3306_v15  ;;  %v617_v15 = vand.u32 7, %v3316_v20  ;;  %v618_v14 = vand.u32 7, %v610_v24  ;;  %v1314_v24 = vadd.f32 %v2562_v1, %v2538_v47  ;;  %vm3355_vm7 = vcmp.eq.s32.totalorder %v620_v12, 0 }
 0x20c   : > { %v3310_v17 = vpop.f32.mrf.mxu0  ;;  %v3312_v18 = vpop.f32.mrf.mxu1  ;;  %3584 = vst [vmem:[#allocation21_spill] sm:$0xff] %v3583_v45  ;;  %v1319_v1 = vadd.f32 %v1318_v7, %v3276_v53  ;;  %vm3383_vm11 = vcmp.eq.s32.totalorder %v620_v12, 7  ;;  %v1475_v29 = vadd.f32 %v3290_v61, %v1303_v23  ;;  %v1476_v53 = vadd.f32 %v1447_v2, %v1306_v26  ;;  %v3598_v7 = vld [vmem:[#allocation9_spill] sm:$0xff]  ;;  %v3605_v23 = vld [vmem:[#allocation16_spill] sm:$0xff] }
 0x20d   : > { %3560 = vst [vmem:[#allocation13_spill] sm:$0xff] %v3310_v17  ;;  %3561 = vst [vmem:[#allocation14_spill] sm:$0xff] %v3312_v18  ;;  %v614_v18 = vand.u32 7, %v3308_v16  ;;  %v3546_v17 = vand.u32 7, %v3321_v22  ;;  %vm3345_vm5 = vcmp.eq.s32.totalorder %v617_v15, 0  ;;  %vm3359_vm8 = vcmp.eq.s32.totalorder %v618_v14, 0 }
 0x20e   : > { %v3318_v21 = vpop.f32.mrf.mxu0  ;;  %v3329_v27 = vpop.f32.mrf.mxu1  ;;  %v880_v22 = vadd.f32 %v3240_v32, %v3242_v33  ;;  %v1478_v51 = vadd.f32 %v3292_v63, %v1314_v24  ;;  %v885_v32 = vadd.f32 %v3252_v0, %v3254_v38  ;;  %v896_v33 = vadd.f32 %v3256_v39, %v3258_v40 }
 0x20f   : > { %3562 = vst [vmem:[#allocation15_spill] sm:$0xff] %v3318_v21  ;;  %3564 = vst [vmem:[#allocation17_spill] sm:$0xff] %v3329_v27  ;;  %v1311_v27 = vadd.f32 %v2561_v60, %v2537_v43  ;;  %vm3341_vm4 = vcmp.eq.s32.totalorder %v614_v18, 0  ;;  %vm3351_vm6 = vcmp.eq.s32.totalorder %v3546_v17, 0  ;;  %v3576_v60 = vmov 0 }
 0x210   : > { %v3333_v21 = vpop.f32.mrf.mxu0  ;;  %v2637_v54 = vpop.f32.mrf.mxu1  ;;  %v3577_v60 = vsel %vm3359_vm8, 4294967295, %v3576_v60  ;;  %v869_v17 = vadd.f32 %v3236_v30, %v3238_v31  ;;  %v1322_v30 = vadd.f32 %v1321_v11, %v3284_v57  ;;  %v893_v31 = vadd.f32 %v3248_v36, %v3250_v37 }
 0x211   : > { %3565 = vst [vmem:[#allocation18_spill] sm:$0xff] %v3333_v21  ;;  %3578 = vst [vmem:[#allocation19_spill] sm:$0xff] %v3577_v60  ;;  %v3579_v21 = vmov 0  ;;  %v1477_v45 = vadd.f32 %v3288_v59, %v1311_v27  ;;  %vm3402_vm13 = vcmp.eq.s32.totalorder %v618_v14, 7  ;;  %v1043_v36 = vadd.f32 %v3264_v44, %v877_v49  ;;  %v3611_v49 = vld [vmem:[#allocation10_spill] sm:$0xff] }
 0x212   : > { %v2613_v20 = vpop.f32.mrf.mxu0  ;;  %v3580_v21 = vsel %vm3363_vm9, 4294967295, %v3579_v21  ;;  %v1769_v47 = vpop.f32.mrf.mxu1  ;;  %v1481_v37 = vadd.f32 %v3294_v4, %v1327_v62  ;;  %v1479_v0 = vadd.f32 %v3296_v6, %v1319_v1  ;;  %v1482_v38 = vadd.f32 %v3298_v8, %v1330_v3  ;;  %v3596_v4 = vld [vmem:[#allocation7_spill] sm:$0xff]  ;;  %v3597_v6 = vld [vmem:[#allocation8_spill] sm:$0xff] }
 0x213   : > { %3581 = vst [vmem:[#allocation20_spill] sm:$0xff] %v3580_v21  ;;  %v872_v21 = vadd.f32 %v3244_v34, %v3246_v35  ;;  %v888_v34 = vadd.f32 %v3260_v41, %v3262_v42  ;;  %v1041_v39 = vadd.f32 %v3266_v46, %v869_v17  ;;  %v1044_v40 = vadd.f32 %v3268_v48, %v880_v22  ;;  %v3613_v3 = vld [vmem:[#allocation12_spill] sm:$0xff] }
 0x214   : > { %v1656_v60 = vpop.f32.mrf.mxu0  ;;  %v2638_v35 = vpop.f32.mrf.mxu1  ;;  %v1485_v42 = vsel %vm3337_vm3, 0.0, %v1477_v45  ;;  %vm3415_vm14 = vcmp.eq.s32.totalorder %v614_v18, 7  ;;  %v1483_v63 = vsel %vm3341_vm4, 0.0, %v1475_v29  ;;  %v1486_v46 = vsel %vm3345_vm5, 0.0, %v1478_v51  ;;  %v3610_v45 = vld [vmem:[#allocation11_spill] sm:$0xff]  ;;  %v3612_v1 = vld [vmem:[#allocation13_spill] sm:$0xff] }
 0x215   : > { %v1042_v41 = vadd.f32 %v3270_v50, %v872_v21  ;;  %v1484_v48 = vsel %vm3351_vm6, 0.0, %v1476_v53  ;;  %v1480_v50 = vadd.f32 %v3300_v10, %v1322_v30  ;;  %v1047_v2 = vadd.f32 %v3595_v52, %v893_v31 }
 0x216   : > { %v2614_v57 = vpop.f32.mrf.mxu0  ;;  %v1045_v5 = vadd.f32 %v3596_v4, %v885_v32  ;;  %v1048_v58 = vadd.f32 %v3597_v6, %v896_v33  ;;  %v1046_v8 = vadd.f32 %v3598_v7, %v888_v34  ;;  %v1772_v9 = vpop.f32.mrf.mxu1  ;;  %vm3434_vm0 = vcmp.eq.s32.totalorder %v617_v15, 7  ;;  %v3617_v52 = vld [vmem:[#allocation17_spill] sm:$0xff] }
 0x217   : > { %v1489_v10 = vsel %vm3355_vm7, 0.0, %v1481_v37  ;;  %v1487_v17 = vsel %vm3359_vm8, 0.0, %v1479_v0  ;;  %v1490_v21 = vsel %vm3363_vm9, 0.0, %v1482_v38  ;;  %v1778_v22 = vadd.f32 %v2637_v54, %v2613_v20  ;;  %v3614_v37 = vld [vmem:[#allocation15_spill] sm:$0xff]  ;;  %v3615_v0 = vld [vmem:[#allocation14_spill] sm:$0xff] }
 0x218   : > { %v1659_v27 = vpop.f32.mrf.mxu0  ;;  %v1493_v15 = vadd.f32 %v1485_v42, %v1043_v36  ;;  %v1491_v19 = vadd.f32 %v1483_v63, %v1041_v39  ;;  %v1494_v16 = vadd.f32 %v1486_v46, %v1044_v40  ;;  %v1492_v56 = vadd.f32 %v1484_v48, %v1042_v41  ;;  %v2301_v36 = vld [vmem:[%s3543_s4] ss:$0 sm:$0xff] }
 0x219   : > { %v3606_v24 = vand.u32 7, %v3605_v23  ;;  %v1488_v43 = vsel %vm3367_vm10, 0.0, %v1480_v50  ;;  %v1762_v62 = vadd.f32 %v3611_v49, %v3610_v45  ;;  %v1770_v54 = vadd.f32 %v1769_v47, %v1656_v60  ;;  %v3616_v50 = vld [vmem:[#allocation18_spill] sm:$0xff] }
 0x21a   : > { %v1754_v29 = vadd.f32 %v3613_v3, %v3612_v1  ;;  %v1497_v51 = vadd.f32 %v1489_v10, %v1047_v2  ;;  %v1495_v30 = vadd.f32 %v1487_v17, %v1045_v5  ;;  %v1498_v32 = vadd.f32 %v1490_v21, %v1048_v58 }
 0x21b   : > { %vm3450_vm2 = vcmp.eq.s32.totalorder %v3606_v24, 7  ;;  %v1781_v33 = vadd.f32 %v2638_v35, %v2614_v57  ;;  %v1765_v38 = vadd.f32 %v3615_v0, %v3614_v37  ;;  %v1773_v39 = vadd.f32 %v1772_v9, %v1659_v27 }
 0x21c   : > { %v1496_v63 = vadd.f32 %v1488_v43, %v1046_v8  ;;  %v1757_v2 = vadd.f32 %v3617_v52, %v3616_v50 }
 0x228   : > { %v2661_v13 = vpop.f32.mrf.mxu1 }
 0x229   : > { %v1932_v20 = vadd.f32 %v2661_v13, %v1778_v22 }
 0x22a   : > { %v2657_v53 = vpop.f32.mrf.mxu0  ;;  %v1911_v31 = vpop.f32.mrf.mxu1 }
 0x22b   : > { %v1940_v34 = vsel %vm3383_vm11, 0.0, %v1932_v20  ;;  %v1928_v60 = vadd.f32 %v2657_v53, %v1762_v62  ;;  %v1930_v47 = vadd.f32 %v1911_v31, %v1770_v54 }
 0x22c   : > { %v1948_v40 = vadd.f32 %v1940_v34, %v1497_v51  ;;  %v1895_v41 = vpop.f32.mrf.mxu0  ;;  %v2662_v42 = vpop.f32.mrf.mxu1 }
 0x22d   : > { %v1936_v35 = vsel %vm3398_vm12, 0.0, %v1928_v60  ;;  %v1938_v57 = vsel %vm3402_vm13, 0.0, %v1930_v47  ;;  %v1926_v46 = vadd.f32 %v1895_v41, %v1754_v29  ;;  %v1933_v48 = vadd.f32 %v2662_v42, %v1781_v33 }
 0x22e   : > { %v1963_v4 = vmul.f32 %v2301_v36, %v1948_v40  ;;  %v1944_v5 = vadd.f32 %v1936_v35, %v1493_v15  ;;  %v1946_v6 = vadd.f32 %v1938_v57, %v1495_v30  ;;  %v2658_v58 = vpop.f32.mrf.mxu0  ;;  %v1914_v7 = vpop.f32.mrf.mxu1 }
 0x22f   : > { %v1934_v8 = vsel %vm3415_vm14, 0.0, %v1926_v46  ;;  %v1941_v55 = vsel %vm3419_vm15, 0.0, %v1933_v48  ;;  %v1929_v59 = vadd.f32 %v2658_v58, %v1765_v38  ;;  %v1931_v9 = vadd.f32 %v1914_v7, %v1773_v39 }
 0x230   : > { %v1978_v10 = vadd.f32 %v2302_v28, %v1963_v4  ;;  %v1959_v14 = vmul.f32 %v2301_v36, %v1944_v5  ;;  %v1961_v17 = vmul.f32 %v2301_v36, %v1946_v6  ;;  %v1942_v18 = vadd.f32 %v1934_v8, %v1491_v19  ;;  %v1898_v21 = vpop.f32.mrf.mxu0 }
 0x231   : > { %v1949_v22 = vadd.f32 %v1941_v55, %v1498_v32  ;;  %v1937_v27 = vsel %vm3434_vm0, 0.0, %v1929_v59  ;;  %v1939_v13 = vsel %vm3438_vm1, 0.0, %v1931_v9  ;;  %v1927_v15 = vadd.f32 %v1898_v21, %v1757_v2 }
 0x232   : > { %v1986_v61 = vmax.f32 %v1978_v10, 0.0  ;;  %v1974_v23 = vadd.f32 %v2302_v28, %v1959_v14  ;;  %v1976_v24 = vadd.f32 %v2302_v28, %v1961_v17  ;;  %v1957_v44 = vmul.f32 %v2301_v36, %v1942_v18 }
 0x233   : > { %v1964_v26 = vmul.f32 %v2301_v36, %v1949_v22  ;;  %v1945_v43 = vadd.f32 %v1937_v27, %v1494_v16  ;;  %v1947_v45 = vadd.f32 %v1939_v13, %v1496_v63  ;;  %v1935_v19 = vsel %vm3450_vm2, 0.0, %v1927_v15 }
 0x234   : > { %1994 = vst [vmem:[%s259_s19 + $0x30] sm:$0xff] %v1986_v61  ;;  %v1982_v49 = vmax.f32 %v1974_v23, 0.0  ;;  %v1984_v11 = vmax.f32 %v1976_v24, 0.0  ;;  %v1972_v62 = vadd.f32 %v2302_v28, %v1957_v44  ;;  %v1943_v54 = vadd.f32 %v1935_v19, %v1492_v56 }
 0x235   : > { %v1979_v12 = vadd.f32 %v2302_v28, %v1964_v26  ;;  %v1960_v20 = vmul.f32 %v2301_v36, %v1945_v43  ;;  %v1962_v1 = vmul.f32 %v2301_v36, %v1947_v45 }
 0x236   : > { %1990 = vst [vmem:[%s259_s19 + $0x10] sm:$0xff] %v1982_v49  ;;  %1992 = vst [vmem:[%s259_s19 + $0x20] sm:$0xff] %v1984_v11  ;;  %v1980_v3 = vmax.f32 %v1972_v62, 0.0  ;;  %v1958_v29 = vmul.f32 %v2301_v36, %v1943_v54 }
 0x237   : > { %v1987_v16 = vmax.f32 %v1979_v12, 0.0  ;;  %v1975_v51 = vadd.f32 %v2302_v28, %v1960_v20  ;;  %v1977_v25 = vadd.f32 %v2302_v28, %v1962_v1 }
 0x238   : > { %1988 = vst [vmem:[%s259_s19] sm:$0xff] %v1980_v3  ;;  %v1973_v53 = vadd.f32 %v2302_v28, %v1958_v29 }
 0x239   : > { %1995 = vst [vmem:[%s259_s19 + $0x38] sm:$0xff] %v1987_v16  ;;  %v1983_v30 = vmax.f32 %v1975_v51, 0.0  ;;  %v1985_v31 = vmax.f32 %v1977_v25, 0.0 }
 0x23a   : > { %v1981_v56 = vmax.f32 %v1973_v53, 0.0 }
 0x23b   : > { %1991 = vst [vmem:[%s259_s19 + $0x18] sm:$0xff] %v1983_v30  ;;  %1993 = vst [vmem:[%s259_s19 + $0x28] sm:$0xff] %v1985_v31 }
 0x23c   : > { %1989 = vst [vmem:[%s259_s19 + $0x8] sm:$0xff] %v1981_v56 }
 0x23d   : > { %2807 = shalt.err (!%p2804_p3)
}
 0x23e   : > { %s2808_s13 = scalar_lea.hbm %s3493_s9, 1024  ;;  %s2812_s17 = scalar_lea.hbm %s3545_s6, 2048 }
 0x23f   : > { %p2809_p4 = scmp.ne.s32.totalorder %s3493_s9, %s2808_s13  ;;  %p2813_p9 = scmp.lt.s32.totalorder %s3493_s9, %s3545_s6 }
 0x240   : > { %p2814_p10 = scmp.lt.s32.totalorder %s2812_s17, %s2808_s13 }
 0x241   : > { %p2810_p7 = pnand %p2809_p4, %p2934_p5 }
 0x242   : > { %p2815_p11 = por %p2814_p10, %p2813_p9 }
 0x243   : > { %p2811_p8 = pneg %p2810_p7 }
 0x245   : > { %p2816_p12 = pnand %p2815_p11, %p2811_p8 }
 0x247   : > { %2819 = shalt.err (!%p2816_p12)
}
 0x248   : > { %s2859_s20 = smov 128   ;;  %s2860_s28 = smov 8  }
 0x249   : > { %2679 = dma.vmem_to_hbm [thread:$0]  (%p2934_p5), %s3495_s26, 1024, %s3493_s9, %s3499_s25, %s2859_s20, %s2859_s20, %s2860_s28  }
 0x24a PF: > { %p2685_p13 = scmp.ge.s32.totalorder %s2854_s24, 2  ;;  %s2025_s29 = sand.u32 1, %s2842_s21  }
 0x24b   : > { %s2026_s10 = scalar_lea.sflag [#allocation4], %s2025_s29 }
 0x24c   : > { %p2682_p0 = pnand %p2685_p13, %p2938_p6 }
 0x24e   : > { %p2683_p1 = pneg %p2682_p0 }
 0x250   : > { %2837 = dma.done.wait (%p2683_p1), %s2026_s10, 1024  }
 0x251   : > { %2839 = vsyncadd (%p2683_p1), %s2026_s10, 4294966272  ;;  %p16_p2 = scmp.ge.s32.totalorder %s2921_s27, 4   ;;  %s3618_s21 = smov %s2846_s22 }
 0x252   : > { %s3619_s22 = smov %s2850_s23  ;;  %s3620_s23 = smov %s2932_s30 }
 0x253   : > { %s3621_s24 = smov %s2921_s27  ;;  %18 = sbr.rel (!%p16_p2) target bundleno = 3 (0x3), region = 90 }
 0x258   :  { %2031 = vsyncpa [#allocation4], 1 }
 0x259   :  { %2033 = vsyncpa [#allocation4 + $0x1], 1 }

</bundles_post_ra>
